<compile_context>
chip_gen: v7x
topology: tpu7x:2x2x1
jax: 0.10.0
libtpu: 0.0.40
codegen_flags: <defaults>
</compile_context>

<pallas_src>
import re

import jax
import jax.numpy as jnp
import numpy as np
from jax import lax
from jax.experimental import pallas as pl
from jax.experimental.pallas import tpu as pltpu

_LANE = 128


# ---------------------------------------------------------------------------
# Hardware-generation helpers
# ---------------------------------------------------------------------------
def _pad_to(n: int, m: int) -> int:
    return ((n + m - 1) // m) * m


def _tpu_generation(default: int = 6) -> int:
    devs = jax.devices()
    if not devs or devs[0].platform != "tpu":
        return default
    m = re.search(r"(\d+)", devs[0].device_kind)
    return int(m.group(1)) if m else default


def default_batch_tile(gen: int | None = None) -> int:
    gen = _tpu_generation() if gen is None else gen
    # v5e MXU is 4x128^2 -> 128-row tiles are native; v6e/v7x MXUs are 256 wide.
    return 128 if gen <= 5 else 256


def _vmem_cap_bytes(gen: int) -> int:
    # v5e/v6e: 128 MiB physical VMEM -> allow ~100 MiB scoped.
    # v7x: only 64 MiB physical -> keep the 64 MiB ceiling.
    return (100 << 20) if gen <= 6 else (64 << 20)


# ---------------------------------------------------------------------------
# Kernel
# ---------------------------------------------------------------------------
def _make_kernel(num_resnet_blocks: int):
    nblk = num_resnet_blocks

    def kernel(x_ref, w1_ref, b1_ref, w2_ref, b2_ref,
               wa_ref, ba_ref, wb_ref, bb_ref, wo_ref, bo_ref, o_ref):

        def mm(a, w):
            # bf16 x bf16 MXU matmul with f32 accumulation.
            return jnp.dot(a.astype(jnp.bfloat16), w,
                           preferred_element_type=jnp.float32)

        # first_fc: Linear + ReLU, Linear + ReLU
        h = jnp.maximum(mm(x_ref[...], w1_ref[...]) + b1_ref[...], 0.0)
        h = jnp.maximum(mm(h, w2_ref[...]) + b2_ref[...], 0.0)

        # resnet blocks over stacked [nblk, R, R] weights (bounded live ranges)
        def block_body(blk, h):
            res = h
            z = jnp.maximum(mm(h, wa_ref[blk]) + ba_ref[blk], 0.0)   # RELU layer
            z = mm(z, wb_ref[blk]) + bb_ref[blk]                     # LINEAR layer
            return jnp.maximum(z + res, 0.0)                         # residual+ReLU

        h = lax.fori_loop(0, nblk, block_body, h, unroll=(nblk <= 4))

        # final output linear (no activation); lane dim padded to >=128 so the
        # store is a full-width unmasked vst.
        o_ref[...] = (mm(h, wo_ref[...]) + bo_ref[...]).astype(o_ref.dtype)

    return kernel


# ---------------------------------------------------------------------------
# Wrapper
# ---------------------------------------------------------------------------
def cube3_fc_resnet_forward(x, params, *, batch_tile: int | None = None,
                            single_buffer_params: bool = True):
    """params: dict with w1,b1,w2,b2, blocks=[(wa,ba,wb,bb),...], w_out,b_out (f32)."""
    gen = _tpu_generation()
    if batch_tile is None:
        batch_tile = default_batch_tile(gen)
    assert batch_tile % 8 == 0

    B, input_dim = x.shape
    num_resnet_blocks = len(params["blocks"])
    assert num_resnet_blocks >= 1

    bf, f32 = jnp.bfloat16, jnp.float32
    h1_dim = params["w1"].shape[1]
    resnet_dim = params["w2"].shape[1]
    out_dim = params["w_out"].shape[1]

    # 128-align every feature/contraction dim (zero padding is exact and does
    # not change any real output element: padded activations stay 0 and padded
    # weight rows/cols are 0).
    k_pad = _pad_to(input_dim, _LANE)
    h1_pad = _pad_to(h1_dim, _LANE)
    r_pad = _pad_to(resnet_dim, _LANE)
    out_pad = _pad_to(max(out_dim, _LANE), _LANE)

    def pad2(w, rows, cols):
        r, c = w.shape
        return jnp.pad(w, ((0, rows - r), (0, cols - c)))

    # bf16 weights (MXU-native), f32 biases; resnet block params stacked.
    w1 = pad2(params["w1"], k_pad, h1_pad).astype(bf)
    b1 = pad2(params["b1"], 1, h1_pad).astype(f32)
    w2 = pad2(params["w2"], h1_pad, r_pad).astype(bf)
    b2 = pad2(params["b2"], 1, r_pad).astype(f32)
    wa = jnp.stack([pad2(blk[0], r_pad, r_pad) for blk in params["blocks"]]).astype(bf)
    ba = jnp.stack([pad2(blk[1], 1, r_pad) for blk in params["blocks"]]).astype(f32)
    wb = jnp.stack([pad2(blk[2], r_pad, r_pad) for blk in params["blocks"]]).astype(bf)
    bb = jnp.stack([pad2(blk[3], 1, r_pad) for blk in params["blocks"]]).astype(f32)
    w_out = pad2(params["w_out"], r_pad, out_pad).astype(bf)
    b_out = pad2(params["b_out"], 1, out_pad).astype(f32)
    flat_params = [w1, b1, w2, b2, wa, ba, wb, bb, w_out, b_out]

    # Pad batch to a multiple of batch_tile and the feature dim to k_pad.
    # NOTE: padded batch rows (all-zero inputs) produce bias-only outputs in
    # the padded region of the result; they are sliced off below and must not
    # be read by callers.
    B_pad = _pad_to(B, batch_tile)
    x_in = jnp.pad(x, ((0, B_pad - B), (0, k_pad - input_dim)))
    grid = (B_pad // batch_tile,)

    x_spec = pl.BlockSpec((batch_tile, k_pad), lambda i: (i, 0))
    out_spec = pl.BlockSpec((batch_tile, out_pad), lambda i: (i, 0))

    # Grid-invariant params: a single VMEM buffer suffices (pl.Buffered(1)).
    # Explicit capability check instead of a blanket try/except so real
    # compile/VMEM failures surface loudly.
    use_single_buffer = bool(single_buffer_params) and hasattr(pl, "Buffered")

    param_specs = []
    for p in flat_params:
        idx_map = (lambda i, nd=p.ndim: (0,) * nd)
        if use_single_buffer:
            param_specs.append(pl.BlockSpec(p.shape, idx_map,
                                            pipeline_mode=pl.Buffered(1)))
        else:
            param_specs.append(pl.BlockSpec(p.shape, idx_map))

    # Cost estimate + explicit VMEM budget (generation-dependent cap).
    flops = 2 * B_pad * (k_pad * h1_pad
                         + h1_pad * r_pad
                         + num_resnet_blocks * 2 * r_pad * r_pad
                         + r_pad * out_pad)
    param_bytes = sum(int(np.prod(p.shape)) * p.dtype.itemsize for p in flat_params)
    bytes_accessed = int(x_in.size * x_in.dtype.itemsize
                         + B_pad * out_pad * 4 + param_bytes)
    cost = pl.CostEstimate(flops=int(flops), transcendentals=0,
                           bytes_accessed=bytes_accessed)

    max_dim = max(k_pad, h1_pad, r_pad, out_pad)
    param_resident = param_bytes * (1 if use_single_buffer else 2)
    vmem_need = (param_resident
                 + 2 * batch_tile * (k_pad * 4 + out_pad * 4)   # dbl-buffered x/out tiles
                 + 8 * batch_tile * max_dim * 4                 # activation / spill slack
                 + (2 << 20))
    vmem_limit = int(min(max(vmem_need, 32 << 20), _vmem_cap_bytes(gen)))

    kernel = _make_kernel(num_resnet_blocks)

    fn = pl.pallas_call(
        kernel,
        out_shape=jax.ShapeDtypeStruct((B_pad, out_pad), jnp.float32),
        grid=grid,
        in_specs=[x_spec] + param_specs,
        out_specs=out_spec,
        compiler_params=pltpu.CompilerParams(
            dimension_semantics=("parallel",),
            vmem_limit_bytes=vmem_limit),
        cost_estimate=cost,
    )
    out = fn(x_in, *flat_params)

    return out[:B, :out_dim]


# ---------------------------------------------------------------------------
# Deterministic parameter construction + matching pure-JAX reference
# ---------------------------------------------------------------------------
def init_params(key, input_dim, h1_dim, resnet_dim, num_resnet_blocks, out_dim):
    def linear(k, fan_in, fan_out):
        kw, kb = jax.random.split(k)
        scale = 1.0 / np.sqrt(fan_in)
        w = jax.random.uniform(kw, (fan_in, fan_out), jnp.float32, -scale, scale)
        b = jax.random.uniform(kb, (1, fan_out), jnp.float32, -scale, scale)
        return w, b

    keys = jax.random.split(key, 3 + 2 * num_resnet_blocks)
    w1, b1 = linear(keys[0], input_dim, h1_dim)
    w2, b2 = linear(keys[1], h1_dim, resnet_dim)
    blocks = []
    for i in range(num_resnet_blocks):
        wa, ba = linear(keys[2 + 2 * i], resnet_dim, resnet_dim)
        wb, bb = linear(keys[3 + 2 * i], resnet_dim, resnet_dim)
        blocks.append((wa, ba, wb, bb))
    w_out, b_out = linear(keys[-1], resnet_dim, out_dim)
    return dict(w1=w1, b1=b1, w2=w2, b2=b2, blocks=blocks, w_out=w_out, b_out=b_out)


def reference_forward(x, params):
    """Pure-JAX reference emulating the kernel's bf16-input / f32-accum matmuls."""
    bf = jnp.bfloat16

    def mm(a, w):
        return jnp.dot(a.astype(bf), w.astype(bf),
                       preferred_element_type=jnp.float32)

    h = jnp.maximum(mm(x, params["w1"]) + params["b1"], 0.0)
    h = jnp.maximum(mm(h, params["w2"]) + params["b2"], 0.0)
    for (wa, ba, wb, bb) in params["blocks"]:
        res = h
        z = jnp.maximum(mm(h, wa) + ba, 0.0)
        z = mm(z, wb) + bb
        h = jnp.maximum(z + res, 0.0)
    return mm(h, params["w_out"]) + params["b_out"]


# ---------------------------------------------------------------------------
if __name__ == "__main__":
    # Shapes consistent with the module (x: [B, input_dim]).  B gives the grid
    # 16 steps (>= 8 per TensorCore on v7x megacore) so x/out tile DMAs are
    # actually hidden under neighbouring steps' matmuls.
    gen = _tpu_generation()
    batch_tile = default_batch_tile(gen)
    B = 16 * batch_tile
    input_dim = 324          # 54 stickers x 6 colors (Cube3 one-hot encoding)
    h1_dim = 256
    resnet_dim = 128
    num_resnet_blocks = 2
    out_dim = 1              # cost-to-go head, as in DeepCubeA

    key = jax.random.PRNGKey(0)
    k_x, k_p = jax.random.split(key)
    x = jax.random.normal(k_x, (B, input_dim), jnp.float32)
    params = init_params(k_p, input_dim, h1_dim, resnet_dim,
                         num_resnet_blocks, out_dim)

    out = cube3_fc_resnet_forward(x, params, batch_tile=batch_tile)
    out = jax.block_until_ready(out)

    ref = jax.block_until_ready(reference_forward(x, params))
    assert out.shape == (B, out_dim)
    # bf16 matmul inputs, f32 accumulation -> tight tolerance vs. matching ref.
    np.testing.assert_allclose(np.asarray(out), np.asarray(ref),
                               rtol=2e-3, atol=2e-3)

    print("KERNEL_OK")
</pallas_src>

<mosaic_0001>
module attributes {stable_mosaic.version = 11 : i64} {
  func.func @kernel(%arg0: i32, %arg1: memref<256x384xf32, #tpu.memory_space<vmem>>, %arg2: memref<384x256xbf16, #tpu.memory_space<vmem>>, %arg3: memref<1x256xf32, #tpu.memory_space<vmem>>, %arg4: memref<256x128xbf16, #tpu.memory_space<vmem>>, %arg5: memref<1x128xf32, #tpu.memory_space<vmem>>, %arg6: memref<2x128x128xbf16, #tpu.memory_space<vmem>>, %arg7: memref<2x1x128xf32, #tpu.memory_space<vmem>>, %arg8: memref<2x128x128xbf16, #tpu.memory_space<vmem>>, %arg9: memref<2x1x128xf32, #tpu.memory_space<vmem>>, %arg10: memref<128x128xbf16, #tpu.memory_space<vmem>>, %arg11: memref<1x128xf32, #tpu.memory_space<vmem>>, %arg12: memref<256x128xf32, #tpu.memory_space<vmem>>) attributes {dimension_semantics = [#tpu.dimension_semantics<parallel>], iteration_bounds = array<i64: 16>, scalar_prefetch = 0 : i64, scratch_operands = 0 : i64, tpu.core_type = #tpu.core_type<tc>, window_params = [{transform_indices = @transform_0, window_bounds = array<i64: 256, 384>}, {pipeline_mode = #tpu.pipeline_mode<synchronous>, transform_indices = @transform_1, window_bounds = array<i64: 384, 256>}, {pipeline_mode = #tpu.pipeline_mode<synchronous>, transform_indices = @transform_2, window_bounds = array<i64: 1, 256>}, {pipeline_mode = #tpu.pipeline_mode<synchronous>, transform_indices = @transform_3, window_bounds = array<i64: 256, 128>}, {pipeline_mode = #tpu.pipeline_mode<synchronous>, transform_indices = @transform_4, window_bounds = array<i64: 1, 128>}, {pipeline_mode = #tpu.pipeline_mode<synchronous>, transform_indices = @transform_5, window_bounds = array<i64: 2, 128, 128>}, {pipeline_mode = #tpu.pipeline_mode<synchronous>, transform_indices = @transform_6, window_bounds = array<i64: 2, 1, 128>}, {pipeline_mode = #tpu.pipeline_mode<synchronous>, transform_indices = @transform_7, window_bounds = array<i64: 2, 128, 128>}, {pipeline_mode = #tpu.pipeline_mode<synchronous>, transform_indices = @transform_8, window_bounds = array<i64: 2, 1, 128>}, {pipeline_mode = #tpu.pipeline_mode<synchronous>, transform_indices = @transform_9, window_bounds = array<i64: 128, 128>}, {pipeline_mode = #tpu.pipeline_mode<synchronous>, transform_indices = @transform_10, window_bounds = array<i64: 1, 128>}, {transform_indices = @transform_11, window_bounds = array<i64: 256, 128>}]} {
    %c0 = arith.constant 0 : index
    %c0_0 = arith.constant 0 : index
    %0 = vector.load %arg1[%c0, %c0_0] : memref<256x384xf32, #tpu.memory_space<vmem>>, vector<256x384xf32>
    %c0_1 = arith.constant 0 : index
    %c0_2 = arith.constant 0 : index
    %1 = vector.load %arg2[%c0_1, %c0_2] : memref<384x256xbf16, #tpu.memory_space<vmem>>, vector<384x256xbf16>
    %2 = arith.truncf %0 : vector<256x384xf32> to vector<256x384xbf16>
    %cst = arith.constant dense<0.000000e+00> : vector<256x256xf32>
    %3 = tpu.matmul %2, %1, %cst {dimension_numbers = #tpu.dot_dimension_numbers<[1], [0], [0], [1], [0, 0, 1, 1], [], []>} : vector<256x384xbf16>, vector<384x256xbf16>, vector<256x256xf32> -> vector<256x256xf32>
    %c0_3 = arith.constant 0 : index
    %c0_4 = arith.constant 0 : index
    %4 = vector.load %arg3[%c0_3, %c0_4] : memref<1x256xf32, #tpu.memory_space<vmem>>, vector<1x256xf32>
    %5 = vector.broadcast %4 : vector<1x256xf32> to vector<256x256xf32>
    %6 = arith.addf %3, %5 : vector<256x256xf32>
    %cst_5 = arith.constant 0.000000e+00 : f32
    %7 = vector.broadcast %cst_5 : f32 to vector<256x256xf32>
    %8 = arith.maximumf %6, %7 : vector<256x256xf32>
    %c0_6 = arith.constant 0 : index
    %c0_7 = arith.constant 0 : index
    %9 = vector.load %arg4[%c0_6, %c0_7] : memref<256x128xbf16, #tpu.memory_space<vmem>>, vector<256x128xbf16>
    %10 = arith.truncf %8 : vector<256x256xf32> to vector<256x256xbf16>
    %cst_8 = arith.constant dense<0.000000e+00> : vector<256x128xf32>
    %11 = tpu.matmul %10, %9, %cst_8 {dimension_numbers = #tpu.dot_dimension_numbers<[1], [0], [0], [1], [0, 0, 1, 1], [], []>} : vector<256x256xbf16>, vector<256x128xbf16>, vector<256x128xf32> -> vector<256x128xf32>
    %c0_9 = arith.constant 0 : index
    %c0_10 = arith.constant 0 : index
    %12 = vector.load %arg5[%c0_9, %c0_10] : memref<1x128xf32, #tpu.memory_space<vmem>>, vector<1x128xf32>
    %13 = vector.broadcast %12 : vector<1x128xf32> to vector<256x128xf32>
    %14 = arith.addf %11, %13 : vector<256x128xf32>
    %cst_11 = arith.constant 0.000000e+00 : f32
    %15 = vector.broadcast %cst_11 : f32 to vector<256x128xf32>
    %16 = arith.maximumf %14, %15 : vector<256x128xf32>
    %c0_i32 = arith.constant 0 : i32
    %17 = arith.index_cast %c0_i32 : i32 to index
    %c0_12 = arith.constant 0 : index
    %c0_13 = arith.constant 0 : index
    %18 = vector.load %arg6[%17, %c0_12, %c0_13] : memref<2x128x128xbf16, #tpu.memory_space<vmem>>, vector<1x128x128xbf16>
    %19 = vector.shape_cast %18 : vector<1x128x128xbf16> to vector<128x128xbf16>
    %20 = arith.truncf %16 : vector<256x128xf32> to vector<256x128xbf16>
    %cst_14 = arith.constant dense<0.000000e+00> : vector<256x128xf32>
    %21 = tpu.matmul %20, %19, %cst_14 {dimension_numbers = #tpu.dot_dimension_numbers<[1], [0], [0], [1], [0, 0, 1, 1], [], []>} : vector<256x128xbf16>, vector<128x128xbf16>, vector<256x128xf32> -> vector<256x128xf32>
    %22 = arith.index_cast %c0_i32 : i32 to index
    %c0_15 = arith.constant 0 : index
    %c0_16 = arith.constant 0 : index
    %23 = vector.load %arg7[%22, %c0_15, %c0_16] : memref<2x1x128xf32, #tpu.memory_space<vmem>>, vector<1x1x128xf32>
    %24 = vector.shape_cast %23 : vector<1x1x128xf32> to vector<1x128xf32>
    %25 = vector.broadcast %24 : vector<1x128xf32> to vector<256x128xf32>
    %26 = arith.addf %21, %25 : vector<256x128xf32>
    %cst_17 = arith.constant 0.000000e+00 : f32
    %27 = vector.broadcast %cst_17 : f32 to vector<256x128xf32>
    %28 = arith.maximumf %26, %27 : vector<256x128xf32>
    %29 = arith.index_cast %c0_i32 : i32 to index
    %c0_18 = arith.constant 0 : index
    %c0_19 = arith.constant 0 : index
    %30 = vector.load %arg8[%29, %c0_18, %c0_19] : memref<2x128x128xbf16, #tpu.memory_space<vmem>>, vector<1x128x128xbf16>
    %31 = vector.shape_cast %30 : vector<1x128x128xbf16> to vector<128x128xbf16>
    %32 = arith.truncf %28 : vector<256x128xf32> to vector<256x128xbf16>
    %cst_20 = arith.constant dense<0.000000e+00> : vector<256x128xf32>
    %33 = tpu.matmul %32, %31, %cst_20 {dimension_numbers = #tpu.dot_dimension_numbers<[1], [0], [0], [1], [0, 0, 1, 1], [], []>} : vector<256x128xbf16>, vector<128x128xbf16>, vector<256x128xf32> -> vector<256x128xf32>
    %34 = arith.index_cast %c0_i32 : i32 to index
    %c0_21 = arith.constant 0 : index
    %c0_22 = arith.constant 0 : index
    %35 = vector.load %arg9[%34, %c0_21, %c0_22] : memref<2x1x128xf32, #tpu.memory_space<vmem>>, vector<1x1x128xf32>
    %36 = vector.shape_cast %35 : vector<1x1x128xf32> to vector<1x128xf32>
    %37 = vector.broadcast %36 : vector<1x128xf32> to vector<256x128xf32>
    %38 = arith.addf %33, %37 : vector<256x128xf32>
    %39 = arith.addf %38, %16 : vector<256x128xf32>
    %cst_23 = arith.constant 0.000000e+00 : f32
    %40 = vector.broadcast %cst_23 : f32 to vector<256x128xf32>
    %41 = arith.maximumf %39, %40 : vector<256x128xf32>
    %c1_i32 = arith.constant 1 : i32
    %42 = arith.index_cast %c1_i32 : i32 to index
    %c0_24 = arith.constant 0 : index
    %c0_25 = arith.constant 0 : index
    %43 = vector.load %arg6[%42, %c0_24, %c0_25] : memref<2x128x128xbf16, #tpu.memory_space<vmem>>, vector<1x128x128xbf16>
    %44 = vector.shape_cast %43 : vector<1x128x128xbf16> to vector<128x128xbf16>
    %45 = arith.truncf %41 : vector<256x128xf32> to vector<256x128xbf16>
    %cst_26 = arith.constant dense<0.000000e+00> : vector<256x128xf32>
    %46 = tpu.matmul %45, %44, %cst_26 {dimension_numbers = #tpu.dot_dimension_numbers<[1], [0], [0], [1], [0, 0, 1, 1], [], []>} : vector<256x128xbf16>, vector<128x128xbf16>, vector<256x128xf32> -> vector<256x128xf32>
    %47 = arith.index_cast %c1_i32 : i32 to index
    %c0_27 = arith.constant 0 : index
    %c0_28 = arith.constant 0 : index
    %48 = vector.load %arg7[%47, %c0_27, %c0_28] : memref<2x1x128xf32, #tpu.memory_space<vmem>>, vector<1x1x128xf32>
    %49 = vector.shape_cast %48 : vector<1x1x128xf32> to vector<1x128xf32>
    %50 = vector.broadcast %49 : vector<1x128xf32> to vector<256x128xf32>
    %51 = arith.addf %46, %50 : vector<256x128xf32>
    %cst_29 = arith.constant 0.000000e+00 : f32
    %52 = vector.broadcast %cst_29 : f32 to vector<256x128xf32>
    %53 = arith.maximumf %51, %52 : vector<256x128xf32>
    %54 = arith.index_cast %c1_i32 : i32 to index
    %c0_30 = arith.constant 0 : index
    %c0_31 = arith.constant 0 : index
    %55 = vector.load %arg8[%54, %c0_30, %c0_31] : memref<2x128x128xbf16, #tpu.memory_space<vmem>>, vector<1x128x128xbf16>
    %56 = vector.shape_cast %55 : vector<1x128x128xbf16> to vector<128x128xbf16>
    %57 = arith.truncf %53 : vector<256x128xf32> to vector<256x128xbf16>
    %cst_32 = arith.constant dense<0.000000e+00> : vector<256x128xf32>
    %58 = tpu.matmul %57, %56, %cst_32 {dimension_numbers = #tpu.dot_dimension_numbers<[1], [0], [0], [1], [0, 0, 1, 1], [], []>} : vector<256x128xbf16>, vector<128x128xbf16>, vector<256x128xf32> -> vector<256x128xf32>
    %59 = arith.index_cast %c1_i32 : i32 to index
    %c0_33 = arith.constant 0 : index
    %c0_34 = arith.constant 0 : index
    %60 = vector.load %arg9[%59, %c0_33, %c0_34] : memref<2x1x128xf32, #tpu.memory_space<vmem>>, vector<1x1x128xf32>
    %61 = vector.shape_cast %60 : vector<1x1x128xf32> to vector<1x128xf32>
    %62 = vector.broadcast %61 : vector<1x128xf32> to vector<256x128xf32>
    %63 = arith.addf %58, %62 : vector<256x128xf32>
    %64 = arith.addf %63, %41 : vector<256x128xf32>
    %cst_35 = arith.constant 0.000000e+00 : f32
    %65 = vector.broadcast %cst_35 : f32 to vector<256x128xf32>
    %66 = arith.maximumf %64, %65 : vector<256x128xf32>
    %c2_i32 = arith.constant 2 : i32
    %c0_36 = arith.constant 0 : index
    %c0_37 = arith.constant 0 : index
    %67 = vector.load %arg10[%c0_36, %c0_37] : memref<128x128xbf16, #tpu.memory_space<vmem>>, vector<128x128xbf16>
    %68 = arith.truncf %66 : vector<256x128xf32> to vector<256x128xbf16>
    %cst_38 = arith.constant dense<0.000000e+00> : vector<256x128xf32>
    %69 = tpu.matmul %68, %67, %cst_38 {dimension_numbers = #tpu.dot_dimension_numbers<[1], [0], [0], [1], [0, 0, 1, 1], [], []>} : vector<256x128xbf16>, vector<128x128xbf16>, vector<256x128xf32> -> vector<256x128xf32>
    %c0_39 = arith.constant 0 : index
    %c0_40 = arith.constant 0 : index
    %70 = vector.load %arg11[%c0_39, %c0_40] : memref<1x128xf32, #tpu.memory_space<vmem>>, vector<1x128xf32>
    %71 = vector.broadcast %70 : vector<1x128xf32> to vector<256x128xf32>
    %72 = arith.addf %69, %71 : vector<256x128xf32>
    %c0_41 = arith.constant 0 : index
    %c0_42 = arith.constant 0 : index
    %73 = vector.load %arg12[%c0_41, %c0_42] : memref<256x128xf32, #tpu.memory_space<vmem>>, vector<256x128xf32>
    tpu.vector_store %arg12[%c0_41, %c0_42], %72 {strides = array<i32>} : memref<256x128xf32, #tpu.memory_space<vmem>>, vector<256x128xf32>,
    return
  }
  func.func @transform_0(%arg0: i32) -> (i32, i32) {
    %c0_i32 = arith.constant 0 : i32
    %c0_i32_0 = arith.constant 0 : i32
    return %arg0, %c0_i32 : i32, i32
  }
  func.func @transform_1(%arg0: i32) -> (i32, i32) {
    %c0_i32 = arith.constant 0 : i32
    %c0_i32_0 = arith.constant 0 : i32
    %c0_i32_1 = arith.constant 0 : i32
    return %c0_i32, %c0_i32_0 : i32, i32
  }
  func.func @transform_2(%arg0: i32) -> (i32, i32) {
    %c0_i32 = arith.constant 0 : i32
    %c0_i32_0 = arith.constant 0 : i32
    %c0_i32_1 = arith.constant 0 : i32
    return %c0_i32, %c0_i32_0 : i32, i32
  }
  func.func @transform_3(%arg0: i32) -> (i32, i32) {
    %c0_i32 = arith.constant 0 : i32
    %c0_i32_0 = arith.constant 0 : i32
    %c0_i32_1 = arith.constant 0 : i32
    return %c0_i32, %c0_i32_0 : i32, i32
  }
  func.func @transform_4(%arg0: i32) -> (i32, i32) {
    %c0_i32 = arith.constant 0 : i32
    %c0_i32_0 = arith.constant 0 : i32
    %c0_i32_1 = arith.constant 0 : i32
    return %c0_i32, %c0_i32_0 : i32, i32
  }
  func.func @transform_5(%arg0: i32) -> (i32, i32, i32) {
    %c0_i32 = arith.constant 0 : i32
    %c0_i32_0 = arith.constant 0 : i32
    %c0_i32_1 = arith.constant 0 : i32
    %c0_i32_2 = arith.constant 0 : i32
    return %c0_i32, %c0_i32_0, %c0_i32_1 : i32, i32, i32
  }
  func.func @transform_6(%arg0: i32) -> (i32, i32, i32) {
    %c0_i32 = arith.constant 0 : i32
    %c0_i32_0 = arith.constant 0 : i32
    %c0_i32_1 = arith.constant 0 : i32
    %c0_i32_2 = arith.constant 0 : i32
    return %c0_i32, %c0_i32_0, %c0_i32_1 : i32, i32, i32
  }
  func.func @transform_7(%arg0: i32) -> (i32, i32, i32) {
    %c0_i32 = arith.constant 0 : i32
    %c0_i32_0 = arith.constant 0 : i32
    %c0_i32_1 = arith.constant 0 : i32
    %c0_i32_2 = arith.constant 0 : i32
    return %c0_i32, %c0_i32_0, %c0_i32_1 : i32, i32, i32
  }
  func.func @transform_8(%arg0: i32) -> (i32, i32, i32) {
    %c0_i32 = arith.constant 0 : i32
    %c0_i32_0 = arith.constant 0 : i32
    %c0_i32_1 = arith.constant 0 : i32
    %c0_i32_2 = arith.constant 0 : i32
    return %c0_i32, %c0_i32_0, %c0_i32_1 : i32, i32, i32
  }
  func.func @transform_9(%arg0: i32) -> (i32, i32) {
    %c0_i32 = arith.constant 0 : i32
    %c0_i32_0 = arith.constant 0 : i32
    %c0_i32_1 = arith.constant 0 : i32
    return %c0_i32, %c0_i32_0 : i32, i32
  }
  func.func @transform_10(%arg0: i32) -> (i32, i32) {
    %c0_i32 = arith.constant 0 : i32
    %c0_i32_0 = arith.constant 0 : i32
    %c0_i32_1 = arith.constant 0 : i32
    return %c0_i32, %c0_i32_0 : i32, i32
  }
  func.func @transform_11(%arg0: i32) -> (i32, i32) {
    %c0_i32 = arith.constant 0 : i32
    %c0_i32_0 = arith.constant 0 : i32
    return %arg0, %c0_i32 : i32, i32
  }
}

</mosaic_0001>

<bundles_post_ra>
// kernel: tpu_custom_call.1
= control target key start
LH: loop header
LB: loop body
LE: loop exit
PB: predicated region body
PF: predicated region fallthrough
CT: control target
= control target key end

     0   :  { %s6265_s0 = inlined_call_operand.hbm [shape: f32[4096,384], index: 0, kind: input, shape index: {}]   ;;  %s6266_s1 = inlined_call_operand.hbm [shape: bf16[384,256], index: 1, kind: input, shape index: {}]   ;;  %s6267_s2 = inlined_call_operand.hbm [shape: f32[1,256], index: 2, kind: input, shape index: {}]   ;;  %s6268_s3 = inlined_call_operand.hbm [shape: bf16[256,128], index: 3, kind: input, shape index: {}]   ;;  %s6269_s4 = inlined_call_operand.hbm [shape: f32[1,128], index: 4, kind: input, shape index: {}]   ;;  %s6270_s5 = inlined_call_operand.hbm [shape: bf16[2,128,128], index: 5, kind: input, shape index: {}]   ;;  %s6271_s6 = inlined_call_operand.hbm [shape: f32[2,1,128], index: 6, kind: input, shape index: {}]   ;;  %s6272_s7 = inlined_call_operand.hbm [shape: bf16[2,128,128], index: 7, kind: input, shape index: {}]   ;;  %s6273_s8 = inlined_call_operand.hbm [shape: f32[2,1,128], index: 8, kind: input, shape index: {}]   ;;  %s6274_s9 = inlined_call_operand.hbm [shape: bf16[128,128], index: 9, kind: input, shape index: {}]   ;;  %s6275_s10 = inlined_call_operand.hbm [shape: f32[1,128], index: 10, kind: input, shape index: {}]   ;;  %s6276_s11 = inlined_call_operand.hbm [shape: f32[4096,128], index: 11, kind: output, shape index: {}]  }
   0x1   :  { %6321 = sst [smem:[#allocation29_spill]] %s6265_s0 }
   0x2   :  { %6322 = sst [smem:[#allocation30_spill]] %s6266_s1 }
   0x3   :  { %6323 = sst [smem:[#allocation31_spill]] %s6267_s2 }
   0x4   :  { %6324 = sst [smem:[#allocation32_spill]] %s6268_s3 }
   0x5   :  { %6325 = sst [smem:[#allocation33_spill]] %s6276_s11 }
   0x6   :  { %16 = vsyncpa [#allocation3], 0 }
   0x7   :  { %18 = vsyncpa [#allocation3 + $0x1], 0 }
   0x8   :  { %19 = vsyncpa [#allocation6], 0 }
   0x9   :  { %20 = vsyncpa [#allocation9], 0 }
   0xa   :  { %21 = vsyncpa [#allocation12], 0 }
   0xb   :  { %22 = vsyncpa [#allocation15], 0 }
   0xc   :  { %23 = vsyncpa [#allocation18], 0 }
   0xd   :  { %24 = vsyncpa [#allocation4], 0 }
   0xe   :  { %26 = vsyncpa [#allocation4 + $0x1], 0  ;;  %s4982_s17 = smov 0   ;;  %s4984_s18 = smov 0  }
   0xf   :  { %s4986_s19 = smov 0   ;;  %s4988_s20 = smov 0  }
  0x10 LB: > { %s4899_s21 = smov [#allocation5]   ;;  %s5003_s23 = sadd.s32 4294967295, %s4897_s20   ;;  %s4897_s20 = sphi %s4988_s20, %s6395_s20   ;;  %s4893_s19 = sphi %s4986_s19, %s6394_s19   ;;  %s4889_s18 = sphi %s4984_s18, %s6393_s18   ;;  %s4885_s17 = sphi %s4982_s17, %s6392_s17  }
  0x11   : > { %s311_s22 = sshll.u32 %s4899_s21, 4  ;;  %p3453_p0 = scmp.ge.s32.totalorder %s4897_s20, 1  ;;  %s5008_s22 = int_to_ptr.vmem [resolvable:$true] %s311_s22 }
  0x12   : > { %p6280_p1 = scmp.eq.s32.totalorder %s5003_s23, 0  ;;  %p299_p2 = scmp.lt.s32.totalorder %s4897_s20, 17 }
  0x13   : > { %s4900_s25 = smov [#allocation8]   ;;  %s4901_s28 = smov [#allocation11]  }
  0x14   : > { %p5010_p3 = pnand %p3453_p0, %p299_p2  ;;  %s335_s26 = sshll.u32 %s4900_s25, 4  ;;  %s5022_s26 = int_to_ptr.vmem [resolvable:$true] %s335_s26 }
  0x15   : > { %s5024_s29 = sshll.u32 %s4901_s28, 4  ;;  %s6329_s1 = sld [smem:[#allocation30_spill]]  ;;  %s360_s29 = int_to_ptr.vmem [resolvable:$true] %s5024_s29 }
  0x16   : > { %s6326_s24 = scalar_select %p5010_p3, 1, 0 }
  0x17   : > { %p4259_p4 = pneg %p5010_p3 }
  0x18   : > { %6327 = sst [smem:[#allocation28_spill]] %s6326_s24 }
  0x19   : > { %p5018_p5 = pnand %p4259_p4, %p6280_p1 }
  0x1b   : > { %s4501_s13 = scalar_lea.hbm %s6329_s1, 6144  ;;  %p5034_p7 = pneg %p5018_p5 }
  0x1c   : > { %p4502_p6 = scmp.ne.s32.totalorder %s6329_s1, %s4501_s13  ;;  %p4508_p10 = scmp.lt.u32.totalorder %s4501_s13, %s6329_s1 }
  0x1e   : > { %p4504_p8 = pnand %p5034_p7, %p4502_p6 }
  0x20   : > { %p4505_p9 = pneg %p4504_p8 }
  0x22   : > { %p4510_p11 = pnand %p4508_p10, %p4505_p9 }
  0x24   : > { %4513 = shalt.err (!%p4510_p11)
}
  0x25   : > { %s4514_s28 = scalar_lea.vmem %s5008_s22, 6144  ;;  %p4522_p2 = scmp.lt.s32.totalorder %s5008_s22, %s5008_s22 }
  0x26   : > { %p4515_p12 = scmp.ne.s32.totalorder %s5008_s22, %s4514_s28  ;;  %p4523_p4 = scmp.lt.s32.totalorder %s4514_s28, %s4514_s28 }
  0x28   : > { %p4517_p13 = pnand %p4515_p12, %p5034_p7  ;;  %p4524_p6 = por %p4523_p4, %p4522_p2 }
  0x2a   : > { %p4518_p0 = pneg %p4517_p13 }
  0x2c   : > { %p4525_p8 = pnand %p4524_p6, %p4518_p0 }
  0x2e   : > { %4528 = shalt.err (!%p4525_p8)
}
  0x2f   : > { %s4902_s30 = smov 128   ;;  %s4903_s12 = smov 8  }
  0x30   : > { %4262 = dma.hbm_to_vmem [thread:$0]  (!%p5018_p5), %s6329_s1, 6144, %s5008_s22, [#allocation6], %s4902_s30, %s4902_s30, %s4903_s12  }
  0x31   : > { %s6331_s3 = sld [smem:[#allocation32_spill]] }
  0x37   : > { %s4529_s25 = scalar_lea.hbm %s6331_s3, 2048 }
  0x38   : > { %p4530_p9 = scmp.ne.s32.totalorder %s6331_s3, %s4529_s25  ;;  %p4536_p12 = scmp.lt.u32.totalorder %s4529_s25, %s6331_s3 }
  0x3a   : > { %p4532_p10 = pnand %p4530_p9, %p5034_p7 }
  0x3c   : > { %p4533_p11 = pneg %p4532_p10 }
  0x3e   : > { %p4538_p13 = pnand %p4536_p12, %p4533_p11 }
  0x40   : > { %4541 = shalt.err (!%p4538_p13)
}
  0x41   : > { %s4542_s22 = scalar_lea.vmem %s5022_s26, 2048  ;;  %p4550_p6 = scmp.lt.s32.totalorder %s5022_s26, %s5022_s26 }
  0x42   : > { %p4543_p0 = scmp.ne.s32.totalorder %s5022_s26, %s4542_s22  ;;  %p4551_p8 = scmp.lt.s32.totalorder %s4542_s22, %s4542_s22 }
  0x44   : > { %p4545_p2 = pnand %p4543_p0, %p5034_p7  ;;  %p4552_p9 = por %p4551_p8, %p4550_p6 }
  0x46   : > { %p4546_p4 = pneg %p4545_p2 }
  0x48   : > { %p4553_p10 = pnand %p4552_p9, %p4546_p4 }
  0x4a   : > { %4556 = shalt.err (!%p4553_p10)
}
  0x4b   : > { %s4904_s11 = smov 64   ;;  %s4905_s0 = smov 4  }
  0x4c   : > { %4268 = dma.hbm_to_vmem [thread:$0]  (!%p5018_p5), %s6331_s3, 2048, %s5022_s26, [#allocation9], %s4904_s11, %s4904_s11, %s4905_s0  }
  0x4d   : > { %s4557_s14 = scalar_lea.hbm %s6270_s5, 2048 }
  0x4e   : > { %p4558_p11 = scmp.ne.s32.totalorder %s6270_s5, %s4557_s14  ;;  %p4564_p0 = scmp.lt.u32.totalorder %s4557_s14, %s6270_s5 }
  0x50   : > { %p4560_p12 = pnand %p4558_p11, %p5034_p7 }
  0x52   : > { %p4561_p13 = pneg %p4560_p12 }
  0x54   : > { %p4566_p2 = pnand %p4564_p0, %p4561_p13 }
  0x56   : > { %4569 = shalt.err (!%p4566_p2)
}
  0x57   : > { %s4570_s22 = scalar_lea.vmem %s360_s29, 2048  ;;  %p4578_p9 = scmp.lt.s32.totalorder %s360_s29, %s360_s29 }
  0x58   : > { %p4571_p4 = scmp.ne.s32.totalorder %s360_s29, %s4570_s22  ;;  %p4579_p10 = scmp.lt.s32.totalorder %s4570_s22, %s4570_s22 }
  0x5a   : > { %p4573_p6 = pnand %p4571_p4, %p5034_p7  ;;  %p4580_p1 = por %p4579_p10, %p4578_p9 }
  0x5c   : > { %p4574_p8 = pneg %p4573_p6 }
  0x5e   : > { %p4581_p3 = pnand %p4580_p1, %p4574_p8 }
  0x60   : > { %4584 = shalt.err (!%p4581_p3)
}
  0x61   : > { %4274 = dma.hbm_to_vmem [thread:$0]  (!%p5018_p5), %s6270_s5, 2048, %s360_s29, [#allocation12], %s4904_s11, %s4904_s11, %s4905_s0  }
  0x62   : > { %s4906_s30 = smov [#allocation14]   ;;  %s4907_s13 = smov [#allocation17]  }
  0x63   : > { %s385_s12 = sshll.u32 %s4906_s30, 4  ;;  %s411_s14 = sshll.u32 %s4907_s13, 4  ;;  %s386_s12 = int_to_ptr.vmem [resolvable:$true] %s385_s12  ;;  %s412_s14 = int_to_ptr.vmem [resolvable:$true] %s411_s14 }
  0x64   : > { %s4585_s25 = scalar_lea.hbm %s6272_s7, 2048 }
  0x65   : > { %p4586_p1 = scmp.ne.s32.totalorder %s6272_s7, %s4585_s25  ;;  %p4592_p12 = scmp.lt.u32.totalorder %s4585_s25, %s6272_s7 }
  0x67   : > { %p4588_p3 = pnand %p4586_p1, %p5034_p7 }
  0x69   : > { %p4589_p11 = pneg %p4588_p3 }
  0x6b   : > { %p4594_p13 = pnand %p4592_p12, %p4589_p11 }
  0x6d   : > { %4597 = shalt.err (!%p4594_p13)
}
  0x6e   : > { %s4598_s29 = scalar_lea.vmem %s386_s12, 2048  ;;  %p4606_p6 = scmp.lt.s32.totalorder %s386_s12, %s386_s12 }
  0x6f   : > { %p4599_p0 = scmp.ne.s32.totalorder %s386_s12, %s4598_s29  ;;  %p4607_p8 = scmp.lt.s32.totalorder %s4598_s29, %s4598_s29 }
  0x71   : > { %p4601_p2 = pnand %p4599_p0, %p5034_p7  ;;  %p4608_p9 = por %p4607_p8, %p4606_p6 }
  0x73   : > { %p4602_p4 = pneg %p4601_p2 }
  0x75   : > { %p4609_p10 = pnand %p4608_p9, %p4602_p4 }
  0x77   : > { %4612 = shalt.err (!%p4609_p10)
}
  0x78   : > { %4280 = dma.hbm_to_vmem [thread:$0]  (!%p5018_p5), %s6272_s7, 2048, %s386_s12, [#allocation15], %s4904_s11, %s4904_s11, %s4905_s0  }
  0x79   : > { %s4613_s15 = scalar_lea.hbm %s6274_s9, 1024 }
  0x7a   : > { %p4614_p1 = scmp.ne.s32.totalorder %s6274_s9, %s4613_s15  ;;  %p4620_p12 = scmp.lt.u32.totalorder %s4613_s15, %s6274_s9 }
  0x7c   : > { %p4616_p3 = pnand %p4614_p1, %p5034_p7 }
  0x7e   : > { %p4617_p11 = pneg %p4616_p3 }
  0x80   : > { %p4622_p13 = pnand %p4620_p12, %p4617_p11 }
  0x82   : > { %4625 = shalt.err (!%p4622_p13)
}
  0x83   : > { %s4626_s26 = scalar_lea.vmem %s412_s14, 1024  ;;  %p4634_p6 = scmp.lt.s32.totalorder %s412_s14, %s412_s14 }
  0x84   : > { %p4627_p0 = scmp.ne.s32.totalorder %s412_s14, %s4626_s26  ;;  %p4635_p8 = scmp.lt.s32.totalorder %s4626_s26, %s4626_s26 }
  0x86   : > { %p4629_p2 = pnand %p4627_p0, %p5034_p7  ;;  %p4636_p9 = por %p4635_p8, %p4634_p6 }
  0x88   : > { %p4630_p4 = pneg %p4629_p2 }
  0x8a   : > { %p4637_p10 = pnand %p4636_p9, %p4630_p4 }
  0x8c   : > { %4640 = shalt.err (!%p4637_p10)
}
  0x8d   : > { %4286 = dma.hbm_to_vmem [thread:$0]  (!%p5018_p5), %s6274_s9, 1024, %s412_s14, [#allocation18], %s4904_s11, %s4904_s11, %s4905_s0  }
  0x8e   : > { %s4908_s1 = smov [#allocation7]   ;;  %s4909_s30 = smov [#allocation10]  }
  0x8f   : > { %s325_s24 = sshll.u32 %s4908_s1, 4  ;;  %s349_s13 = sshll.u32 %s4909_s30, 4  ;;  %s326_s24 = int_to_ptr.vmem [resolvable:$true] %s325_s24  ;;  %s350_s13 = int_to_ptr.vmem [resolvable:$true] %s349_s13 }
  0x90   : > { %s6332_s2 = sld [smem:[#allocation31_spill]] }
  0x96   : > { %s4641_s25 = scalar_lea.hbm %s6332_s2, 32 }
  0x97   : > { %p4642_p1 = scmp.ne.s32.totalorder %s6332_s2, %s4641_s25  ;;  %p4648_p12 = scmp.lt.u32.totalorder %s4641_s25, %s6332_s2 }
  0x99   : > { %p4644_p3 = pnand %p4642_p1, %p5034_p7 }
  0x9b   : > { %p4645_p11 = pneg %p4644_p3 }
  0x9d   : > { %p4650_p13 = pnand %p4648_p12, %p4645_p11 }
  0x9f   : > { %4653 = shalt.err (!%p4650_p13)
}
  0xa0   : > { %s4654_s11 = scalar_lea.vmem %s326_s24, 32  ;;  %p4662_p6 = scmp.lt.s32.totalorder %s326_s24, %s326_s24 }
  0xa1   : > { %p4655_p0 = scmp.ne.s32.totalorder %s326_s24, %s4654_s11  ;;  %p4663_p8 = scmp.lt.s32.totalorder %s4654_s11, %s4654_s11 }
  0xa3   : > { %p4657_p2 = pnand %p4655_p0, %p5034_p7  ;;  %p4664_p9 = por %p4663_p8, %p4662_p6 }
  0xa5   : > { %p4658_p4 = pneg %p4657_p2 }
  0xa7   : > { %p4665_p10 = pnand %p4664_p9, %p4658_p4 }
  0xa9   : > { %4668 = shalt.err (!%p4665_p10)
}
  0xaa   : > { %4265 = dma.hbm_to_vmem [thread:$0]  (!%p5018_p5), %s6332_s2, 32, %s326_s24, [#allocation6]  }
  0xab   : > { %s4669_s30 = scalar_lea.hbm %s6269_s4, 16 }
  0xac   : > { %p4670_p1 = scmp.ne.s32.totalorder %s6269_s4, %s4669_s30  ;;  %p4676_p12 = scmp.lt.u32.totalorder %s4669_s30, %s6269_s4 }
  0xae   : > { %p4672_p3 = pnand %p4670_p1, %p5034_p7 }
  0xb0   : > { %p4673_p11 = pneg %p4672_p3 }
  0xb2   : > { %p4678_p13 = pnand %p4676_p12, %p4673_p11 }
  0xb4   : > { %4681 = shalt.err (!%p4678_p13)
}
  0xb5   : > { %s4682_s22 = scalar_lea.vmem %s350_s13, 16  ;;  %s4689_s24 = scalar_lea.vmem %s350_s13, 32 }
  0xb6   : > { %p4683_p0 = scmp.ne.s32.totalorder %s350_s13, %s4682_s22  ;;  %p4690_p6 = scmp.lt.s32.totalorder %s350_s13, %s350_s13 }
  0xb7   : > { %p4691_p8 = scmp.lt.s32.totalorder %s4689_s24, %s4682_s22 }
  0xb8   : > { %p4685_p2 = pnand %p4683_p0, %p5034_p7 }
  0xb9   : > { %p4692_p9 = por %p4691_p8, %p4690_p6 }
  0xba   : > { %p4686_p4 = pneg %p4685_p2 }
  0xbc   : > { %p4693_p10 = pnand %p4692_p9, %p4686_p4 }
  0xbe   : > { %4696 = shalt.err (!%p4693_p10)
}
  0xbf   : > { %4271 = dma.hbm_to_vmem [thread:$0]  (!%p5018_p5), %s6269_s4, 16, %s350_s13, [#allocation9]  }
  0xc0   : > { %s4910_s11 = smov [#allocation13]   ;;  %s4697_s1 = scalar_lea.hbm %s6271_s6, 32 }
  0xc1   : > { %s372_s0 = sshll.u32 %s4910_s11, 4  ;;  %p4698_p1 = scmp.ne.s32.totalorder %s6271_s6, %s4697_s1  ;;  %s373_s0 = int_to_ptr.vmem [resolvable:$true] %s372_s0 }
  0xc2   : > { %p4704_p12 = scmp.lt.u32.totalorder %s4697_s1, %s6271_s6 }
  0xc3   : > { %p4700_p3 = pnand %p4698_p1, %p5034_p7 }
  0xc5   : > { %p4701_p11 = pneg %p4700_p3 }
  0xc7   : > { %p4706_p13 = pnand %p4704_p12, %p4701_p11 }
  0xc9   : > { %4709 = shalt.err (!%p4706_p13)
}
  0xca   : > { %s4710_s13 = scalar_lea.vmem %s373_s0, 32  ;;  %p4718_p6 = scmp.lt.s32.totalorder %s373_s0, %s373_s0 }
  0xcb   : > { %p4711_p0 = scmp.ne.s32.totalorder %s373_s0, %s4710_s13  ;;  %p4719_p8 = scmp.lt.s32.totalorder %s4710_s13, %s4710_s13 }
  0xcd   : > { %p4713_p2 = pnand %p4711_p0, %p5034_p7  ;;  %p4720_p9 = por %p4719_p8, %p4718_p6 }
  0xcf   : > { %p4714_p4 = pneg %p4713_p2 }
  0xd1   : > { %p4721_p10 = pnand %p4720_p9, %p4714_p4 }
  0xd3   : > { %4724 = shalt.err (!%p4721_p10)
}
  0xd4   : > { %s4911_s28 = smov 16   ;;  %s4912_s22 = smov 1  }
  0xd5   : > { %4277 = dma.hbm_to_vmem [thread:$0]  (!%p5018_p5), %s6271_s6, 32, %s373_s0, [#allocation12], %s4911_s28, %s4911_s28, %s4912_s22  }
  0xd6   : > { %s4913_s12 = smov [#allocation16]   ;;  %s4914_s14 = smov [#allocation19]  }
  0xd7   : > { %s398_s11 = sshll.u32 %s4913_s12, 4  ;;  %s425_s29 = sshll.u32 %s4914_s14, 4  ;;  %s399_s11 = int_to_ptr.vmem [resolvable:$true] %s398_s11  ;;  %s5199_s29 = int_to_ptr.vmem [resolvable:$true] %s425_s29 }
  0xd8   : > { %s4725_s15 = scalar_lea.hbm %s6273_s8, 32 }
  0xd9   : > { %p4726_p1 = scmp.ne.s32.totalorder %s6273_s8, %s4725_s15  ;;  %p4732_p12 = scmp.lt.u32.totalorder %s4725_s15, %s6273_s8 }
  0xdb   : > { %p4728_p3 = pnand %p4726_p1, %p5034_p7 }
  0xdd   : > { %p4729_p11 = pneg %p4728_p3 }
  0xdf   : > { %p4734_p13 = pnand %p4732_p12, %p4729_p11 }
  0xe1   : > { %4737 = shalt.err (!%p4734_p13)
}
  0xe2   : > { %s4738_s24 = scalar_lea.vmem %s399_s11, 32  ;;  %p4746_p6 = scmp.lt.s32.totalorder %s399_s11, %s399_s11 }
  0xe3   : > { %p4739_p0 = scmp.ne.s32.totalorder %s399_s11, %s4738_s24  ;;  %p4747_p8 = scmp.lt.s32.totalorder %s4738_s24, %s4738_s24 }
  0xe5   : > { %p4741_p2 = pnand %p4739_p0, %p5034_p7  ;;  %p4748_p9 = por %p4747_p8, %p4746_p6 }
  0xe7   : > { %p4742_p4 = pneg %p4741_p2 }
  0xe9   : > { %p4749_p10 = pnand %p4748_p9, %p4742_p4 }
  0xeb   : > { %4752 = shalt.err (!%p4749_p10)
}
  0xec   : > { %4283 = dma.hbm_to_vmem [thread:$0]  (!%p5018_p5), %s6273_s8, 32, %s399_s11, [#allocation15], %s4911_s28, %s4911_s28, %s4912_s22  }
  0xed   : > { %s4753_s30 = scalar_lea.hbm %s6275_s10, 16 }
  0xee   : > { %p4754_p1 = scmp.ne.s32.totalorder %s6275_s10, %s4753_s30  ;;  %p4760_p12 = scmp.lt.u32.totalorder %s4753_s30, %s6275_s10 }
  0xf0   : > { %p4756_p3 = pnand %p4754_p1, %p5034_p7 }
  0xf2   : > { %p4757_p11 = pneg %p4756_p3 }
  0xf4   : > { %p4762_p13 = pnand %p4760_p12, %p4757_p11 }
  0xf6   : > { %4765 = shalt.err (!%p4762_p13)
}
  0xf7   : > { %s4766_s28 = scalar_lea.vmem %s5199_s29, 16  ;;  %s4773_s22 = scalar_lea.vmem %s5199_s29, 32 }
  0xf8   : > { %p4767_p0 = scmp.ne.s32.totalorder %s5199_s29, %s4766_s28  ;;  %p4774_p6 = scmp.lt.s32.totalorder %s5199_s29, %s5199_s29 }
  0xf9   : > { %p4775_p8 = scmp.lt.s32.totalorder %s4773_s22, %s4766_s28 }
  0xfa   : > { %p4769_p2 = pnand %p4767_p0, %p5034_p7 }
  0xfb   : > { %p4776_p9 = por %p4775_p8, %p4774_p6 }
  0xfc   : > { %p4770_p4 = pneg %p4769_p2 }
  0xfe   : > { %p4777_p10 = pnand %p4776_p9, %p4770_p4 }
 0x100   : > { %4780 = shalt.err (!%p4777_p10)
}
 0x101   : > { %4289 = dma.hbm_to_vmem [thread:$0]  (!%p5018_p5), %s6275_s10, 16, %s5199_s29, [#allocation18]  }
 0x102   : > { %s3452_s27 = sadd.s32 4294967294, %s4897_s20   ;;  %s5245_s16 = sadd.s32 1, %s4897_s20  }
 0x103   : > { %s36_s24 = ssub.s32 %s4897_s20, %s5245_s16  ;;  %s39_s26 = sadd.s32 1, %s4893_s19 }
 0x104   : > { %p37_p7 = scmp.eq.s32.totalorder %s36_s24, 0  ;;  %p46_p1 = scmp.ne.s32.totalorder %s4893_s19, %s4889_s18 }
 0x105   : > { %p47_p3 = scmp.eq.s32.totalorder %s4897_s20, 0  ;;  %p52_p11 = scmp.ne.s32.totalorder %s4889_s18, %s4885_s17 }
 0x106   : > { %s5256_s12 = scalar_select %p37_p7, %s4893_s19, %s39_s26  }
 0x107   : > { %p48_p12 = por %p47_p3, %p46_p1  ;;  %p6333_p13 = scmp.eq.s32.totalorder %s5003_s23, 0 }
 0x108   : > { %p286_p5 = scmp.eq.s32.totalorder %s5003_s23, 15  ;;  %p292_p2 = scmp.eq.s32.totalorder %s3452_s27, 15 }
 0x109   : > { %p5260_p0 = por %p6333_p13, %p52_p11  ;;  %p4308_p4 = scmp.lt.s32.totalorder %s4897_s20, 16 }
 0x10a   : > { %s436_s29 = sand.u32 1, %s4893_s19   ;;  %p5267_p6 = por %p286_p5, %p46_p1 }
 0x10b   : > { %p5271_p8 = por %p292_p2, %p52_p11  ;;  %s4212_s15 = smul.u32 768, %s436_s29 }
 0x10c   : > { %s6335_s1 = scalar_select %p5267_p6, 1, 0 }
 0x10d   : > { %s6336_s30 = scalar_select %p5271_p8, 1, 0 }
 0x10e   : > { %s4213_s21 = smul.u32 12288, %s4897_s20  ;;  %p5276_p9 = pnand %p4308_p4, %p48_p12 }
 0x10f   : > { %s6338_s22 = sld [smem:[#allocation29_spill]]  ;;  %s440_s0 = scalar_lea.vmem [#allocation2], %s4212_s15 }
 0x110   : > { %s448_s27 = sshll.u32 %s440_s0, 4  ;;  %s5287_s24 = scalar_lea.sflag [#allocation3], %s436_s29  ;;  %s5285_s27 = int_to_ptr.vmem [resolvable:$true] %s448_s27 }
 0x111   : > { %p4783_p7 = pneg %p5276_p9 }
 0x115   : > { %s5283_s11 = scalar_lea.hbm %s6338_s22, %s4213_s21  ;;  %s4786_s28 = scalar_lea.hbm %s6338_s22, 196608 }
 0x116   : > { %s4781_s26 = scalar_lea.hbm %s5283_s11, 12288  ;;  %p4787_p11 = scmp.lt.u32.totalorder %s5283_s11, %s6338_s22 }
 0x117   : > { %p4782_p10 = scmp.ne.s32.totalorder %s5283_s11, %s4781_s26  ;;  %p4788_p12 = scmp.lt.u32.totalorder %s4786_s28, %s4781_s26 }
 0x118   : > { %p4790_p5 = scmp.lt.u32.totalorder %s4781_s26, %s5283_s11 }
 0x119   : > { %p4784_p1 = pnand %p4783_p7, %p4782_p10  ;;  %p4789_p13 = por %p4788_p12, %p4787_p11 }
 0x11b   : > { %p4785_p3 = pneg %p4784_p1  ;;  %p4791_p2 = por %p4790_p5, %p4789_p13 }
 0x11d   : > { %p4792_p4 = pnand %p4791_p2, %p4785_p3 }
 0x11f   : > { %4795 = shalt.err (!%p4792_p4)
}
 0x120   : > { %s4796_s29 = scalar_lea.vmem %s5285_s27, 12288  ;;  %s4915_s15 = smov [#allocation2]  }
 0x121   : > { %p4797_p10 = scmp.ne.s32.totalorder %s5285_s27, %s4796_s29  ;;  %s4801_s0 = sshll.u32 %s4915_s15, 4  ;;  %s4802_s0 = int_to_ptr.vmem [resolvable:$false] %s4801_s0 }
 0x122   : > { %s4803_s2 = scalar_lea.vmem %s4802_s0, 24576  ;;  %p4804_p6 = scmp.lt.s32.totalorder %s5285_s27, %s4802_s0 }
 0x123   : > { %p4799_p1 = pnand %p4797_p10, %p4783_p7  ;;  %p4805_p11 = scmp.lt.s32.totalorder %s4803_s2, %s4796_s29 }
 0x125   : > { %p4800_p8 = pneg %p4799_p1  ;;  %p4806_p12 = por %p4805_p11, %p4804_p6 }
 0x127   : > { %p4807_p13 = pnand %p4806_p12, %p4800_p8 }
 0x129   : > { %4810 = shalt.err (!%p4807_p13)
}
 0x12a   : > { %s4916_s3 = smov 384   ;;  %s4917_s26 = smov 24  }
 0x12b   : > { %4293 = dma.hbm_to_vmem [thread:$0]  (!%p5276_p9), %s5283_s11, 12288, %s5285_s27, %s5287_s24, %s4916_s3, %s4916_s3, %s4917_s26  }
 0x12c   : > { %s6339_s21 = sld [smem:[#allocation28_spill]] }
 0x132   : > { %p6340_p7 = scmp.ne.s32.totalorder %s6339_s21, 0 }
 0x133   : > { %s5318_s13 = sand.u32 (!%p6340_p7), 1, %s4889_s18  }
 0x134   : > { %460 = sbr.rel (%p6340_p7) target bundleno = 2214 (0x8a6), region = 64  ;;  %s463_s29 = scalar_lea.sflag (!%p6340_p7), [#allocation3], %s5318_s13 }
 0x135   : > { %s4214_s28 = smul.u32 (!%p6340_p7), 768, %s5318_s13 }
 0x137   : > { %s5322_s15 = scalar_lea.vmem (!%p6340_p7), [#allocation2], %s4214_s28 }
 0x13b   : > { %4856 = dma.done.wait (%p5260_p0), %s463_s29, 12288  }
 0x13c   : > { %4858 = vsyncadd (%p5260_p0), %s463_s29, 4294955008  ;;  %p6341_p6 = scmp.eq.s32.totalorder %s5003_s23, 0 }
 0x13e   : > { %4860 = dma.done.wait (%p6341_p6), [#allocation6], 6176   ;;  %p6342_p8 = pmov %p6341_p6 }
 0x13f   : > { %p6343_p9 = pmov %p6341_p6 }
 0x140   : > { %4862 = vsyncadd (%p6342_p8), [#allocation6], 4294961120 }
 0x141   : > { %4864 = dma.done.wait (%p6343_p9), [#allocation9], 2064   ;;  %p6344_p3 = pmov %p6341_p6 }
 0x143   : > { %4866 = vsyncadd (%p6344_p3), [#allocation9], 4294965232  ;;  %p6345_p5 = pmov %p6344_p3 }
 0x144   : > { %p6346_p2 = pmov %p6344_p3 }
 0x145   : > { %4868 = dma.done.wait (%p6345_p5), [#allocation12], 2080  }
 0x146   : > { %4870 = vsyncadd (%p6346_p2), [#allocation12], 4294965216  ;;  %p6347_p0 = pmov %p6346_p2 }
 0x148   : > { %4872 = dma.done.wait (%p6347_p0), [#allocation15], 2080   ;;  %p6348_p4 = pmov %p6347_p0 }
 0x149   : > { %p6349_p10 = pmov %p6347_p0 }
 0x14a   : > { %4874 = vsyncadd (%p6348_p4), [#allocation15], 4294965216 }
 0x14b   : > { %4876 = dma.done.wait (%p6349_p10), [#allocation18], 1040   ;;  %p6350_p1 = pmov %p6347_p0 }
 0x14c   : > { %v4373_v0 = vld [vmem:[#allocation5 + $0x4] ss:$8 sps:$4 sm:$0xff]   ;;  %v4375_v1 = vld [vmem:[#allocation5] ss:$8 sps:$4 sm:$0xff]   ;;  %v4376_v2 = vld [vmem:[#allocation5 + $0x14] ss:$8 sps:$4 sm:$0xff]  }
 0x14d   : > { %4878 = vsyncadd (%p6350_p1), [#allocation18], 4294966256  ;;  %992 = vmatprep.subr.bf16.mxu0 %v4373_v0  ;;  %v4378_v3 = vld [vmem:[#allocation5 + $0x10] ss:$8 sps:$4 sm:$0xff]   ;;  %v4379_v4 = vld [vmem:[#allocation5 + $0x24] ss:$8 sps:$4 sm:$0xff]  }
 0x14e   : > { %993 = vmatpush1.bf16.msra.mxu0 %v4375_v1  ;;  %v4381_v5 = vld [vmem:[#allocation5 + $0x20] ss:$8 sps:$4 sm:$0xff]   ;;  %v4382_v6 = vld [vmem:[#allocation5 + $0x34] ss:$8 sps:$4 sm:$0xff]   ;;  %v4384_v7 = vld [vmem:[#allocation5 + $0x30] ss:$8 sps:$4 sm:$0xff]  }
 0x14f   : > { %994 = vmatprep.subr.bf16.mxu0 %v4376_v2  ;;  %v4385_v8 = vld [vmem:[#allocation5 + $0x44] ss:$8 sps:$4 sm:$0xff]   ;;  %v4387_v9 = vld [vmem:[#allocation5 + $0x40] ss:$8 sps:$4 sm:$0xff]   ;;  %v4388_v10 = vld [vmem:[#allocation5 + $0x54] ss:$8 sps:$4 sm:$0xff]  }
 0x150   : > { %v4390_v11 = vld [vmem:[#allocation5 + $0x50] ss:$8 sps:$4 sm:$0xff]   ;;  %v4391_v12 = vld [vmem:[#allocation5 + $0x64] ss:$8 sps:$4 sm:$0xff]   ;;  %v4393_v16 = vld [vmem:[#allocation5 + $0x60] ss:$8 sps:$4 sm:$0xff]  }
 0x151   : > { %v549_v13 = vld [vmem:[%s5322_s15 + $0x8] sm:$0xff]  ;;  %v552_v14 = vld [vmem:[%s5322_s15 + $0x20] sm:$0xff]  ;;  %v4394_v17 = vld [vmem:[#allocation5 + $0x74] ss:$8 sps:$4 sm:$0xff]   ;;  %s3479_s14 = sshll.u32 %s5318_s13, 8  ;;  %s3595_s11 = sshll.u32 %s5003_s23, 12 }
 0x152   : > { %995 = vmatpush1.bf16.msra.mxu0 %v4378_v3  ;;  %v693_v15 = vpack.c.bf16 %v552_v14, %v549_v13  ;;  %v4396_v18 = vld [vmem:[#allocation5 + $0x70] ss:$8 sps:$4 sm:$0xff]   ;;  %v4397_v19 = vld [vmem:[#allocation5 + $0x84] ss:$8 sps:$4 sm:$0xff]   ;;  %v4399_v20 = vld [vmem:[#allocation5 + $0x80] ss:$8 sps:$4 sm:$0xff]  }
 0x153   : > { %996 = vmatprep.subr.bf16.mxu0 %v4379_v4  ;;  %v4400_v21 = vld [vmem:[#allocation5 + $0x94] ss:$8 sps:$4 sm:$0xff]   ;;  %v4402_v22 = vld [vmem:[#allocation5 + $0x90] ss:$8 sps:$4 sm:$0xff]   ;;  %v4403_v23 = vld [vmem:[#allocation5 + $0xa4] ss:$8 sps:$4 sm:$0xff]  }
 0x154   : > { %1024 = vmatprep.mubr.bf16.mxu0 %v693_v15  ;;  %v4405_v24 = vld [vmem:[#allocation5 + $0xa0] ss:$8 sps:$4 sm:$0xff]   ;;  %v4406_v25 = vld [vmem:[#allocation5 + $0xb4] ss:$8 sps:$4 sm:$0xff]   ;;  %v4408_v26 = vld [vmem:[#allocation5 + $0xb0] ss:$8 sps:$4 sm:$0xff]  }
 0x155   : > { %v4409_v27 = vld [vmem:[#allocation5 + $0xc4] ss:$8 sps:$4 sm:$0xff]   ;;  %v4411_v28 = vld [vmem:[#allocation5 + $0xc0] ss:$8 sps:$4 sm:$0xff]   ;;  %v4412_v29 = vld [vmem:[#allocation5 + $0xd4] ss:$8 sps:$4 sm:$0xff]  }
 0x156   : > { %997 = vmatpush1.bf16.msra.mxu0 %v4381_v5  ;;  %v4414_v30 = vld [vmem:[#allocation5 + $0xd0] ss:$8 sps:$4 sm:$0xff]   ;;  %v4415_v31 = vld [vmem:[#allocation5 + $0xe4] ss:$8 sps:$4 sm:$0xff]   ;;  %v4417_v32 = vld [vmem:[#allocation5 + $0xe0] ss:$8 sps:$4 sm:$0xff]  }
 0x157   : > { %998 = vmatprep.subr.bf16.mxu0 %v4382_v6  ;;  %v4418_v33 = vld [vmem:[#allocation5 + $0xf4] ss:$8 sps:$4 sm:$0xff]   ;;  %v4420_v34 = vld [vmem:[#allocation5 + $0xf0] ss:$8 sps:$4 sm:$0xff]   ;;  %v548_v35 = vld [vmem:[%s5322_s15] sm:$0xff]  ;;  %s6151_s25 = scalar_lea.vmem [#allocation20], %s3479_s14 }
 0x158   : > { %v551_v36 = vld [vmem:[%s5322_s15 + $0x18] sm:$0xff]  ;;  %v4423_v37 = vld [vmem:[#allocation5 + $0x104] ss:$8 sps:$4 sm:$0xff]   ;;  %v558_v39 = vld [vmem:[%s5322_s15 + $0x50] sm:$0xff]  ;;  %s3284_s27 = sshll.u32 %s6151_s25, 4  ;;  %s6389_s2 = sld [smem:[#allocation33_spill]]  ;;  %s6218_s27 = int_to_ptr.vmem [resolvable:$true] %s3284_s27 }
 0x159   : > { %v555_v38 = vld [vmem:[%s5322_s15 + $0x38] sm:$0xff]  ;;  %v4421_v40 = vld [vmem:[#allocation5 + $0x100] ss:$8 sps:$4 sm:$0xff]   ;;  %v692_v41 = vpack.c.bf16 %v551_v36, %v548_v35  ;;  %v554_v44 = vld [vmem:[%s5322_s15 + $0x30] sm:$0xff]  ;;  %s3271_s23 = scalar_lea.sflag [#allocation4], %s5318_s13  ;;  %s4811_s26 = scalar_lea.vmem %s6218_s27, 4096 }
 0x15a   : > { %999 = vmatpush1.bf16.msra.mxu0 %v4384_v7  ;;  %v4426_v42 = vld [vmem:[#allocation5 + $0x114] ss:$8 sps:$4 sm:$0xff]   ;;  %v696_v43 = vpack.c.bf16 %v558_v39, %v555_v38  ;;  %v557_v45 = vld [vmem:[%s5322_s15 + $0x48] sm:$0xff]  ;;  %v564_v47 = vld [vmem:[%s5322_s15 + $0x80] sm:$0xff]  ;;  %p4812_p11 = scmp.ne.s32.totalorder %s6218_s27, %s4811_s26  ;;  %p6390_p12 = scmp.ne.s32.totalorder %s6335_s1, 0 }
 0x15b   : > { %1000 = vmatprep.subr.bf16.mxu0 %v4385_v8  ;;  %v561_v46 = vld [vmem:[%s5322_s15 + $0x68] sm:$0xff]  ;;  %v4424_v48 = vld [vmem:[#allocation5 + $0x110] ss:$8 sps:$4 sm:$0xff]   ;;  %v695_v51 = vpack.c.bf16 %v557_v45, %v554_v44  ;;  %v4432_v52 = vld [vmem:[#allocation5 + $0x134] ss:$8 sps:$4 sm:$0xff]   ;;  %s4919_s21 = smov [#allocation20]  }
 0x15c   : > { %v4429_v49 = vld [vmem:[#allocation5 + $0x124] ss:$8 sps:$4 sm:$0xff]   ;;  %v4427_v50 = vld [vmem:[#allocation5 + $0x120] ss:$8 sps:$4 sm:$0xff]   ;;  %v699_v53 = vpack.c.bf16 %v564_v47, %v561_v46  ;;  %v563_v55 = vld [vmem:[%s5322_s15 + $0x78] sm:$0xff]  ;;  %p4813_p13 = pnand %p4812_p11, %p6390_p12  ;;  %s4815_s28 = sshll.u32 %s4919_s21, 4  ;;  %s4816_s28 = int_to_ptr.vmem [resolvable:$false] %s4815_s28 }
 0x15d   : > { %v560_v54 = vld [vmem:[%s5322_s15 + $0x60] sm:$0xff]  ;;  %v567_v56 = vld [vmem:[%s5322_s15 + $0x98] sm:$0xff]  ;;  %v570_v57 = vld [vmem:[%s5322_s15 + $0xb0] sm:$0xff]  ;;  %s4817_s29 = scalar_lea.vmem %s4816_s28, 8192  ;;  %p4818_p6 = scmp.lt.s32.totalorder %s6218_s27, %s4816_s28 }
 0x15e   : > { %1001 = vmatpush1.bf16.msra.mxu0 %v4387_v9  ;;  %v4430_v58 = vld [vmem:[#allocation5 + $0x130] ss:$8 sps:$4 sm:$0xff]   ;;  %v4435_v59 = vld [vmem:[#allocation5 + $0x144] ss:$8 sps:$4 sm:$0xff]   ;;  %v4433_v60 = vld [vmem:[#allocation5 + $0x140] ss:$8 sps:$4 sm:$0xff]   ;;  %v698_v61 = vpack.c.bf16 %v563_v55, %v560_v54  ;;  %v702_v63 = vpack.c.bf16 %v570_v57, %v567_v56  ;;  %s6216_s3 = scalar_lea.hbm %s6389_s2, %s3595_s11  ;;  %p4814_p7 = pneg %p4813_p13 }
 0x15f   : > { %1002 = vmatprep.subr.bf16.mxu0 %v4388_v10  ;;  %v4438_v62 = vld [vmem:[#allocation5 + $0x154] ss:$8 sps:$4 sm:$0xff]   ;;  %v569_v1 = vld [vmem:[%s5322_s15 + $0xa8] sm:$0xff]  ;;  %v576_v3 = vld [vmem:[%s5322_s15 + $0xe0] sm:$0xff]  ;;  %p4819_p8 = scmp.lt.s32.totalorder %s4817_s29, %s4811_s26 }
 0x160   : > { %v566_v0 = vld [vmem:[%s5322_s15 + $0x90] sm:$0xff]  ;;  %v573_v2 = vld [vmem:[%s5322_s15 + $0xc8] sm:$0xff]  ;;  %v572_v10 = vld [vmem:[%s5322_s15 + $0xc0] sm:$0xff] }
 0x161   : > { %v4436_v4 = vld [vmem:[#allocation5 + $0x150] ss:$8 sps:$4 sm:$0xff]   ;;  %v4441_v5 = vld [vmem:[#allocation5 + $0x164] ss:$8 sps:$4 sm:$0xff]   ;;  %v4439_v6 = vld [vmem:[#allocation5 + $0x160] ss:$8 sps:$4 sm:$0xff]   ;;  %v701_v7 = vpack.c.bf16 %v569_v1, %v566_v0  ;;  %v705_v9 = vpack.c.bf16 %v576_v3, %v573_v2  ;;  %p4820_p9 = por %p4819_p8, %p4818_p6 }
 0x162   : > { %1003 = vmatpush1.bf16.msra.mxu0 %v4390_v11  ;;  %v4444_v8 = vld [vmem:[#allocation5 + $0x174] ss:$8 sps:$4 sm:$0xff]   ;;  %v4442_v14 = vld [vmem:[#allocation5 + $0x170] ss:$8 sps:$4 sm:$0xff]   ;;  %v596_v35 = vld [vmem:[%s5322_s15 + $0x180] sm:$0xff] }
 0x163   : > { %1004 = vmatprep.subr.bf16.mxu0 %v4391_v12  ;;  %v575_v11 = vld [vmem:[%s5322_s15 + $0xd8] sm:$0xff]  ;;  %v582_v13 = vld [vmem:[%s5322_s15 + $0x110] sm:$0xff]  ;;  %v612_v44 = vld [vmem:[%s5322_s15 + $0x200] sm:$0xff]  ;;  %p4821_p3 = pnand %p4820_p9, %p4814_p7 }
 0x164   : > { %v579_v12 = vld [vmem:[%s5322_s15 + $0xf8] sm:$0xff]  ;;  %v704_v15 = vpack.c.bf16 %v575_v11, %v572_v10  ;;  %v606_v38 = vld [vmem:[%s5322_s15 + $0x1d0] sm:$0xff]  ;;  %v608_v47 = vld [vmem:[%s5322_s15 + $0x1e0] sm:$0xff] }
 0x165   : > { %v599_v36 = vld [vmem:[%s5322_s15 + $0x198] sm:$0xff]  ;;  %v617_v54 = vld [vmem:[%s5322_s15 + $0x228] sm:$0xff]  ;;  %v624_v56 = vld [vmem:[%s5322_s15 + $0x260] sm:$0xff] }
 0x166   : > { %1005 = vmatpush1.bf16.msra.mxu0 %v4393_v16  ;;  %v708_v16 = vpack.c.bf16 %v582_v13, %v579_v12  ;;  %v716_v39 = vpack.c.bf16 %v599_v36, %v596_v35  ;;  %v621_v55 = vld [vmem:[%s5322_s15 + $0x248] sm:$0xff]  ;;  %v626_v1 = vld [vmem:[%s5322_s15 + $0x270] sm:$0xff] }
 0x167   : > { %1006 = vmatprep.subr.bf16.mxu0 %v4394_v17  ;;  %v578_v17 = vld [vmem:[%s5322_s15 + $0xf0] sm:$0xff]  ;;  %v629_v2 = vld [vmem:[%s5322_s15 + $0x288] sm:$0xff] }
 0x168   : > { %v633_v3 = vld [vmem:[%s5322_s15 + $0x2a8] sm:$0xff]  ;;  %v642_v10 = vld [vmem:[%s5322_s15 + $0x2f0] sm:$0xff] }
 0x169   : > { %v638_v13 = vld [vmem:[%s5322_s15 + $0x2d0] sm:$0xff]  ;;  %v565_v35 = vld [vmem:[%s5322_s15 + $0x88] sm:$0xff] }
 0x16a   : > { %1007 = vmatpush1.bf16.msra.mxu0 %v4396_v18  ;;  %v581_v18 = vld [vmem:[%s5322_s15 + $0x108] sm:$0xff] }
 0x16b   : > { %1008 = vmatprep.subr.bf16.mxu0 %v4397_v19  ;;  %v585_v19 = vld [vmem:[%s5322_s15 + $0x128] sm:$0xff] }
 0x16e   : > { %1009 = vmatpush1.bf16.msra.mxu0 %v4399_v20  ;;  %v588_v20 = vld [vmem:[%s5322_s15 + $0x140] sm:$0xff] }
 0x16f   : > { %1010 = vmatprep.subr.bf16.mxu0 %v4400_v21  ;;  %v707_v21 = vpack.c.bf16 %v581_v18, %v578_v17  ;;  %v4446_v17 = vld [vmem:[#allocation8] sm:$0xff]   ;;  %v4447_v18 = vld [vmem:[#allocation8 + $0x48] sm:$0xff]  }
 0x172   : > { %1011 = vmatpush1.bf16.msra.mxu0 %v4402_v22  ;;  %v711_v22 = vpack.c.bf16 %v588_v20, %v585_v19  ;;  %v4918_v19 = vmov 0   ;;  %v550_v20 = vld [vmem:[%s5322_s15 + $0x10] sm:$0xff] }
 0x173   : > { %1012 = vmatprep.subr.bf16.mxu0 %v4403_v23  ;;  %v584_v23 = vld [vmem:[%s5322_s15 + $0x120] sm:$0xff] }
 0x176   : > { %1013 = vmatpush1.bf16.msra.mxu0 %v4405_v24  ;;  %v587_v24 = vld [vmem:[%s5322_s15 + $0x138] sm:$0xff] }
 0x177   : > { %1014 = vmatprep.subr.bf16.mxu0 %v4406_v25  ;;  %v591_v25 = vld [vmem:[%s5322_s15 + $0x158] sm:$0xff] }
 0x17a   : > { %1015 = vmatpush1.bf16.msra.mxu0 %v4408_v26  ;;  %v594_v26 = vld [vmem:[%s5322_s15 + $0x170] sm:$0xff] }
 0x17b   : > { %1016 = vmatprep.subr.bf16.mxu0 %v4409_v27  ;;  %v710_v27 = vpack.c.bf16 %v587_v24, %v584_v23  ;;  %v4449_v24 = vld [vmem:[#allocation8 + $0x50] sm:$0xff]  }
 0x17e   : > { %1017 = vmatpush1.bf16.msra.mxu0 %v4411_v28  ;;  %v714_v28 = vpack.c.bf16 %v594_v26, %v591_v25  ;;  %v4450_v25 = vld [vmem:[#allocation8 + $0x10] sm:$0xff]   ;;  %v4451_v26 = vld [vmem:[#allocation8 + $0x58] sm:$0xff]  }
 0x17f   : > { %1018 = vmatprep.subr.bf16.mxu0 %v4412_v29  ;;  %v590_v29 = vld [vmem:[%s5322_s15 + $0x150] sm:$0xff] }
 0x182   : > { %1019 = vmatpush1.bf16.msra.mxu0 %v4414_v30  ;;  %v593_v30 = vld [vmem:[%s5322_s15 + $0x168] sm:$0xff] }
 0x183   : > { %1020 = vmatprep.subr.bf16.mxu0 %v4415_v31  ;;  %v597_v31 = vld [vmem:[%s5322_s15 + $0x188] sm:$0xff] }
 0x186   : > { %1021 = vmatpush1.bf16.msra.mxu0 %v4417_v32  ;;  %v600_v32 = vld [vmem:[%s5322_s15 + $0x1a0] sm:$0xff] }
 0x187   : > { %1022 = vmatprep.subr.bf16.mxu0 %v4418_v33  ;;  %v713_v33 = vpack.c.bf16 %v593_v30, %v590_v29  ;;  %v4452_v29 = vld [vmem:[#allocation8 + $0x18] sm:$0xff]  }
 0x18a   : > { %1023 = vmatpush1.bf16.msra.mxu0 %v4420_v34  ;;  %v717_v34 = vpack.c.bf16 %v600_v32, %v597_v31  ;;  %v4453_v31 = vld [vmem:[#allocation8 + $0x60] sm:$0xff]  }
 0x18b   : > { %1185 = vmatprep.subr.bf16.mxu0 %v4423_v37  ;;  %v603_v37 = vld [vmem:[%s5322_s15 + $0x1b8] sm:$0xff]  ;;  %v4454_v32 = vld [vmem:[#allocation8 + $0x20] sm:$0xff]  }
 0x18d   : > { %1025 = vmatmul.mubr.bf16.vlgmr.msra.gmra.mrb[0].mxu0 %v692_v41  ;;  %v602_v41 = vld [vmem:[%s5322_s15 + $0x1b0] sm:$0xff] }
 0x18e   : > { %1186 = vmatpush1.bf16.msra.mxu0 %v4421_v40  ;;  %1034 = vmatprep.mubr.bf16.mxu0 %v696_v43  ;;  %v720_v40 = vpack.c.bf16 %v606_v38, %v603_v37  ;;  %v609_v43 = vld [vmem:[%s5322_s15 + $0x1e8] sm:$0xff]  ;;  %v568_v37 = vld [vmem:[%s5322_s15 + $0xa0] sm:$0xff]  ;;  %v571_v38 = vld [vmem:[%s5322_s15 + $0xb8] sm:$0xff] }
 0x18f   : > { %1187 = vmatprep.subr.bf16.mxu0 %v4426_v42  ;;  %v605_v42 = vld [vmem:[%s5322_s15 + $0x1c8] sm:$0xff]  ;;  %v723_v46 = vpack.c.bf16 %v612_v44, %v609_v43  ;;  %v580_v43 = vld [vmem:[%s5322_s15 + $0x100] sm:$0xff]  ;;  %v583_v44 = vld [vmem:[%s5322_s15 + $0x118] sm:$0xff] }
 0x190   : > { %v719_v45 = vpack.c.bf16 %v605_v42, %v602_v41  ;;  %v577_v41 = vld [vmem:[%s5322_s15 + $0xe8] sm:$0xff] }
 0x192   : > { %1188 = vmatpush1.bf16.msra.mxu0 %v4424_v48  ;;  %v611_v48 = vld [vmem:[%s5322_s15 + $0x1f8] sm:$0xff] }
 0x193   : > { %1189 = vmatprep.subr.bf16.mxu0 %v4429_v49  ;;  %v615_v49 = vld [vmem:[%s5322_s15 + $0x218] sm:$0xff] }
 0x195   : > { %1035 = vmatmul.mubr.bf16.gmra.mrb[4].mxu0 %v695_v51  ;;  %v722_v51 = vpack.c.bf16 %v611_v48, %v608_v47  ;;  %v589_v47 = vld [vmem:[%s5322_s15 + $0x148] sm:$0xff] }
 0x196   : > { %1044 = vmatprep.mubr.bf16.mxu0 %v699_v53  ;;  %1190 = vmatpush1.bf16.msra.mxu0 %v4427_v50  ;;  %v618_v50 = vld [vmem:[%s5322_s15 + $0x230] sm:$0xff] }
 0x197   : > { %1191 = vmatprep.subr.bf16.mxu0 %v4432_v52  ;;  %v726_v52 = vpack.c.bf16 %v618_v50, %v615_v49  ;;  %v614_v53 = vld [vmem:[%s5322_s15 + $0x210] sm:$0xff]  ;;  %v592_v49 = vld [vmem:[%s5322_s15 + $0x160] sm:$0xff]  ;;  %v595_v50 = vld [vmem:[%s5322_s15 + $0x178] sm:$0xff] }
 0x198   : > { %v725_v57 = vpack.c.bf16 %v617_v54, %v614_v53  ;;  %v601_v53 = vld [vmem:[%s5322_s15 + $0x1a8] sm:$0xff] }
 0x19a   : > { %1192 = vmatpush1.bf16.msra.mxu0 %v4430_v58  ;;  %v729_v58 = vpack.c.bf16 %v624_v56, %v621_v55  ;;  %v604_v55 = vld [vmem:[%s5322_s15 + $0x1c0] sm:$0xff]  ;;  %v607_v56 = vld [vmem:[%s5322_s15 + $0x1d8] sm:$0xff] }
 0x19b   : > { %1193 = vmatprep.subr.bf16.mxu0 %v4435_v59  ;;  %v620_v59 = vld [vmem:[%s5322_s15 + $0x240] sm:$0xff] }
 0x19d   : > { %1045 = vmatmul.mubr.bf16.gmra.mrb[8].mxu0 %v698_v61  ;;  %v627_v61 = vld [vmem:[%s5322_s15 + $0x278] sm:$0xff] }
 0x19e   : > { %1054 = vmatprep.mubr.bf16.mxu0 %v702_v63  ;;  %1194 = vmatpush1.bf16.msra.mxu0 %v4433_v60  ;;  %v623_v60 = vld [vmem:[%s5322_s15 + $0x258] sm:$0xff] }
 0x19f   : > { %1195 = vmatprep.subr.bf16.mxu0 %v4438_v62  ;;  %v630_v62 = vld [vmem:[%s5322_s15 + $0x290] sm:$0xff]  ;;  %v728_v63 = vpack.c.bf16 %v623_v60, %v620_v59  ;;  %v613_v59 = vld [vmem:[%s5322_s15 + $0x208] sm:$0xff] }
 0x1a0   : > { %v732_v0 = vpack.c.bf16 %v630_v62, %v627_v61  ;;  %v616_v61 = vld [vmem:[%s5322_s15 + $0x220] sm:$0xff]  ;;  %v619_v62 = vld [vmem:[%s5322_s15 + $0x238] sm:$0xff] }
 0x1a2   : > { %1196 = vmatpush1.bf16.msra.mxu0 %v4436_v4  ;;  %v636_v4 = vld [vmem:[%s5322_s15 + $0x2c0] sm:$0xff] }
 0x1a3   : > { %1197 = vmatprep.subr.bf16.mxu0 %v4441_v5  ;;  %v731_v5 = vpack.c.bf16 %v629_v2, %v626_v1  ;;  %v4457_v1 = vld [vmem:[#allocation8 + $0x70] sm:$0xff]  }
 0x1a4   : > { %v4458_v2 = vld [vmem:[#allocation8 + $0x30] sm:$0xff]  }
 0x1a5   : > { %1055 = vmatmul.mubr.bf16.gmra.mrb[12].mxu0 %v701_v7  ;;  %v632_v7 = vld [vmem:[%s5322_s15 + $0x2a0] sm:$0xff] }
 0x1a6   : > { %1064 = vmatprep.mubr.bf16.mxu0 %v705_v9  ;;  %1198 = vmatpush1.bf16.msra.mxu0 %v4439_v6  ;;  %v735_v6 = vpack.c.bf16 %v636_v4, %v633_v3  ;;  %v639_v9 = vld [vmem:[%s5322_s15 + $0x2d8] sm:$0xff]  ;;  %v622_v4 = vld [vmem:[%s5322_s15 + $0x250] sm:$0xff] }
 0x1a7   : > { %1199 = vmatprep.subr.bf16.mxu0 %v4444_v8  ;;  %v635_v8 = vld [vmem:[%s5322_s15 + $0x2b8] sm:$0xff]  ;;  %v738_v12 = vpack.c.bf16 %v642_v10, %v639_v9 }
 0x1a8   : > { %v734_v11 = vpack.c.bf16 %v635_v8, %v632_v7  ;;  %v4459_v3 = vld [vmem:[#allocation8 + $0x78] sm:$0xff]  }
 0x1a9   : > { %v628_v8 = vld [vmem:[%s5322_s15 + $0x280] sm:$0xff]  ;;  %v631_v9 = vld [vmem:[%s5322_s15 + $0x298] sm:$0xff] }
 0x1aa   : > { %1200 = vmatpush1.bf16.msra.mxu0 %v4442_v14  ;;  %v641_v14 = vld [vmem:[%s5322_s15 + $0x2e8] sm:$0xff]  ;;  %v733_v10 = vpack.c.bf16 %v631_v9, %v628_v8 }
 0x1ad   : > { %1065 = vmatmul.mubr.bf16.gmra.mrb[16].mxu0 %v704_v15  ;;  %v737_v15 = vpack.c.bf16 %v641_v14, %v638_v13  ;;  %v640_v14 = vld [vmem:[%s5322_s15 + $0x2e0] sm:$0xff] }
 0x1ae   : > { %1074 = vmatprep.mubr.bf16.mxu0 %v708_v16  ;;  %v4445_v16 = vld [vmem:[#allocation8 + $0x40] sm:$0xff]  }
 0x1af   : > { %3596 = vmatprep.subr.bf16.mxu1 %v4445_v16 }
 0x1b0   : > { %3597 = vmatpush3.bf16.msra.mxu1 %v4446_v17  ;;  %v742_v17 = vlaneseq }
 0x1b1   : > { %3598 = vmatprep.subr.bf16.mxu1 %v4447_v18 }
 0x1b2   : > { %v743_v18 = vshrl.u32 %v742_v17, 7 }
 0x1b5   : > { %1075 = vmatmul.mubr.bf16.gmra.mrb[20].mxu0 %v707_v21  ;;  %v553_v21 = vld [vmem:[%s5322_s15 + $0x28] sm:$0xff] }
 0x1b6   : > { %1084 = vmatprep.mubr.bf16.mxu0 %v711_v22  ;;  %v4448_v22 = vld [vmem:[#allocation8 + $0x8] sm:$0xff]   ;;  %v694_v23 = vpack.c.bf16 %v553_v21, %v550_v20  ;;  %v744_v20 = vsub.s32 0, %v743_v18  ;;  %v740_v21 = vld [vmem:[#allocation7] sm:$0x3] }
 0x1b7   : > { %3599 = vmatpush3.bf16.msra.mxu1 %v4448_v22  ;;  %v748_v22 = vsub.s32 1, %v743_v18 }
 0x1b8   : > { %3600 = vmatprep.subr.bf16.mxu1 %v4449_v24 }
 0x1b9   : > { %v5462_v24 = vrot.slane %v740_v21, %v748_v22 }
 0x1bb   : > { %3601 = vmatpush3.bf16.msra.mxu1 %v4450_v25 }
 0x1bc   : > { %3602 = vmatprep.subr.bf16.mxu1 %v4451_v26 }
 0x1bd   : > { %1085 = vmatmul.mubr.bf16.gmra.mrb[24].mxu0 %v710_v27  ;;  %v556_v27 = vld [vmem:[%s5322_s15 + $0x40] sm:$0xff] }
 0x1be   : > { %1094 = vmatprep.mubr.bf16.mxu0 %v714_v28  ;;  %v559_v28 = vld [vmem:[%s5322_s15 + $0x58] sm:$0xff] }
 0x1bf   : > { %v697_v30 = vpack.c.bf16 %v559_v28, %v556_v27  ;;  %3603 = vmatpush3.bf16.msra.mxu1 %v4452_v29 }
 0x1c0   : > { %3604 = vmatprep.subr.bf16.mxu1 %v4453_v31  ;;  %v4461_v31 = vld [vmem:[#allocation11] sm:$0xff]  }
 0x1c3   : > { %3605 = vmatpush3.bf16.msra.mxu1 %v4454_v32 }
 0x1c5   : > { %1095 = vmatmul.mubr.bf16.gmra.mrb[28].mxu0 %v713_v33  ;;  %v4455_v33 = vld [vmem:[#allocation8 + $0x68] sm:$0xff]  }
 0x1c6   : > { %1104 = vmatprep.mubr.bf16.mxu0 %v717_v34  ;;  %v562_v34 = vld [vmem:[%s5322_s15 + $0x70] sm:$0xff]  ;;  %3606 = vmatprep.subr.bf16.mxu1 %v4455_v33 }
 0x1c7   : > { %v700_v36 = vpack.c.bf16 %v565_v35, %v562_v34 }
 0x1cd   : > { %1105 = vmatmul.mubr.bf16.gmra.mrb[32].mxu0 %v716_v39  ;;  %v703_v39 = vpack.c.bf16 %v571_v38, %v568_v37 }
 0x1ce   : > { %1114 = vmatprep.mubr.bf16.mxu0 %v720_v40  ;;  %v574_v40 = vld [vmem:[%s5322_s15 + $0xd0] sm:$0xff] }
 0x1cf   : > { %v706_v42 = vpack.c.bf16 %v577_v41, %v574_v40 }
 0x1d5   : > { %1115 = vmatmul.mubr.bf16.gmra.mrb[36].mxu0 %v719_v45  ;;  %v709_v45 = vpack.c.bf16 %v583_v44, %v580_v43 }
 0x1d6   : > { %1124 = vmatprep.mubr.bf16.mxu0 %v723_v46  ;;  %v586_v46 = vld [vmem:[%s5322_s15 + $0x130] sm:$0xff] }
 0x1d7   : > { %v712_v48 = vpack.c.bf16 %v589_v47, %v586_v46 }
 0x1dd   : > { %1125 = vmatmul.mubr.bf16.gmra.mrb[40].mxu0 %v722_v51  ;;  %v715_v51 = vpack.c.bf16 %v595_v50, %v592_v49  ;;  %v4463_v50 = vld [vmem:[#allocation11 + $0x10] sm:$0xff]  }
 0x1de   : > { %1134 = vmatprep.mubr.bf16.mxu0 %v726_v52  ;;  %v598_v52 = vld [vmem:[%s5322_s15 + $0x190] sm:$0xff] }
 0x1df   : > { %v718_v54 = vpack.c.bf16 %v601_v53, %v598_v52 }
 0x1e5   : > { %1135 = vmatmul.mubr.bf16.gmra.mrb[44].mxu0 %v725_v57  ;;  %v721_v57 = vpack.c.bf16 %v607_v56, %v604_v55 }
 0x1e6   : > { %1144 = vmatprep.mubr.bf16.mxu0 %v729_v58  ;;  %v610_v58 = vld [vmem:[%s5322_s15 + $0x1f0] sm:$0xff] }
 0x1e7   : > { %v724_v60 = vpack.c.bf16 %v613_v59, %v610_v58  ;;  %v4464_v58 = vld [vmem:[#allocation11 + $0x18] sm:$0xff]  }
 0x1ed   : > { %1145 = vmatmul.mubr.bf16.gmra.mrb[48].mxu0 %v728_v63  ;;  %v4456_v63 = vld [vmem:[#allocation8 + $0x28] sm:$0xff]  }
 0x1ee   : > { %1154 = vmatprep.mubr.bf16.mxu0 %v732_v0  ;;  %3607 = vmatpush3.bf16.msra.mxu1 %v4456_v63  ;;  %v727_v0 = vpack.c.bf16 %v619_v62, %v616_v61 }
 0x1ef   : > { %3608 = vmatprep.subr.bf16.mxu1 %v4457_v1 }
 0x1f2   : > { %3609 = vmatpush3.bf16.msra.mxu1 %v4458_v2 }
 0x1f3   : > { %3610 = vmatprep.subr.bf16.mxu1 %v4459_v3 }
 0x1f5   : > { %1155 = vmatmul.mubr.bf16.gmra.mrb[52].mxu0 %v731_v5  ;;  %v625_v5 = vld [vmem:[%s5322_s15 + $0x268] sm:$0xff] }
 0x1f6   : > { %1164 = vmatprep.mubr.bf16.mxu0 %v735_v6  ;;  %v4460_v6 = vld [vmem:[#allocation8 + $0x38] sm:$0xff]   ;;  %v730_v7 = vpack.c.bf16 %v625_v5, %v622_v4 }
 0x1f7   : > { %3611 = vmatpush3.bf16.msra.mxu1 %v4460_v6 }
 0x1f8   : > { %3828 = vmatprep.subr.bf16.mxu1 %v4461_v31 }
 0x1fd   : > { %1165 = vmatmul.mubr.bf16.gmra.mrb[56].mxu0 %v734_v11  ;;  %v634_v11 = vld [vmem:[%s5322_s15 + $0x2b0] sm:$0xff] }
 0x1fe   : > { %1174 = vmatprep.mubr.bf16.mxu0 %v738_v12  ;;  %v637_v12 = vld [vmem:[%s5322_s15 + $0x2c8] sm:$0xff] }
 0x1ff   : > { %v736_v13 = vpack.c.bf16 %v637_v12, %v634_v11 }
 0x205   : > { %1175 = vmatmul.mubr.bf16.gmra.mrb[60].mxu0 %v737_v15  ;;  %v643_v15 = vld [vmem:[%s5322_s15 + $0x2f8] sm:$0xff] }
 0x206   : > { %1217 = vmatprep.mubr.bf16.mxu0 %v4918_v19  ;;  %v739_v16 = vpack.c.bf16 %v643_v15, %v640_v14 }
 0x20d   : > { %1218 = vmatmul.mubr.bf16.vlgmr.msra.gmra.mrb[0].mxu0 %v694_v23  ;;  %v5460_v23 = vrot.slane %v740_v21, %v744_v20 }
 0x20e   : > { %1227 = vmatprep.mubr.bf16.mxu0 %v4918_v19 }
 0x215   : > { %1228 = vmatmul.mubr.bf16.gmra.mrb[4].mxu0 %v697_v30 }
 0x216   : > { %1237 = vmatprep.mubr.bf16.mxu0 %v4918_v19 }
 0x21d   : > { %1238 = vmatmul.mubr.bf16.gmra.mrb[8].mxu0 %v700_v36 }
 0x21e   : > { %1247 = vmatprep.mubr.bf16.mxu0 %v4918_v19 }
 0x225   : > { %1248 = vmatmul.mubr.bf16.gmra.mrb[12].mxu0 %v703_v39 }
 0x226   : > { %1257 = vmatprep.mubr.bf16.mxu0 %v4918_v19 }
 0x22d   : > { %1258 = vmatmul.mubr.bf16.gmra.mrb[16].mxu0 %v706_v42  ;;  %v4462_v42 = vld [vmem:[#allocation11 + $0x8] sm:$0xff]  }
 0x22e   : > { %1267 = vmatprep.mubr.bf16.mxu0 %v4918_v19 }
 0x235   : > { %1268 = vmatmul.mubr.bf16.gmra.mrb[20].mxu0 %v709_v45 }
 0x236   : > { %1277 = vmatprep.mubr.bf16.mxu0 %v4918_v19 }
 0x23d   : > { %1278 = vmatmul.mubr.bf16.gmra.mrb[24].mxu0 %v712_v48 }
 0x23e   : > { %1287 = vmatprep.mubr.bf16.mxu0 %v4918_v19 }
 0x245   : > { %1288 = vmatmul.mubr.bf16.gmra.mrb[28].mxu0 %v715_v51 }
 0x246   : > { %1297 = vmatprep.mubr.bf16.mxu0 %v4918_v19 }
 0x24d   : > { %1298 = vmatmul.mubr.bf16.gmra.mrb[32].mxu0 %v718_v54 }
 0x24e   : > { %1307 = vmatprep.mubr.bf16.mxu0 %v4918_v19 }
 0x255   : > { %1308 = vmatmul.mubr.bf16.gmra.mrb[36].mxu0 %v721_v57 }
 0x256   : > { %1317 = vmatprep.mubr.bf16.mxu0 %v4918_v19 }
 0x25d   : > { %1318 = vmatmul.mubr.bf16.gmra.mrb[40].mxu0 %v724_v60 }
 0x25e   : > { %1327 = vmatprep.mubr.bf16.mxu0 %v4918_v19 }
 0x265   : > { %1328 = vmatmul.mubr.bf16.gmra.mrb[44].mxu0 %v727_v0 }
 0x266   : > { %1337 = vmatprep.mubr.bf16.mxu0 %v4918_v19 }
 0x26d   : > { %1338 = vmatmul.mubr.bf16.gmra.mrb[48].mxu0 %v730_v7 }
 0x26e   : > { %1347 = vmatprep.mubr.bf16.mxu0 %v4918_v19 }
 0x275   : > { %1348 = vmatmul.mubr.bf16.gmra.mrb[52].mxu0 %v733_v10 }
 0x276   : > { %1357 = vmatprep.mubr.bf16.mxu0 %v4918_v19 }
 0x27d   : > { %1358 = vmatmul.mubr.bf16.gmra.mrb[56].mxu0 %v736_v13 }
 0x27e   : > { %1367 = vmatprep.mubr.bf16.mxu0 %v4918_v19 }
 0x285   : > { %1368 = vmatmul.mubr.bf16.gmra.mrb[60].mxu0 %v739_v16 }
 0x2e0   : > { %v1219_v25 = vpop.f32.mrb[0].mxu0 }
 0x2e1   : > { %v4084_v26 = vadd.f32 %v1219_v25, %v5460_v23  ;;  %v1221_v27 = vpop.f32.mrb[1].mxu0 }
 0x2e2   : > { %v4085_v28 = vadd.f32 %v1221_v27, %v5462_v24  ;;  %v1223_v19 = vpop.f32.mrb[2].mxu0 }
 0x2e3   : > { %v4086_v29 = vadd.f32 %v1223_v19, %v5460_v23  ;;  %v1225_v30 = vpop.f32.mrb[3].mxu0  ;;  %v1378_v33 = vmax.f32 %v4084_v26, 0.0 }
 0x2e4   : > { %v4087_v32 = vadd.f32 %v1225_v30, %v5462_v24  ;;  %v1379_v35 = vmax.f32 %v4085_v28, 0.0 }
 0x2e5   : > { %v1380_v34 = vmax.f32 %v4086_v29, 0.0 }
 0x2e6   : > { %v1381_v36 = vmax.f32 %v4087_v32, 0.0 }
 0x2e7   : > { %v1474_v37 = vpack.c.bf16 %v1380_v34, %v1378_v33 }
 0x2e8   : > { %v1229_v38 = vpop.f32.mrb[4].mxu0  ;;  %v1475_v39 = vpack.c.bf16 %v1381_v36, %v1379_v35 }
 0x2e9   : > { %v4088_v40 = vadd.f32 %v1229_v38, %v5460_v23  ;;  %v1231_v41 = vpop.f32.mrb[5].mxu0 }
 0x2ea   : > { %v4089_v43 = vadd.f32 %v1231_v41, %v5462_v24  ;;  %v1233_v44 = vpop.f32.mrb[6].mxu0  ;;  %1641 = vmatprep.mubr.bf16.mxu1 %v1475_v39 }
 0x2eb   : > { %v4090_v45 = vadd.f32 %v1233_v44, %v5460_v23  ;;  %v1235_v46 = vpop.f32.mrb[7].mxu0  ;;  %1642 = vmatmul.mubr.bf16.vlgmr.msra.gmra.mrb[0].mxu1 %v1474_v37  ;;  %v1382_v48 = vmax.f32 %v4088_v40, 0.0 }
 0x2ec   : > { %v4091_v47 = vadd.f32 %v1235_v46, %v5462_v24  ;;  %3829 = vmatpush3.bf16.msra.mxu1 %v4461_v31  ;;  %v1383_v51 = vmax.f32 %v4089_v43, 0.0 }
 0x2ed   : > { %v1384_v49 = vmax.f32 %v4090_v45, 0.0  ;;  %3830 = vmatprep.subr.bf16.mxu1 %v4462_v42 }
 0x2ee   : > { %v1385_v52 = vmax.f32 %v4091_v47, 0.0 }
 0x2ef   : > { %v1476_v53 = vpack.c.bf16 %v1384_v49, %v1382_v48 }
 0x2f0   : > { %v1477_v54 = vpack.c.bf16 %v1385_v52, %v1383_v51  ;;  %v1239_v55 = vpop.f32.mrb[8].mxu0  ;;  %3831 = vmatpush3.bf16.msra.mxu1 %v4462_v42 }
 0x2f1   : > { %v4092_v56 = vadd.f32 %v1239_v55, %v5460_v23  ;;  %v1241_v57 = vpop.f32.mrb[9].mxu0  ;;  %3832 = vmatprep.subr.bf16.mxu1 %v4463_v50 }
 0x2f2   : > { %v4093_v59 = vadd.f32 %v1241_v57, %v5462_v24  ;;  %v1243_v60 = vpop.f32.mrb[10].mxu0  ;;  %1649 = vmatprep.mubr.bf16.mxu1 %v1477_v54 }
 0x2f3   : > { %v4094_v61 = vadd.f32 %v1243_v60, %v5460_v23  ;;  %v1245_v62 = vpop.f32.mrb[11].mxu0  ;;  %1650 = vmatmul.mubr.bf16.gmra.mrb[4].mxu1 %v1476_v53  ;;  %v1386_v0 = vmax.f32 %v4092_v56, 0.0 }
 0x2f4   : > { %v4095_v63 = vadd.f32 %v1245_v62, %v5462_v24  ;;  %3833 = vmatpush3.bf16.msra.mxu1 %v4463_v50  ;;  %v1387_v2 = vmax.f32 %v4093_v59, 0.0 }
 0x2f5   : > { %v1388_v1 = vmax.f32 %v4094_v61, 0.0  ;;  %3834 = vmatprep.subr.bf16.mxu1 %v4464_v58 }
 0x2f6   : > { %v1389_v3 = vmax.f32 %v4095_v63, 0.0 }
 0x2f7   : > { %v1478_v4 = vpack.c.bf16 %v1388_v1, %v1386_v0 }
 0x2f8   : > { %v1479_v5 = vpack.c.bf16 %v1389_v3, %v1387_v2  ;;  %v1249_v6 = vpop.f32.mrb[12].mxu0  ;;  %3835 = vmatpush3.bf16.msra.mxu1 %v4464_v58 }
 0x2f9   : > { %v4096_v7 = vadd.f32 %v1249_v6, %v5460_v23  ;;  %v1251_v8 = vpop.f32.mrb[13].mxu0 }
 0x2fa   : > { %v4097_v9 = vadd.f32 %v1251_v8, %v5462_v24  ;;  %v1253_v10 = vpop.f32.mrb[14].mxu0  ;;  %1657 = vmatprep.mubr.bf16.mxu1 %v1479_v5 }
 0x2fb   : > { %v4098_v11 = vadd.f32 %v1253_v10, %v5460_v23  ;;  %v1255_v12 = vpop.f32.mrb[15].mxu0  ;;  %1658 = vmatmul.mubr.bf16.gmra.mrb[8].mxu1 %v1478_v4  ;;  %v1390_v14 = vmax.f32 %v4096_v7, 0.0 }
 0x2fc   : > { %v4099_v13 = vadd.f32 %v1255_v12, %v5462_v24  ;;  %v1391_v16 = vmax.f32 %v4097_v9, 0.0 }
 0x2fd   : > { %v1392_v15 = vmax.f32 %v4098_v11, 0.0 }
 0x2fe   : > { %v1393_v17 = vmax.f32 %v4099_v13, 0.0 }
 0x2ff   : > { %v1480_v18 = vpack.c.bf16 %v1392_v15, %v1390_v14 }
 0x300   : > { %v1481_v20 = vpack.c.bf16 %v1393_v17, %v1391_v16  ;;  %v1259_v21 = vpop.f32.mrb[16].mxu0 }
 0x301   : > { %v4100_v22 = vadd.f32 %v1259_v21, %v5460_v23  ;;  %v1261_v25 = vpop.f32.mrb[17].mxu0 }
 0x302   : > { %v4101_v26 = vadd.f32 %v1261_v25, %v5462_v24  ;;  %v1263_v27 = vpop.f32.mrb[18].mxu0  ;;  %1665 = vmatprep.mubr.bf16.mxu1 %v1481_v20 }
 0x303   : > { %v4102_v28 = vadd.f32 %v1263_v27, %v5460_v23  ;;  %v1265_v19 = vpop.f32.mrb[19].mxu0  ;;  %1666 = vmatmul.mubr.bf16.gmra.mrb[12].mxu1 %v1480_v18  ;;  %v1394_v30 = vmax.f32 %v4100_v22, 0.0 }
 0x304   : > { %v4103_v29 = vadd.f32 %v1265_v19, %v5462_v24  ;;  %v1395_v32 = vmax.f32 %v4101_v26, 0.0 }
 0x305   : > { %v1396_v31 = vmax.f32 %v4102_v28, 0.0 }
 0x306   : > { %v1397_v33 = vmax.f32 %v4103_v29, 0.0 }
 0x307   : > { %v1482_v34 = vpack.c.bf16 %v1396_v31, %v1394_v30 }
 0x308   : > { %v1483_v35 = vpack.c.bf16 %v1397_v33, %v1395_v32  ;;  %v1269_v36 = vpop.f32.mrb[20].mxu0 }
 0x309   : > { %v4104_v37 = vadd.f32 %v1269_v36, %v5460_v23  ;;  %v1271_v38 = vpop.f32.mrb[21].mxu0 }
 0x30a   : > { %v4105_v39 = vadd.f32 %v1271_v38, %v5462_v24  ;;  %v1273_v40 = vpop.f32.mrb[22].mxu0  ;;  %1673 = vmatprep.mubr.bf16.mxu1 %v1483_v35 }
 0x30b   : > { %v4106_v41 = vadd.f32 %v1273_v40, %v5460_v23  ;;  %v1275_v42 = vpop.f32.mrb[23].mxu0  ;;  %1674 = vmatmul.mubr.bf16.gmra.mrb[16].mxu1 %v1482_v34  ;;  %v1398_v44 = vmax.f32 %v4104_v37, 0.0 }
 0x30c   : > { %v4107_v43 = vadd.f32 %v1275_v42, %v5462_v24  ;;  %v1399_v46 = vmax.f32 %v4105_v39, 0.0 }
 0x30d   : > { %v1400_v45 = vmax.f32 %v4106_v41, 0.0 }
 0x30e   : > { %v1401_v47 = vmax.f32 %v4107_v43, 0.0 }
 0x30f   : > { %v1484_v48 = vpack.c.bf16 %v1400_v45, %v1398_v44 }
 0x310   : > { %v1485_v49 = vpack.c.bf16 %v1401_v47, %v1399_v46  ;;  %v1279_v50 = vpop.f32.mrb[24].mxu0 }
 0x311   : > { %v4108_v51 = vadd.f32 %v1279_v50, %v5460_v23  ;;  %v1281_v52 = vpop.f32.mrb[25].mxu0 }
 0x312   : > { %v4109_v53 = vadd.f32 %v1281_v52, %v5462_v24  ;;  %v1283_v54 = vpop.f32.mrb[26].mxu0  ;;  %1681 = vmatprep.mubr.bf16.mxu1 %v1485_v49 }
 0x313   : > { %v4110_v55 = vadd.f32 %v1283_v54, %v5460_v23  ;;  %v1285_v56 = vpop.f32.mrb[27].mxu0  ;;  %1682 = vmatmul.mubr.bf16.gmra.mrb[20].mxu1 %v1484_v48  ;;  %v1402_v58 = vmax.f32 %v4108_v51, 0.0 }
 0x314   : > { %v4111_v57 = vadd.f32 %v1285_v56, %v5462_v24  ;;  %v1403_v60 = vmax.f32 %v4109_v53, 0.0 }
 0x315   : > { %v1404_v59 = vmax.f32 %v4110_v55, 0.0 }
 0x316   : > { %v1405_v61 = vmax.f32 %v4111_v57, 0.0 }
 0x317   : > { %v1486_v62 = vpack.c.bf16 %v1404_v59, %v1402_v58 }
 0x318   : > { %v1487_v63 = vpack.c.bf16 %v1405_v61, %v1403_v60  ;;  %v1289_v0 = vpop.f32.mrb[28].mxu0 }
 0x319   : > { %v4112_v1 = vadd.f32 %v1289_v0, %v5460_v23  ;;  %v1291_v2 = vpop.f32.mrb[29].mxu0 }
 0x31a   : > { %v4113_v3 = vadd.f32 %v1291_v2, %v5462_v24  ;;  %v1293_v4 = vpop.f32.mrb[30].mxu0  ;;  %1689 = vmatprep.mubr.bf16.mxu1 %v1487_v63 }
 0x31b   : > { %v4114_v5 = vadd.f32 %v1293_v4, %v5460_v23  ;;  %v1295_v6 = vpop.f32.mrb[31].mxu0  ;;  %1690 = vmatmul.mubr.bf16.gmra.mrb[24].mxu1 %v1486_v62  ;;  %v1406_v8 = vmax.f32 %v4112_v1, 0.0 }
 0x31c   : > { %v4115_v7 = vadd.f32 %v1295_v6, %v5462_v24  ;;  %v1407_v10 = vmax.f32 %v4113_v3, 0.0 }
 0x31d   : > { %v1408_v9 = vmax.f32 %v4114_v5, 0.0 }
 0x31e   : > { %v1409_v11 = vmax.f32 %v4115_v7, 0.0 }
 0x31f   : > { %v1488_v12 = vpack.c.bf16 %v1408_v9, %v1406_v8  ;;  %v4465_v9 = vld [vmem:[#allocation11 + $0x20] sm:$0xff]  }
 0x320   : > { %v1489_v13 = vpack.c.bf16 %v1409_v11, %v1407_v10  ;;  %v1299_v14 = vpop.f32.mrb[32].mxu0  ;;  %3836 = vmatprep.subr.bf16.mxu1 %v4465_v9 }
 0x321   : > { %v4116_v15 = vadd.f32 %v1299_v14, %v5460_v23  ;;  %v1301_v16 = vpop.f32.mrb[33].mxu0  ;;  %3837 = vmatpush3.bf16.msra.mxu1 %v4465_v9 }
 0x322   : > { %v4117_v17 = vadd.f32 %v1301_v16, %v5462_v24  ;;  %v1303_v18 = vpop.f32.mrb[34].mxu0  ;;  %1697 = vmatprep.mubr.bf16.mxu1 %v1489_v13 }
 0x323   : > { %v4118_v20 = vadd.f32 %v1303_v18, %v5460_v23  ;;  %v1305_v21 = vpop.f32.mrb[35].mxu0  ;;  %1698 = vmatmul.mubr.bf16.gmra.mrb[28].mxu1 %v1488_v12  ;;  %v1410_v25 = vmax.f32 %v4116_v15, 0.0 }
 0x324   : > { %v4119_v22 = vadd.f32 %v1305_v21, %v5462_v24  ;;  %v1411_v27 = vmax.f32 %v4117_v17, 0.0  ;;  %v4466_v17 = vld [vmem:[#allocation11 + $0x28] sm:$0xff]  }
 0x325   : > { %v1412_v26 = vmax.f32 %v4118_v20, 0.0  ;;  %3838 = vmatprep.subr.bf16.mxu1 %v4466_v17 }
 0x326   : > { %v1413_v28 = vmax.f32 %v4119_v22, 0.0  ;;  %3839 = vmatpush3.bf16.msra.mxu1 %v4466_v17 }
 0x327   : > { %v1490_v19 = vpack.c.bf16 %v1412_v26, %v1410_v25 }
 0x328   : > { %v1491_v29 = vpack.c.bf16 %v1413_v28, %v1411_v27  ;;  %v1309_v30 = vpop.f32.mrb[36].mxu0  ;;  %v4467_v28 = vld [vmem:[#allocation11 + $0x30] sm:$0xff]  }
 0x329   : > { %v4120_v31 = vadd.f32 %v1309_v30, %v5460_v23  ;;  %v1311_v32 = vpop.f32.mrb[37].mxu0  ;;  %3840 = vmatprep.subr.bf16.mxu1 %v4467_v28 }
 0x32a   : > { %v4121_v33 = vadd.f32 %v1311_v32, %v5462_v24  ;;  %v1313_v34 = vpop.f32.mrb[38].mxu0  ;;  %1705 = vmatprep.mubr.bf16.mxu1 %v1491_v29  ;;  %3841 = vmatpush3.bf16.msra.mxu1 %v4467_v28 }
 0x32b   : > { %v4122_v35 = vadd.f32 %v1313_v34, %v5460_v23  ;;  %v1315_v36 = vpop.f32.mrb[39].mxu0  ;;  %1706 = vmatmul.mubr.bf16.gmra.mrb[32].mxu1 %v1490_v19  ;;  %v1414_v38 = vmax.f32 %v4120_v31, 0.0 }
 0x32c   : > { %v4123_v37 = vadd.f32 %v1315_v36, %v5462_v24  ;;  %v1415_v40 = vmax.f32 %v4121_v33, 0.0 }
 0x32d   : > { %v1416_v39 = vmax.f32 %v4122_v35, 0.0  ;;  %v4468_v35 = vld [vmem:[#allocation11 + $0x38] sm:$0xff]  }
 0x32e   : > { %v1417_v41 = vmax.f32 %v4123_v37, 0.0  ;;  %3842 = vmatprep.subr.bf16.mxu1 %v4468_v35 }
 0x32f   : > { %v1492_v42 = vpack.c.bf16 %v1416_v39, %v1414_v38  ;;  %3843 = vmatpush3.bf16.msra.mxu1 %v4468_v35 }
 0x330   : > { %v1493_v43 = vpack.c.bf16 %v1417_v41, %v1415_v40  ;;  %v1319_v44 = vpop.f32.mrb[40].mxu0 }
 0x331   : > { %v4124_v45 = vadd.f32 %v1319_v44, %v5460_v23  ;;  %v1321_v46 = vpop.f32.mrb[41].mxu0 }
 0x332   : > { %v4125_v47 = vadd.f32 %v1321_v46, %v5462_v24  ;;  %v1323_v48 = vpop.f32.mrb[42].mxu0  ;;  %1713 = vmatprep.mubr.bf16.mxu1 %v1493_v43 }
 0x333   : > { %v4126_v49 = vadd.f32 %v1323_v48, %v5460_v23  ;;  %v1325_v50 = vpop.f32.mrb[43].mxu0  ;;  %1714 = vmatmul.mubr.bf16.gmra.mrb[36].mxu1 %v1492_v42  ;;  %v1418_v52 = vmax.f32 %v4124_v45, 0.0 }
 0x334   : > { %v4127_v51 = vadd.f32 %v1325_v50, %v5462_v24  ;;  %v1419_v54 = vmax.f32 %v4125_v47, 0.0 }
 0x335   : > { %v1420_v53 = vmax.f32 %v4126_v49, 0.0 }
 0x336   : > { %v1421_v55 = vmax.f32 %v4127_v51, 0.0 }
 0x337   : > { %v1494_v56 = vpack.c.bf16 %v1420_v53, %v1418_v52 }
 0x338   : > { %v1495_v57 = vpack.c.bf16 %v1421_v55, %v1419_v54  ;;  %v1329_v58 = vpop.f32.mrb[44].mxu0 }
 0x339   : > { %v4128_v59 = vadd.f32 %v1329_v58, %v5460_v23  ;;  %v1331_v60 = vpop.f32.mrb[45].mxu0 }
 0x33a   : > { %v4129_v61 = vadd.f32 %v1331_v60, %v5462_v24  ;;  %v1333_v62 = vpop.f32.mrb[46].mxu0  ;;  %1721 = vmatprep.mubr.bf16.mxu1 %v1495_v57 }
 0x33b   : > { %v4130_v63 = vadd.f32 %v1333_v62, %v5460_v23  ;;  %v1335_v0 = vpop.f32.mrb[47].mxu0  ;;  %1722 = vmatmul.mubr.bf16.gmra.mrb[40].mxu1 %v1494_v56  ;;  %v1422_v2 = vmax.f32 %v4128_v59, 0.0 }
 0x33c   : > { %v4131_v1 = vadd.f32 %v1335_v0, %v5462_v24  ;;  %v1423_v4 = vmax.f32 %v4129_v61, 0.0 }
 0x33d   : > { %v1424_v3 = vmax.f32 %v4130_v63, 0.0 }
 0x33e   : > { %v1425_v5 = vmax.f32 %v4131_v1, 0.0 }
 0x33f   : > { %v1496_v6 = vpack.c.bf16 %v1424_v3, %v1422_v2 }
 0x340   : > { %v1497_v7 = vpack.c.bf16 %v1425_v5, %v1423_v4  ;;  %v1339_v8 = vpop.f32.mrb[48].mxu0 }
 0x341   : > { %v4132_v10 = vadd.f32 %v1339_v8, %v5460_v23  ;;  %v1341_v11 = vpop.f32.mrb[49].mxu0 }
 0x342   : > { %v4133_v12 = vadd.f32 %v1341_v11, %v5462_v24  ;;  %v1343_v13 = vpop.f32.mrb[50].mxu0  ;;  %1729 = vmatprep.mubr.bf16.mxu1 %v1497_v7  ;;  %v5528_v7 = vld [vmem:[#allocation10] ss:$0 sm:$0xff] }
 0x343   : > { %v4134_v14 = vadd.f32 %v1343_v13, %v5460_v23  ;;  %v1345_v15 = vpop.f32.mrb[51].mxu0  ;;  %1730 = vmatmul.mubr.bf16.gmra.mrb[44].mxu1 %v1496_v6  ;;  %v1426_v18 = vmax.f32 %v4132_v10, 0.0 }
 0x344   : > { %v4135_v16 = vadd.f32 %v1345_v15, %v5462_v24  ;;  %v1427_v21 = vmax.f32 %v4133_v12, 0.0 }
 0x345   : > { %v1428_v20 = vmax.f32 %v4134_v14, 0.0 }
 0x346   : > { %v1429_v22 = vmax.f32 %v4135_v16, 0.0 }
 0x347   : > { %v1498_v25 = vpack.c.bf16 %v1428_v20, %v1426_v18 }
 0x348   : > { %v1499_v26 = vpack.c.bf16 %v1429_v22, %v1427_v21  ;;  %v1349_v27 = vpop.f32.mrb[52].mxu0 }
 0x349   : > { %v4136_v19 = vadd.f32 %v1349_v27, %v5460_v23  ;;  %v1351_v29 = vpop.f32.mrb[53].mxu0 }
 0x34a   : > { %v4137_v30 = vadd.f32 %v1351_v29, %v5462_v24  ;;  %v1353_v31 = vpop.f32.mrb[54].mxu0  ;;  %1737 = vmatprep.mubr.bf16.mxu1 %v1499_v26 }
 0x34b   : > { %v4138_v32 = vadd.f32 %v1353_v31, %v5460_v23  ;;  %v1355_v33 = vpop.f32.mrb[55].mxu0  ;;  %1738 = vmatmul.mubr.bf16.gmra.mrb[48].mxu1 %v1498_v25  ;;  %v1430_v36 = vmax.f32 %v4136_v19, 0.0 }
 0x34c   : > { %v4139_v34 = vadd.f32 %v1355_v33, %v5462_v24  ;;  %v1431_v38 = vmax.f32 %v4137_v30, 0.0 }
 0x34d   : > { %v1432_v37 = vmax.f32 %v4138_v32, 0.0 }
 0x34e   : > { %v1433_v39 = vmax.f32 %v4139_v34, 0.0  ;;  %v4470_v34 = vld [vmem:[#allocation14 + $0x8] sm:$0xff]  }
 0x34f   : > { %v1500_v40 = vpack.c.bf16 %v1432_v37, %v1430_v36 }
 0x350   : > { %v1501_v41 = vpack.c.bf16 %v1433_v39, %v1431_v38  ;;  %v1359_v42 = vpop.f32.mrb[56].mxu0  ;;  %v4471_v39 = vld [vmem:[#allocation14 + $0x10] sm:$0xff]  }
 0x351   : > { %v4140_v43 = vadd.f32 %v1359_v42, %v5460_v23  ;;  %v1361_v44 = vpop.f32.mrb[57].mxu0 }
 0x352   : > { %v4141_v45 = vadd.f32 %v1361_v44, %v5462_v24  ;;  %v1363_v46 = vpop.f32.mrb[58].mxu0  ;;  %1745 = vmatprep.mubr.bf16.mxu1 %v1501_v41 }
 0x353   : > { %v4142_v47 = vadd.f32 %v1363_v46, %v5460_v23  ;;  %v1365_v48 = vpop.f32.mrb[59].mxu0  ;;  %1746 = vmatmul.mubr.bf16.gmra.mrb[52].mxu1 %v1500_v40  ;;  %v1434_v50 = vmax.f32 %v4140_v43, 0.0 }
 0x354   : > { %v4143_v49 = vadd.f32 %v1365_v48, %v5462_v24  ;;  %v1435_v52 = vmax.f32 %v4141_v45, 0.0 }
 0x355   : > { %v1436_v51 = vmax.f32 %v4142_v47, 0.0  ;;  %v4472_v47 = vld [vmem:[#allocation14 + $0x18] sm:$0xff]  }
 0x356   : > { %v1437_v53 = vmax.f32 %v4143_v49, 0.0 }
 0x357   : > { %v1502_v54 = vpack.c.bf16 %v1436_v51, %v1434_v50 }
 0x358   : > { %v1503_v55 = vpack.c.bf16 %v1437_v53, %v1435_v52  ;;  %v1369_v56 = vpop.f32.mrb[60].mxu0  ;;  %v4473_v52 = vld [vmem:[#allocation14 + $0x20] sm:$0xff]  }
 0x359   : > { %v4144_v57 = vadd.f32 %v1369_v56, %v5460_v23  ;;  %v1371_v58 = vpop.f32.mrb[61].mxu0 }
 0x35a   : > { %v4145_v59 = vadd.f32 %v1371_v58, %v5462_v24  ;;  %v1373_v60 = vpop.f32.mrb[62].mxu0  ;;  %1753 = vmatprep.mubr.bf16.mxu1 %v1503_v55 }
 0x35b   : > { %v4146_v61 = vadd.f32 %v1373_v60, %v5460_v23  ;;  %v1375_v62 = vpop.f32.mrb[63].mxu0  ;;  %1754 = vmatmul.mubr.bf16.gmra.mrb[56].mxu1 %v1502_v54  ;;  %v1438_v0 = vmax.f32 %v4144_v57, 0.0  ;;  %v4474_v60 = vld [vmem:[#allocation14 + $0x28] sm:$0xff]  }
 0x35c   : > { %v4147_v63 = vadd.f32 %v1375_v62, %v5462_v24  ;;  %v1439_v2 = vmax.f32 %v4145_v59, 0.0  ;;  %v4469_v24 = vld [vmem:[#allocation14] sm:$0xff]  }
 0x35d   : > { %v1440_v1 = vmax.f32 %v4146_v61, 0.0  ;;  %3876 = vmatprep.subr.bf16.mxu1 %v4469_v24 }
 0x35e   : > { %v1441_v3 = vmax.f32 %v4147_v63, 0.0 }
 0x35f   : > { %v1504_v4 = vpack.c.bf16 %v1440_v1, %v1438_v0 }
 0x360   : > { %v1505_v5 = vpack.c.bf16 %v1441_v3, %v1439_v2 }
 0x362   : > { %1761 = vmatprep.mubr.bf16.mxu1 %v1505_v5 }
 0x363   : > { %1762 = vmatmul.mubr.bf16.gmra.mrb[60].mxu1 %v1504_v4 }
 0x3be   : > { %v3612_v6 = vpop.f32.mrb[0].mxu1 }
 0x3bf   : > { %v3613_v8 = vpop.f32.mrb[1].mxu1 }
 0x3c0   : > { %v3614_v9 = vadd.f32 %v3613_v8, %v3612_v6  ;;  %v3615_v10 = vpop.f32.mrb[2].mxu1 }
 0x3c1   : > { %v3616_v11 = vpop.f32.mrb[3].mxu1 }
 0x3c2   : > { %v5531_v23 = vadd.f32 %v3614_v9, %v5528_v7  ;;  %v3617_v12 = vadd.f32 %v3616_v11, %v3615_v10 }
 0x3c4   : > { %v5534_v13 = vadd.f32 %v3617_v12, %v5528_v7  ;;  %v1770_v14 = vmax.f32 %v5531_v23, 0.0 }
 0x3c6   : > { %v1771_v15 = vmax.f32 %v5534_v13, 0.0  ;;  %v3618_v16 = vpop.f32.mrb[4].mxu1 }
 0x3c7   : > { %v3619_v17 = vpop.f32.mrb[5].mxu1 }
 0x3c8   : > { %v3620_v18 = vadd.f32 %v3619_v17, %v3618_v16  ;;  %v3621_v20 = vpop.f32.mrb[6].mxu1  ;;  %v1818_v21 = vpack.c.bf16 %v1771_v15, %v1770_v14 }
 0x3c9   : > { %v3622_v22 = vpop.f32.mrb[7].mxu1 }
 0x3ca   : > { %v5543_v25 = vadd.f32 %v3620_v18, %v5528_v7  ;;  %v3623_v26 = vadd.f32 %v3622_v22, %v3621_v20  ;;  %3844 = vmatprep.mubr.bf16.mxu1 %v1818_v21 }
 0x3cc   : > { %v5546_v27 = vadd.f32 %v3623_v26, %v5528_v7  ;;  %v1772_v28 = vmax.f32 %v5543_v25, 0.0 }
 0x3ce   : > { %v1773_v19 = vmax.f32 %v5546_v27, 0.0  ;;  %v3624_v29 = vpop.f32.mrb[8].mxu1 }
 0x3cf   : > { %v3625_v30 = vpop.f32.mrb[9].mxu1 }
 0x3d0   : > { %v1819_v31 = vpack.c.bf16 %v1773_v19, %v1772_v28  ;;  %v3626_v32 = vadd.f32 %v3625_v30, %v3624_v29  ;;  %v3627_v33 = vpop.f32.mrb[10].mxu1 }
 0x3d1   : > { %v3628_v35 = vpop.f32.mrb[11].mxu1 }
 0x3d2   : > { %v5555_v36 = vadd.f32 %v3626_v32, %v5528_v7  ;;  %v3629_v37 = vadd.f32 %v3628_v35, %v3627_v33  ;;  %3845 = vmatmul.mubr.bf16.vlgmr.msra.gmra.mrb[64].mxu1 %v1819_v31 }
 0x3d3   : > { %3877 = vmatpush3.bf16.msra.mxu1 %v4469_v24 }
 0x3d4   : > { %v5558_v38 = vadd.f32 %v3629_v37, %v5528_v7  ;;  %3878 = vmatprep.subr.bf16.mxu1 %v4470_v34  ;;  %v1774_v40 = vmax.f32 %v5555_v36, 0.0 }
 0x3d6   : > { %v1775_v41 = vmax.f32 %v5558_v38, 0.0  ;;  %v3630_v42 = vpop.f32.mrb[12].mxu1 }
 0x3d7   : > { %v3631_v43 = vpop.f32.mrb[13].mxu1  ;;  %3879 = vmatpush3.bf16.msra.mxu1 %v4470_v34 }
 0x3d8   : > { %v3632_v44 = vadd.f32 %v3631_v43, %v3630_v42  ;;  %v3633_v45 = vpop.f32.mrb[14].mxu1  ;;  %v1820_v46 = vpack.c.bf16 %v1775_v41, %v1774_v40  ;;  %3880 = vmatprep.subr.bf16.mxu1 %v4471_v39 }
 0x3d9   : > { %v3634_v48 = vpop.f32.mrb[15].mxu1 }
 0x3da   : > { %v5567_v49 = vadd.f32 %v3632_v44, %v5528_v7  ;;  %v3635_v50 = vadd.f32 %v3634_v48, %v3633_v45  ;;  %3848 = vmatprep.mubr.bf16.mxu1 %v1820_v46 }
 0x3db   : > { %3881 = vmatpush3.bf16.msra.mxu1 %v4471_v39 }
 0x3dc   : > { %v5570_v51 = vadd.f32 %v3635_v50, %v5528_v7  ;;  %3882 = vmatprep.subr.bf16.mxu1 %v4472_v47  ;;  %v1776_v53 = vmax.f32 %v5567_v49, 0.0 }
 0x3de   : > { %v1777_v54 = vmax.f32 %v5570_v51, 0.0  ;;  %v3636_v55 = vpop.f32.mrb[16].mxu1 }
 0x3df   : > { %v3637_v56 = vpop.f32.mrb[17].mxu1  ;;  %3883 = vmatpush3.bf16.msra.mxu1 %v4472_v47 }
 0x3e0   : > { %v3638_v57 = vadd.f32 %v3637_v56, %v3636_v55  ;;  %v3639_v58 = vpop.f32.mrb[18].mxu1  ;;  %v1821_v59 = vpack.c.bf16 %v1777_v54, %v1776_v53  ;;  %3884 = vmatprep.subr.bf16.mxu1 %v4473_v52 }
 0x3e1   : > { %v3640_v61 = vpop.f32.mrb[19].mxu1 }
 0x3e2   : > { %v5579_v62 = vadd.f32 %v3638_v57, %v5528_v7  ;;  %v3641_v63 = vadd.f32 %v3640_v61, %v3639_v58  ;;  %3849 = vmatmul.mubr.bf16.gmra.mrb[68].mxu1 %v1821_v59 }
 0x3e3   : > { %3885 = vmatpush3.bf16.msra.mxu1 %v4473_v52 }
 0x3e4   : > { %v5582_v0 = vadd.f32 %v3641_v63, %v5528_v7  ;;  %3886 = vmatprep.subr.bf16.mxu1 %v4474_v60  ;;  %v1778_v1 = vmax.f32 %v5579_v62, 0.0 }
 0x3e6   : > { %v1779_v2 = vmax.f32 %v5582_v0, 0.0  ;;  %v3642_v3 = vpop.f32.mrb[20].mxu1 }
 0x3e7   : > { %v3643_v4 = vpop.f32.mrb[21].mxu1  ;;  %3887 = vmatpush3.bf16.msra.mxu1 %v4474_v60 }
 0x3e8   : > { %v3644_v5 = vadd.f32 %v3643_v4, %v3642_v3  ;;  %v3645_v6 = vpop.f32.mrb[22].mxu1  ;;  %v1822_v8 = vpack.c.bf16 %v1779_v2, %v1778_v1 }
 0x3e9   : > { %v3646_v9 = vpop.f32.mrb[23].mxu1 }
 0x3ea   : > { %v5591_v10 = vadd.f32 %v3644_v5, %v5528_v7  ;;  %v3647_v11 = vadd.f32 %v3646_v9, %v3645_v6  ;;  %3852 = vmatprep.mubr.bf16.mxu1 %v1822_v8 }
 0x3ec   : > { %v5594_v12 = vadd.f32 %v3647_v11, %v5528_v7  ;;  %v1780_v24 = vmax.f32 %v5591_v10, 0.0 }
 0x3ee   : > { %v1781_v16 = vmax.f32 %v5594_v12, 0.0  ;;  %v3648_v17 = vpop.f32.mrb[24].mxu1 }
 0x3ef   : > { %v3649_v18 = vpop.f32.mrb[25].mxu1 }
 0x3f0   : > { %v3650_v20 = vadd.f32 %v3649_v18, %v3648_v17  ;;  %v3651_v21 = vpop.f32.mrb[26].mxu1  ;;  %v1823_v22 = vpack.c.bf16 %v1781_v16, %v1780_v24 }
 0x3f1   : > { %v3652_v26 = vpop.f32.mrb[27].mxu1 }
 0x3f2   : > { %v5603_v29 = vadd.f32 %v3650_v20, %v5528_v7  ;;  %v3653_v30 = vadd.f32 %v3652_v26, %v3651_v21  ;;  %3853 = vmatmul.mubr.bf16.gmra.mrb[72].mxu1 %v1823_v22 }
 0x3f4   : > { %v5606_v31 = vadd.f32 %v3653_v30, %v5528_v7  ;;  %v1782_v32 = vmax.f32 %v5603_v29, 0.0 }
 0x3f6   : > { %v6299_v33 = vmax.f32 %v5606_v31, 0.0  ;;  %v3654_v34 = vpop.f32.mrb[28].mxu1 }
 0x3f7   : > { %v3655_v35 = vpop.f32.mrb[29].mxu1 }
 0x3f8   : > { %v3656_v37 = vadd.f32 %v3655_v35, %v3654_v34  ;;  %v3657_v39 = vpop.f32.mrb[30].mxu1  ;;  %v1824_v42 = vpack.c.bf16 %v6299_v33, %v1782_v32  ;;  %v4478_v33 = vld [vmem:[#allocation11 + $0x48] sm:$0xff]  }
 0x3f9   : > { %v3658_v43 = vpop.f32.mrb[31].mxu1 }
 0x3fa   : > { %v5615_v44 = vadd.f32 %v3656_v37, %v5528_v7  ;;  %v3659_v45 = vadd.f32 %v3658_v43, %v3657_v39  ;;  %3856 = vmatprep.mubr.bf16.mxu1 %v1824_v42 }
 0x3fc   : > { %v5618_v46 = vadd.f32 %v3659_v45, %v5528_v7  ;;  %v6301_v47 = vmax.f32 %v5615_v44, 0.0 }
 0x3fe   : > { %v6300_v48 = vmax.f32 %v5618_v46, 0.0  ;;  %v3660_v50 = vpop.f32.mrb[32].mxu1 }
 0x3ff   : > { %v3661_v52 = vpop.f32.mrb[33].mxu1 }
 0x400   : > { %v3662_v55 = vadd.f32 %v3661_v52, %v3660_v50  ;;  %v3663_v56 = vpop.f32.mrb[34].mxu1  ;;  %v1825_v57 = vpack.c.bf16 %v6300_v48, %v6301_v47  ;;  %v4480_v47 = vld [vmem:[#allocation11 + $0x58] sm:$0xff]  }
 0x401   : > { %v3664_v58 = vpop.f32.mrb[35].mxu1 }
 0x402   : > { %v5627_v59 = vadd.f32 %v3662_v55, %v5528_v7  ;;  %v3665_v60 = vadd.f32 %v3664_v58, %v3663_v56  ;;  %3857 = vmatmul.mubr.bf16.gmra.mrb[76].mxu1 %v1825_v57 }
 0x404   : > { %v5630_v61 = vadd.f32 %v3665_v60, %v5528_v7  ;;  %v6298_v63 = vmax.f32 %v5627_v59, 0.0 }
 0x406   : > { %v6293_v3 = vmax.f32 %v5630_v61, 0.0  ;;  %v3666_v4 = vpop.f32.mrb[36].mxu1 }
 0x407   : > { %v3667_v5 = vpop.f32.mrb[37].mxu1 }
 0x408   : > { %v3668_v6 = vadd.f32 %v3667_v5, %v3666_v4  ;;  %v3669_v8 = vpop.f32.mrb[38].mxu1  ;;  %v1826_v9 = vpack.c.bf16 %v6293_v3, %v6298_v63 }
 0x409   : > { %v3670_v11 = vpop.f32.mrb[39].mxu1 }
 0x40a   : > { %v5639_v17 = vadd.f32 %v3668_v6, %v5528_v7  ;;  %v3671_v18 = vadd.f32 %v3670_v11, %v3669_v8  ;;  %3860 = vmatprep.mubr.bf16.mxu1 %v1826_v9 }
 0x40c   : > { %v5642_v20 = vadd.f32 %v3671_v18, %v5528_v7  ;;  %v6295_v21 = vmax.f32 %v5639_v17, 0.0 }
 0x40e   : > { %v6294_v22 = vmax.f32 %v5642_v20, 0.0  ;;  %v3672_v26 = vpop.f32.mrb[40].mxu1 }
 0x40f   : > { %v3673_v30 = vpop.f32.mrb[41].mxu1 }
 0x410   : > { %v3674_v34 = vadd.f32 %v3673_v30, %v3672_v26  ;;  %v3675_v35 = vpop.f32.mrb[42].mxu1  ;;  %v1827_v37 = vpack.c.bf16 %v6294_v22, %v6295_v21 }
 0x411   : > { %v3676_v39 = vpop.f32.mrb[43].mxu1 }
 0x412   : > { %v5651_v42 = vadd.f32 %v3674_v34, %v5528_v7  ;;  %v3677_v43 = vadd.f32 %v3676_v39, %v3675_v35  ;;  %3861 = vmatmul.mubr.bf16.gmra.mrb[80].mxu1 %v1827_v37 }
 0x414   : > { %v5654_v45 = vadd.f32 %v3677_v43, %v5528_v7  ;;  %v6288_v50 = vmax.f32 %v5651_v42, 0.0 }
 0x416   : > { %v6283_v52 = vmax.f32 %v5654_v45, 0.0  ;;  %v3678_v55 = vpop.f32.mrb[44].mxu1 }
 0x417   : > { %v3679_v56 = vpop.f32.mrb[45].mxu1 }
 0x418   : > { %v3680_v57 = vadd.f32 %v3679_v56, %v3678_v55  ;;  %v3681_v58 = vpop.f32.mrb[46].mxu1  ;;  %v1828_v60 = vpack.c.bf16 %v6283_v52, %v6288_v50 }
 0x419   : > { %v3682_v4 = vpop.f32.mrb[47].mxu1 }
 0x41a   : > { %v5663_v5 = vadd.f32 %v3680_v57, %v5528_v7  ;;  %v3683_v6 = vadd.f32 %v3682_v4, %v3681_v58  ;;  %3864 = vmatprep.mubr.bf16.mxu1 %v1828_v60  ;;  %v4475_v60 = vld [vmem:[#allocation14 + $0x30] sm:$0xff]  }
 0x41b   : > { %3888 = vmatprep.subr.bf16.mxu1 %v4475_v60 }
 0x41c   : > { %v5666_v8 = vadd.f32 %v3683_v6, %v5528_v7  ;;  %v6287_v9 = vmax.f32 %v5663_v5, 0.0  ;;  %3889 = vmatpush3.bf16.msra.mxu1 %v4475_v60 }
 0x41e   : > { %v6286_v11 = vmax.f32 %v5666_v8, 0.0  ;;  %v3684_v18 = vpop.f32.mrb[48].mxu1 }
 0x41f   : > { %v3685_v26 = vpop.f32.mrb[49].mxu1 }
 0x420   : > { %v3686_v30 = vadd.f32 %v3685_v26, %v3684_v18  ;;  %v3687_v34 = vpop.f32.mrb[50].mxu1  ;;  %v1829_v35 = vpack.c.bf16 %v6286_v11, %v6287_v9 }
 0x421   : > { %v3688_v37 = vpop.f32.mrb[51].mxu1 }
 0x422   : > { %v5675_v39 = vadd.f32 %v3686_v30, %v5528_v7  ;;  %v3689_v43 = vadd.f32 %v3688_v37, %v3687_v34  ;;  %3865 = vmatmul.mubr.bf16.gmra.mrb[84].mxu1 %v1829_v35  ;;  %v4476_v37 = vld [vmem:[#allocation14 + $0x38] sm:$0xff]  }
 0x423   : > { %3890 = vmatprep.subr.bf16.mxu1 %v4476_v37 }
 0x424   : > { %v5678_v55 = vadd.f32 %v3689_v43, %v5528_v7  ;;  %v6285_v56 = vmax.f32 %v5675_v39, 0.0  ;;  %3891 = vmatpush3.bf16.msra.mxu1 %v4476_v37 }
 0x426   : > { %v6284_v57 = vmax.f32 %v5678_v55, 0.0  ;;  %v3690_v58 = vpop.f32.mrb[52].mxu1 }
 0x427   : > { %v3691_v4 = vpop.f32.mrb[53].mxu1 }
 0x428   : > { %v3692_v6 = vadd.f32 %v3691_v4, %v3690_v58  ;;  %v3693_v18 = vpop.f32.mrb[54].mxu1  ;;  %v1830_v26 = vpack.c.bf16 %v6284_v57, %v6285_v56 }
 0x429   : > { %v3694_v30 = vpop.f32.mrb[55].mxu1 }
 0x42a   : > { %v5687_v34 = vadd.f32 %v3692_v6, %v5528_v7  ;;  %v3695_v35 = vadd.f32 %v3694_v30, %v3693_v18  ;;  %3868 = vmatprep.mubr.bf16.mxu1 %v1830_v26 }
 0x42c   : > { %v5690_v43 = vadd.f32 %v3695_v35, %v5528_v7  ;;  %v6290_v58 = vmax.f32 %v5687_v34, 0.0 }
 0x42e   : > { %v6289_v4 = vmax.f32 %v5690_v43, 0.0  ;;  %v3696_v52 = vpop.f32.mrb[56].mxu1 }
 0x42f   : > { %v3697_v57 = vpop.f32.mrb[57].mxu1 }
 0x430   : > { %v3698_v56 = vadd.f32 %v3697_v57, %v3696_v52  ;;  %v3699_v11 = vpop.f32.mrb[58].mxu1  ;;  %v1831_v60 = vpack.c.bf16 %v6289_v4, %v6290_v58 }
 0x431   : > { %v3700_v6 = vpop.f32.mrb[59].mxu1 }
 0x432   : > { %v5699_v18 = vadd.f32 %v3698_v56, %v5528_v7  ;;  %v3701_v26 = vadd.f32 %v3700_v6, %v3699_v11  ;;  %3869 = vmatmul.mubr.bf16.gmra.mrb[88].mxu1 %v1831_v60 }
 0x434   : > { %v5702_v30 = vadd.f32 %v3701_v26, %v5528_v7  ;;  %v6292_v35 = vmax.f32 %v5699_v18, 0.0 }
 0x436   : > { %v6291_v37 = vmax.f32 %v5702_v30, 0.0  ;;  %v3702_v52 = vpop.f32.mrb[60].mxu1 }
 0x437   : > { %v3703_v57 = vpop.f32.mrb[61].mxu1 }
 0x438   : > { %v3704_v9 = vadd.f32 %v3703_v57, %v3702_v52  ;;  %v3705_v50 = vpop.f32.mrb[62].mxu1  ;;  %v1832_v4 = vpack.c.bf16 %v6291_v37, %v6292_v35  ;;  %v4477_v57 = vld [vmem:[#allocation11 + $0x40] sm:$0xff]  }
 0x439   : > { %v3706_v56 = vpop.f32.mrb[63].mxu1  ;;  %3924 = vmatprep.subr.bf16.mxu1 %v4477_v57  ;;  %v5722_v37 = vld [vmem:[#allocation13] ss:$0 sm:$0xff] }
 0x43a   : > { %v5711_v11 = vadd.f32 %v3704_v9, %v5528_v7  ;;  %v3707_v60 = vadd.f32 %v3706_v56, %v3705_v50  ;;  %3872 = vmatprep.mubr.bf16.mxu1 %v1832_v4 }
 0x43c   : > { %v5714_v6 = vadd.f32 %v3707_v60, %v5528_v7  ;;  %v6297_v26 = vmax.f32 %v5711_v11, 0.0 }
 0x43e   : > { %v6296_v58 = vmax.f32 %v5714_v6, 0.0 }
 0x440   : > { %v1833_v52 = vpack.c.bf16 %v6296_v58, %v6297_v26 }
 0x442   : > { %3873 = vmatmul.mubr.bf16.gmra.mrb[92].mxu1 %v1833_v52 }
 0x4a5   : > { %v3846_v9 = vpop.f32.mrb[64].mxu1 }
 0x4a6   : > { %v1932_v50 = vadd.f32 %v3846_v9, %v5722_v37  ;;  %v1923_v4 = vpop.f32.mrb[65].mxu1  ;;  %v4479_v9 = vld [vmem:[#allocation11 + $0x50] sm:$0xff]  }
 0x4a7   : > { %v1924_v7 = vadd.f32 %v5722_v37, %v1923_v4  ;;  %v3847_v56 = vpop.f32.mrb[66].mxu1 }
 0x4a8   : > { %v1935_v60 = vadd.f32 %v3847_v56, %v5722_v37  ;;  %v1926_v35 = vpop.f32.mrb[67].mxu1  ;;  %v2052_v22 = vmax.f32 %v1932_v50, 0.0 }
 0x4a9   : > { %v1927_v3 = vadd.f32 %v5722_v37, %v1926_v35  ;;  %v2050_v58 = vmax.f32 %v1924_v7, 0.0 }
 0x4aa   : > { %v2053_v21 = vmax.f32 %v1935_v60, 0.0 }
 0x4ab   : > { %v2051_v52 = vmax.f32 %v1927_v3, 0.0 }
 0x4ac   : > { %v2099_v26 = vpack.c.bf16 %v2053_v21, %v2052_v22 }
 0x4ad   : > { %v2098_v63 = vpack.c.bf16 %v2051_v52, %v2050_v58 }
 0x4af   : > { %3892 = vmatprep.mubr.bf16.mxu1 %v2098_v63 }
 0x4b0   : > { %3893 = vmatmul.mubr.bf16.vlgmr.msra.gmra.mrb[96].mxu1 %v2099_v26  ;;  %v4481_v26 = vld [vmem:[#allocation11 + $0x60] sm:$0xff]  }
 0x4b1   : > { %3925 = vmatpush3.bf16.msra.mxu1 %v4477_v57 }
 0x4b2   : > { %3926 = vmatprep.subr.bf16.mxu1 %v4478_v33 }
 0x4b5   : > { %v3850_v48 = vpop.f32.mrb[68].mxu1  ;;  %3927 = vmatpush3.bf16.msra.mxu1 %v4478_v33 }
 0x4b6   : > { %v1948_v4 = vadd.f32 %v3850_v48, %v5722_v37  ;;  %v1939_v56 = vpop.f32.mrb[69].mxu1  ;;  %3928 = vmatprep.subr.bf16.mxu1 %v4479_v9 }
 0x4b7   : > { %v1940_v35 = vadd.f32 %v5722_v37, %v1939_v56  ;;  %v3851_v50 = vpop.f32.mrb[70].mxu1 }
 0x4b8   : > { %v1951_v3 = vadd.f32 %v3851_v50, %v5722_v37  ;;  %v1942_v21 = vpop.f32.mrb[71].mxu1  ;;  %v2056_v63 = vmax.f32 %v1948_v4, 0.0 }
 0x4b9   : > { %v1943_v22 = vadd.f32 %v5722_v37, %v1942_v21  ;;  %3929 = vmatpush3.bf16.msra.mxu1 %v4479_v9  ;;  %v2054_v57 = vmax.f32 %v1940_v35, 0.0 }
 0x4ba   : > { %v2057_v58 = vmax.f32 %v1951_v3, 0.0  ;;  %3930 = vmatprep.subr.bf16.mxu1 %v4480_v47 }
 0x4bb   : > { %v2055_v33 = vmax.f32 %v1943_v22, 0.0 }
 0x4bc   : > { %v2101_v7 = vpack.c.bf16 %v2057_v58, %v2056_v63 }
 0x4bd   : > { %v2100_v48 = vpack.c.bf16 %v2055_v33, %v2054_v57  ;;  %3931 = vmatpush3.bf16.msra.mxu1 %v4480_v47 }
 0x4be   : > { %3932 = vmatprep.subr.bf16.mxu1 %v4481_v26 }
 0x4bf   : > { %3896 = vmatprep.mubr.bf16.mxu1 %v2100_v48 }
 0x4c0   : > { %3897 = vmatmul.mubr.bf16.gmra.mrb[100].mxu1 %v2101_v7 }
 0x4c1   : > { %3933 = vmatpush3.bf16.msra.mxu1 %v4481_v26 }
 0x4c5   : > { %v3854_v60 = vpop.f32.mrb[72].mxu1 }
 0x4c6   : > { %v1964_v52 = vadd.f32 %v3854_v60, %v5722_v37  ;;  %v1955_v56 = vpop.f32.mrb[73].mxu1 }
 0x4c7   : > { %v1956_v50 = vadd.f32 %v5722_v37, %v1955_v56  ;;  %v3855_v9 = vpop.f32.mrb[74].mxu1 }
 0x4c8   : > { %v1967_v4 = vadd.f32 %v3855_v9, %v5722_v37  ;;  %v1958_v3 = vpop.f32.mrb[75].mxu1  ;;  %v2060_v21 = vmax.f32 %v1964_v52, 0.0 }
 0x4c9   : > { %v1959_v35 = vadd.f32 %v5722_v37, %v1958_v3  ;;  %v2058_v63 = vmax.f32 %v1956_v50, 0.0 }
 0x4ca   : > { %v2061_v22 = vmax.f32 %v1967_v4, 0.0 }
 0x4cb   : > { %v2059_v47 = vmax.f32 %v1959_v35, 0.0 }
 0x4cc   : > { %v2103_v58 = vpack.c.bf16 %v2061_v22, %v2060_v21 }
 0x4cd   : > { %v2102_v57 = vpack.c.bf16 %v2059_v47, %v2058_v63 }
 0x4cf   : > { %3900 = vmatprep.mubr.bf16.mxu1 %v2102_v57 }
 0x4d0   : > { %3901 = vmatmul.mubr.bf16.gmra.mrb[104].mxu1 %v2103_v58 }
 0x4d5   : > { %v3858_v26 = vpop.f32.mrb[76].mxu1 }
 0x4d6   : > { %v1980_v33 = vadd.f32 %v3858_v26, %v5722_v37  ;;  %v1971_v7 = vpop.f32.mrb[77].mxu1 }
 0x4d7   : > { %v1972_v48 = vadd.f32 %v5722_v37, %v1971_v7  ;;  %v3859_v60 = vpop.f32.mrb[78].mxu1 }
 0x4d8   : > { %v1983_v56 = vadd.f32 %v3859_v60, %v5722_v37  ;;  %v1974_v9 = vpop.f32.mrb[79].mxu1  ;;  %v2064_v52 = vmax.f32 %v1980_v33, 0.0 }
 0x4d9   : > { %v1975_v3 = vadd.f32 %v5722_v37, %v1974_v9  ;;  %v2062_v50 = vmax.f32 %v1972_v48, 0.0 }
 0x4da   : > { %v2065_v4 = vmax.f32 %v1983_v56, 0.0 }
 0x4db   : > { %v2063_v35 = vmax.f32 %v1975_v3, 0.0 }
 0x4dc   : > { %v2105_v21 = vpack.c.bf16 %v2065_v4, %v2064_v52 }
 0x4dd   : > { %v2104_v22 = vpack.c.bf16 %v2063_v35, %v2062_v50 }
 0x4df   : > { %3904 = vmatprep.mubr.bf16.mxu1 %v2104_v22 }
 0x4e0   : > { %3905 = vmatmul.mubr.bf16.gmra.mrb[108].mxu1 %v2105_v21 }
 0x4e5   : > { %v3862_v63 = vpop.f32.mrb[80].mxu1 }
 0x4e6   : > { %v1996_v47 = vadd.f32 %v3862_v63, %v5722_v37  ;;  %v1987_v58 = vpop.f32.mrb[81].mxu1 }
 0x4e7   : > { %v1988_v57 = vadd.f32 %v5722_v37, %v1987_v58  ;;  %v3863_v26 = vpop.f32.mrb[82].mxu1 }
 0x4e8   : > { %v1999_v7 = vadd.f32 %v3863_v26, %v5722_v37  ;;  %v1990_v60 = vpop.f32.mrb[83].mxu1  ;;  %v2068_v33 = vmax.f32 %v1996_v47, 0.0 }
 0x4e9   : > { %v1991_v9 = vadd.f32 %v5722_v37, %v1990_v60  ;;  %v2066_v48 = vmax.f32 %v1988_v57, 0.0 }
 0x4ea   : > { %v2069_v56 = vmax.f32 %v1999_v7, 0.0 }
 0x4eb   : > { %v2067_v3 = vmax.f32 %v1991_v9, 0.0 }
 0x4ec   : > { %v2107_v52 = vpack.c.bf16 %v2069_v56, %v2068_v33 }
 0x4ed   : > { %v2106_v4 = vpack.c.bf16 %v2067_v3, %v2066_v48  ;;  %v4482_v48 = vld [vmem:[#allocation11 + $0x68] sm:$0xff]  }
 0x4ee   : > { %3934 = vmatprep.subr.bf16.mxu1 %v4482_v48 }
 0x4ef   : > { %3908 = vmatprep.mubr.bf16.mxu1 %v2106_v4  ;;  %3935 = vmatpush3.bf16.msra.mxu1 %v4482_v48 }
 0x4f0   : > { %3909 = vmatmul.mubr.bf16.gmra.mrb[112].mxu1 %v2107_v52 }
 0x4f5   : > { %v3866_v50 = vpop.f32.mrb[84].mxu1 }
 0x4f6   : > { %v2012_v35 = vadd.f32 %v3866_v50, %v5722_v37  ;;  %v2003_v21 = vpop.f32.mrb[85].mxu1  ;;  %v4483_v50 = vld [vmem:[#allocation11 + $0x70] sm:$0xff]  }
 0x4f7   : > { %v2004_v22 = vadd.f32 %v5722_v37, %v2003_v21  ;;  %v3867_v63 = vpop.f32.mrb[86].mxu1  ;;  %3936 = vmatprep.subr.bf16.mxu1 %v4483_v50 }
 0x4f8   : > { %v2015_v58 = vadd.f32 %v3867_v63, %v5722_v37  ;;  %v2006_v26 = vpop.f32.mrb[87].mxu1  ;;  %v2072_v47 = vmax.f32 %v2012_v35, 0.0  ;;  %3937 = vmatpush3.bf16.msra.mxu1 %v4483_v50 }
 0x4f9   : > { %v2007_v60 = vadd.f32 %v5722_v37, %v2006_v26  ;;  %v2070_v57 = vmax.f32 %v2004_v22, 0.0 }
 0x4fa   : > { %v2073_v7 = vmax.f32 %v2015_v58, 0.0 }
 0x4fb   : > { %v2071_v9 = vmax.f32 %v2007_v60, 0.0 }
 0x4fc   : > { %v2109_v33 = vpack.c.bf16 %v2073_v7, %v2072_v47  ;;  %v4484_v47 = vld [vmem:[#allocation11 + $0x78] sm:$0xff]  }
 0x4fd   : > { %v2108_v56 = vpack.c.bf16 %v2071_v9, %v2070_v57  ;;  %3938 = vmatprep.subr.bf16.mxu1 %v4484_v47 }
 0x4fe   : > { %3939 = vmatpush3.bf16.msra.mxu1 %v4484_v47 }
 0x4ff   : > { %3912 = vmatprep.mubr.bf16.mxu1 %v2108_v56 }
 0x500   : > { %3913 = vmatmul.mubr.bf16.gmra.mrb[116].mxu1 %v2109_v33 }
 0x505   : > { %v3870_v3 = vpop.f32.mrb[88].mxu1 }
 0x506   : > { %v2028_v52 = vadd.f32 %v3870_v3, %v5722_v37  ;;  %v2019_v4 = vpop.f32.mrb[89].mxu1 }
 0x507   : > { %v2020_v21 = vadd.f32 %v5722_v37, %v2019_v4  ;;  %v3871_v63 = vpop.f32.mrb[90].mxu1 }
 0x508   : > { %v2031_v35 = vadd.f32 %v3871_v63, %v5722_v37  ;;  %v2022_v58 = vpop.f32.mrb[91].mxu1  ;;  %v2076_v26 = vmax.f32 %v2028_v52, 0.0 }
 0x509   : > { %v2023_v22 = vadd.f32 %v5722_v37, %v2022_v58  ;;  %v2074_v7 = vmax.f32 %v2020_v21, 0.0 }
 0x50a   : > { %v2077_v60 = vmax.f32 %v2031_v35, 0.0 }
 0x50b   : > { %v2075_v57 = vmax.f32 %v2023_v22, 0.0 }
 0x50c   : > { %v2111_v9 = vpack.c.bf16 %v2077_v60, %v2076_v26 }
 0x50d   : > { %v2110_v33 = vpack.c.bf16 %v2075_v57, %v2074_v7  ;;  %v4485_v7 = vld [vmem:[#allocation14 + $0x40] sm:$0xff]   ;;  %v4486_v57 = vld [vmem:[#allocation14 + $0x48] sm:$0xff]  }
 0x50e   : > { %3972 = vmatprep.subr.bf16.mxu0 %v4485_v7 }
 0x50f   : > { %3916 = vmatprep.mubr.bf16.mxu1 %v2110_v33  ;;  %3973 = vmatpush3.bf16.msra.mxu0 %v4485_v7 }
 0x510   : > { %3917 = vmatmul.mubr.bf16.gmra.mrb[120].mxu1 %v2111_v9  ;;  %v5756_v9 = vld [vmem:[#allocation16] ss:$0 sm:$0xff]  ;;  %3974 = vmatprep.subr.bf16.mxu0 %v4486_v57 }
 0x513   : > { %3975 = vmatpush3.bf16.msra.mxu0 %v4486_v57 }
 0x515   : > { %v3874_v56 = vpop.f32.mrb[92].mxu1 }
 0x516   : > { %v2044_v48 = vadd.f32 %v3874_v56, %v5722_v37  ;;  %v2035_v3 = vpop.f32.mrb[93].mxu1 }
 0x517   : > { %v2036_v4 = vadd.f32 %v5722_v37, %v2035_v3  ;;  %v3875_v63 = vpop.f32.mrb[94].mxu1 }
 0x518   : > { %v2047_v50 = vadd.f32 %v3875_v63, %v5722_v37  ;;  %v2038_v52 = vpop.f32.mrb[95].mxu1  ;;  %v2080_v21 = vmax.f32 %v2044_v48, 0.0 }
 0x519   : > { %v2039_v35 = vadd.f32 %v5722_v37, %v2038_v52  ;;  %v2078_v22 = vmax.f32 %v2036_v4, 0.0  ;;  %v4487_v37 = vld [vmem:[#allocation14 + $0x50] sm:$0xff]  }
 0x51a   : > { %v2081_v58 = vmax.f32 %v2047_v50, 0.0  ;;  %3976 = vmatprep.subr.bf16.mxu0 %v4487_v37 }
 0x51b   : > { %v2079_v26 = vmax.f32 %v2039_v35, 0.0  ;;  %3977 = vmatpush3.bf16.msra.mxu0 %v4487_v37 }
 0x51c   : > { %v2113_v60 = vpack.c.bf16 %v2081_v58, %v2080_v21 }
 0x51d   : > { %v2112_v47 = vpack.c.bf16 %v2079_v26, %v2078_v22  ;;  %v4488_v22 = vld [vmem:[#allocation14 + $0x58] sm:$0xff]  }
 0x51e   : > { %3978 = vmatprep.subr.bf16.mxu0 %v4488_v22 }
 0x51f   : > { %3920 = vmatprep.mubr.bf16.mxu1 %v2112_v47  ;;  %3979 = vmatpush3.bf16.msra.mxu0 %v4488_v22 }
 0x520   : > { %3921 = vmatmul.mubr.bf16.gmra.mrb[124].mxu1 %v2113_v60 }
 0x583   : > { %v3894_v33 = vpop.f32.mrb[96].mxu1 }
 0x584   : > { %v2212_v56 = vadd.f32 %v3894_v33, %v5756_v9  ;;  %v2203_v3 = vpop.f32.mrb[97].mxu1 }
 0x585   : > { %v2204_v48 = vadd.f32 %v5756_v9, %v2203_v3  ;;  %v3895_v4 = vpop.f32.mrb[98].mxu1 }
 0x586   : > { %v2215_v63 = vadd.f32 %v3895_v4, %v5756_v9  ;;  %v2206_v50 = vpop.f32.mrb[99].mxu1  ;;  %v5768_v21 = vadd.f32 %v2212_v56, %v1772_v28  ;;  %v4489_v28 = vld [vmem:[#allocation14 + $0x60] sm:$0xff]  }
 0x587   : > { %v5763_v52 = vadd.f32 %v2204_v48, %v1770_v14  ;;  %v2207_v35 = vadd.f32 %v5756_v9, %v2206_v50  ;;  %3980 = vmatprep.subr.bf16.mxu0 %v4489_v28 }
 0x588   : > { %v5772_v58 = vadd.f32 %v2215_v63, %v1773_v19  ;;  %v2364_v25 = vmax.f32 %v5768_v21, 0.0  ;;  %3981 = vmatpush3.bf16.msra.mxu0 %v4489_v28 }
 0x589   : > { %v5776_v26 = vadd.f32 %v2207_v35, %v1771_v15  ;;  %v2362_v14 = vmax.f32 %v5763_v52, 0.0  ;;  %v4490_v15 = vld [vmem:[#allocation14 + $0x68] sm:$0xff]  }
 0x58a   : > { %v2365_v23 = vmax.f32 %v5772_v58, 0.0  ;;  %3982 = vmatprep.subr.bf16.mxu0 %v4490_v15 }
 0x58b   : > { %v2363_v60 = vmax.f32 %v5776_v26, 0.0 }
 0x58c   : > { %v2412_v13 = vpack.c.bf16 %v2365_v23, %v2364_v25  ;;  %3983 = vmatpush3.bf16.msra.mxu0 %v4490_v15 }
 0x58d   : > { %v2411_v27 = vpack.c.bf16 %v2363_v60, %v2362_v14 }
 0x58f   : > { %3940 = vmatprep.mubr.bf16.mxu1 %v2411_v27 }
 0x590   : > { %3941 = vmatmul.mubr.bf16.vlgmr.msra.gmra.mrb[128].mxu1 %v2412_v13 }
 0x593   : > { %v3898_v19 = vpop.f32.mrb[100].mxu1 }
 0x594   : > { %v2228_v47 = vadd.f32 %v3898_v19, %v5756_v9  ;;  %v2219_v7 = vpop.f32.mrb[101].mxu1 }
 0x595   : > { %v2220_v57 = vadd.f32 %v5756_v9, %v2219_v7  ;;  %v3899_v33 = vpop.f32.mrb[102].mxu1 }
 0x596   : > { %v2231_v56 = vadd.f32 %v3899_v33, %v5756_v9  ;;  %v2222_v3 = vpop.f32.mrb[103].mxu1  ;;  %v5800_v4 = vadd.f32 %v2228_v47, %v1776_v53 }
 0x597   : > { %v5795_v37 = vadd.f32 %v2220_v57, %v1774_v40  ;;  %v2223_v48 = vadd.f32 %v5756_v9, %v2222_v3 }
 0x598   : > { %v5804_v63 = vadd.f32 %v2231_v56, %v1777_v54  ;;  %v2368_v22 = vmax.f32 %v5800_v4, 0.0 }
 0x599   : > { %v5808_v50 = vadd.f32 %v2223_v48, %v1775_v41  ;;  %v2366_v36 = vmax.f32 %v5795_v37, 0.0 }
 0x59a   : > { %v2369_v35 = vmax.f32 %v5804_v63, 0.0 }
 0x59b   : > { %v2367_v40 = vmax.f32 %v5808_v50, 0.0 }
 0x59c   : > { %v2414_v38 = vpack.c.bf16 %v2369_v35, %v2368_v22 }
 0x59d   : > { %v2413_v49 = vpack.c.bf16 %v2367_v40, %v2366_v36 }
 0x59f   : > { %3944 = vmatprep.mubr.bf16.mxu1 %v2413_v49 }
 0x5a0   : > { %3945 = vmatmul.mubr.bf16.gmra.mrb[132].mxu1 %v2414_v38 }
 0x5a3   : > { %v3902_v41 = vpop.f32.mrb[104].mxu1 }
 0x5a4   : > { %v2244_v51 = vadd.f32 %v3902_v41, %v5756_v9  ;;  %v2235_v53 = vpop.f32.mrb[105].mxu1 }
 0x5a5   : > { %v2236_v54 = vadd.f32 %v5756_v9, %v2235_v53  ;;  %v3903_v28 = vpop.f32.mrb[106].mxu1 }
 0x5a6   : > { %v2247_v27 = vadd.f32 %v3903_v28, %v5756_v9  ;;  %v2238_v13 = vpop.f32.mrb[107].mxu1  ;;  %v5832_v47 = vadd.f32 %v2244_v51, %v1780_v24  ;;  %v6351_v51 = vmax.f32 %v5615_v44, 0.0 }
 0x5a7   : > { %v5827_v15 = vadd.f32 %v2236_v54, %v1778_v1  ;;  %v2239_v19 = vadd.f32 %v5756_v9, %v2238_v13  ;;  %v6352_v54 = vmax.f32 %v5618_v46, 0.0 }
 0x5a8   : > { %v5836_v7 = vadd.f32 %v2247_v27, %v1781_v16  ;;  %v2372_v56 = vmax.f32 %v5832_v47, 0.0  ;;  %v6353_v27 = vmax.f32 %v5606_v31, 0.0 }
 0x5a9   : > { %v5840_v57 = vadd.f32 %v2239_v19, %v1779_v2  ;;  %v2370_v62 = vmax.f32 %v5827_v15, 0.0 }
 0x5aa   : > { %v2373_v33 = vmax.f32 %v5836_v7, 0.0 }
 0x5ab   : > { %v2371_v1 = vmax.f32 %v5840_v57, 0.0 }
 0x5ac   : > { %v2416_v0 = vpack.c.bf16 %v2373_v33, %v2372_v56 }
 0x5ad   : > { %v2415_v10 = vpack.c.bf16 %v2371_v1, %v2370_v62 }
 0x5af   : > { %3948 = vmatprep.mubr.bf16.mxu1 %v2415_v10 }
 0x5b0   : > { %3949 = vmatmul.mubr.bf16.gmra.mrb[136].mxu1 %v2416_v0 }
 0x5b3   : > { %v3906_v2 = vpop.f32.mrb[108].mxu1 }
 0x5b4   : > { %v2260_v12 = vadd.f32 %v3906_v2, %v5756_v9  ;;  %v2251_v24 = vpop.f32.mrb[109].mxu1 }
 0x5b5   : > { %v2252_v16 = vadd.f32 %v5756_v9, %v2251_v24  ;;  %v3907_v3 = vpop.f32.mrb[110].mxu1 }
 0x5b6   : > { %v2263_v48 = vadd.f32 %v3907_v3, %v5756_v9  ;;  %v2254_v49 = vpop.f32.mrb[111].mxu1  ;;  %v5864_v53 = vadd.f32 %v2260_v12, %v6351_v51  ;;  %v6355_v51 = vmax.f32 %v5639_v17, 0.0 }
 0x5b7   : > { %v5859_v38 = vadd.f32 %v2252_v16, %v1782_v32  ;;  %v2255_v41 = vadd.f32 %v5756_v9, %v2254_v49 }
 0x5b8   : > { %v5868_v28 = vadd.f32 %v2263_v48, %v6352_v54  ;;  %v2376_v10 = vmax.f32 %v5864_v53, 0.0  ;;  %v6354_v48 = vmax.f32 %v5627_v59, 0.0 }
 0x5b9   : > { %v5872_v13 = vadd.f32 %v2255_v41, %v6353_v27  ;;  %v6320_v29 = vmax.f32 %v5859_v38, 0.0  ;;  %v6356_v27 = vmax.f32 %v5642_v20, 0.0 }
 0x5ba   : > { %v6319_v19 = vmax.f32 %v5868_v28, 0.0 }
 0x5bb   : > { %v6318_v32 = vmax.f32 %v5872_v13, 0.0 }
 0x5bc   : > { %v2418_v31 = vpack.c.bf16 %v6319_v19, %v2376_v10 }
 0x5bd   : > { %v2417_v44 = vpack.c.bf16 %v6318_v32, %v6320_v29  ;;  %v4497_v29 = vld [vmem:[#allocation17 + $0x20] sm:$0xff]  }
 0x5bf   : > { %3952 = vmatprep.mubr.bf16.mxu1 %v2417_v44 }
 0x5c0   : > { %3953 = vmatmul.mubr.bf16.gmra.mrb[140].mxu1 %v2418_v31  ;;  %v6357_v31 = vmax.f32 %v5630_v61, 0.0 }
 0x5c3   : > { %v3910_v46 = vpop.f32.mrb[112].mxu1 }
 0x5c4   : > { %v2276_v0 = vadd.f32 %v3910_v46, %v5756_v9  ;;  %v2267_v2 = vpop.f32.mrb[113].mxu1 }
 0x5c5   : > { %v2268_v12 = vadd.f32 %v5756_v9, %v2267_v2  ;;  %v3911_v24 = vpop.f32.mrb[114].mxu1 }
 0x5c6   : > { %v2279_v16 = vadd.f32 %v3911_v24, %v5756_v9  ;;  %v2270_v3 = vpop.f32.mrb[115].mxu1  ;;  %v5896_v54 = vadd.f32 %v2276_v0, %v6355_v51 }
 0x5c7   : > { %v5891_v49 = vadd.f32 %v2268_v12, %v6354_v48  ;;  %v2271_v41 = vadd.f32 %v5756_v9, %v2270_v3 }
 0x5c8   : > { %v5900_v44 = vadd.f32 %v2279_v16, %v6356_v27  ;;  %v6309_v24 = vmax.f32 %v5896_v54, 0.0  ;;  %v6358_v27 = vmax.f32 %v5651_v42, 0.0 }
 0x5c9   : > { %v5904_v46 = vadd.f32 %v2271_v41, %v6357_v31  ;;  %v6304_v59 = vmax.f32 %v5891_v49, 0.0 }
 0x5ca   : > { %v6303_v2 = vmax.f32 %v5900_v44, 0.0 }
 0x5cb   : > { %v6302_v12 = vmax.f32 %v5904_v46, 0.0 }
 0x5cc   : > { %v2420_v61 = vpack.c.bf16 %v6303_v2, %v6309_v24  ;;  %v6359_v2 = vmax.f32 %v5663_v5, 0.0 }
 0x5cd   : > { %v2419_v17 = vpack.c.bf16 %v6302_v12, %v6304_v59 }
 0x5cf   : > { %3956 = vmatprep.mubr.bf16.mxu1 %v2419_v17 }
 0x5d0   : > { %3957 = vmatmul.mubr.bf16.gmra.mrb[144].mxu1 %v2420_v61  ;;  %v6360_v61 = vmax.f32 %v5666_v8, 0.0 }
 0x5d3   : > { %v3914_v20 = vpop.f32.mrb[116].mxu1 }
 0x5d4   : > { %v2292_v0 = vadd.f32 %v3914_v20, %v5756_v9  ;;  %v2283_v16 = vpop.f32.mrb[117].mxu1 }
 0x5d5   : > { %v2284_v3 = vadd.f32 %v5756_v9, %v2283_v16  ;;  %v3915_v48 = vpop.f32.mrb[118].mxu1  ;;  %v6361_v16 = vmax.f32 %v5654_v45, 0.0 }
 0x5d6   : > { %v2295_v41 = vadd.f32 %v3915_v48, %v5756_v9  ;;  %v2286_v51 = vpop.f32.mrb[119].mxu1  ;;  %v5928_v17 = vadd.f32 %v2292_v0, %v6359_v2  ;;  %v4491_v0 = vld [vmem:[#allocation14 + $0x70] sm:$0xff]  }
 0x5d7   : > { %v5923_v31 = vadd.f32 %v2284_v3, %v6358_v27  ;;  %v2287_v12 = vadd.f32 %v5756_v9, %v2286_v51  ;;  %3984 = vmatprep.subr.bf16.mxu0 %v4491_v0 }
 0x5d8   : > { %v5932_v20 = vadd.f32 %v2295_v41, %v6360_v61  ;;  %v6308_v51 = vmax.f32 %v5928_v17, 0.0  ;;  %3985 = vmatpush3.bf16.msra.mxu0 %v4491_v0 }
 0x5d9   : > { %v5936_v59 = vadd.f32 %v2287_v12, %v6361_v16  ;;  %v6306_v42 = vmax.f32 %v5923_v31, 0.0 }
 0x5da   : > { %v6307_v48 = vmax.f32 %v5932_v20, 0.0 }
 0x5db   : > { %v6305_v3 = vmax.f32 %v5936_v59, 0.0 }
 0x5dc   : > { %v2422_v45 = vpack.c.bf16 %v6307_v48, %v6308_v51 }
 0x5dd   : > { %v2421_v5 = vpack.c.bf16 %v6305_v3, %v6306_v42  ;;  %v6362_v3 = vmax.f32 %v5675_v39, 0.0 }
 0x5df   : > { %3960 = vmatprep.mubr.bf16.mxu1 %v2421_v5  ;;  %v6363_v5 = vmax.f32 %v5687_v34, 0.0 }
 0x5e0   : > { %3961 = vmatmul.mubr.bf16.gmra.mrb[148].mxu1 %v2422_v45 }
 0x5e3   : > { %v3918_v8 = vpop.f32.mrb[120].mxu1 }
 0x5e4   : > { %v2308_v2 = vadd.f32 %v3918_v8, %v5756_v9  ;;  %v2299_v12 = vpop.f32.mrb[121].mxu1  ;;  %v6364_v8 = vmax.f32 %v5690_v43, 0.0 }
 0x5e5   : > { %v2300_v41 = vadd.f32 %v5756_v9, %v2299_v12  ;;  %v3919_v27 = vpop.f32.mrb[122].mxu1  ;;  %v4492_v12 = vld [vmem:[#allocation14 + $0x78] sm:$0xff]  }
 0x5e6   : > { %v2311_v61 = vadd.f32 %v3919_v27, %v5756_v9  ;;  %v2302_v16 = vpop.f32.mrb[123].mxu1  ;;  %v5960_v45 = vadd.f32 %v2308_v2, %v6363_v5  ;;  %v6365_v27 = vmax.f32 %v5678_v55, 0.0  ;;  %3986 = vmatprep.subr.bf16.mxu0 %v4492_v12 }
 0x5e7   : > { %v5955_v42 = vadd.f32 %v2300_v41, %v6362_v3  ;;  %v2303_v48 = vadd.f32 %v5756_v9, %v2302_v16  ;;  %3987 = vmatpush3.bf16.msra.mxu0 %v4492_v12  ;;  %v6366_v12 = vmax.f32 %v5699_v18, 0.0 }
 0x5e8   : > { %v5964_v51 = vadd.f32 %v2311_v61, %v6364_v8  ;;  %v6317_v34 = vmax.f32 %v5960_v45, 0.0 }
 0x5e9   : > { %v5968_v24 = vadd.f32 %v2303_v48, %v6365_v27  ;;  %v6312_v3 = vmax.f32 %v5955_v42, 0.0 }
 0x5ea   : > { %v6311_v39 = vmax.f32 %v5964_v51, 0.0 }
 0x5eb   : > { %v6310_v0 = vmax.f32 %v5968_v24, 0.0 }
 0x5ec   : > { %v2424_v55 = vpack.c.bf16 %v6311_v39, %v6317_v34  ;;  %v6367_v39 = vmax.f32 %v5711_v11, 0.0 }
 0x5ed   : > { %v2423_v43 = vpack.c.bf16 %v6310_v0, %v6312_v3 }
 0x5ef   : > { %3964 = vmatprep.mubr.bf16.mxu1 %v2423_v43 }
 0x5f0   : > { %3965 = vmatmul.mubr.bf16.gmra.mrb[152].mxu1 %v2424_v55  ;;  %v6368_v55 = vmax.f32 %v5714_v6, 0.0  ;;  %v4493_v6 = vld [vmem:[#allocation17] sm:$0xff]  }
 0x5f1   : > { %4020 = vmatprep.subr.bf16.mxu0 %v4493_v6  ;;  %4068 = vmatprep.subr.bf16.mxu1 %v4493_v6 }
 0x5f2   : > { %4076 = vmatpush3.bf16.msra.mxu1 %v4493_v6 }
 0x5f3   : > { %v3922_v48 = vpop.f32.mrb[124].mxu1 }
 0x5f4   : > { %v2324_v2 = vadd.f32 %v3922_v48, %v5756_v9  ;;  %v2315_v41 = vpop.f32.mrb[125].mxu1 }
 0x5f5   : > { %v2316_v61 = vadd.f32 %v5756_v9, %v2315_v41  ;;  %v3923_v16 = vpop.f32.mrb[126].mxu1  ;;  %v6369_v41 = vmax.f32 %v5702_v30, 0.0 }
 0x5f6   : > { %v2327_v5 = vadd.f32 %v3923_v16, %v5756_v9  ;;  %v2318_v8 = vpop.f32.mrb[127].mxu1  ;;  %v5992_v43 = vadd.f32 %v2324_v2, %v6367_v39  ;;  %v4494_v39 = vld [vmem:[#allocation17 + $0x8] sm:$0xff]  }
 0x5f7   : > { %v5987_v27 = vadd.f32 %v2316_v61, %v6366_v12  ;;  %v2319_v0 = vadd.f32 %v5756_v9, %v2318_v8  ;;  %4069 = vmatprep.subr.bf16.mxu1 %v4494_v39  ;;  %v4495_v12 = vld [vmem:[#allocation17 + $0x10] sm:$0xff]  }
 0x5f8   : > { %v5996_v48 = vadd.f32 %v2327_v5, %v6368_v55  ;;  %v6316_v9 = vmax.f32 %v5992_v43, 0.0  ;;  %4077 = vmatpush3.bf16.msra.mxu1 %v4494_v39 }
 0x5f9   : > { %v6000_v3 = vadd.f32 %v2319_v0, %v6369_v41  ;;  %v6315_v18 = vmax.f32 %v5987_v27, 0.0  ;;  %v6014_v0 = vld [vmem:[#allocation13 + $0x1] ss:$0 sm:$0xff]  ;;  %4070 = vmatprep.subr.bf16.mxu1 %v4495_v12 }
 0x5fa   : > { %v6314_v16 = vmax.f32 %v5996_v48, 0.0 }
 0x5fb   : > { %v6313_v61 = vmax.f32 %v6000_v3, 0.0 }
 0x5fc   : > { %v2426_v30 = vpack.c.bf16 %v6314_v16, %v6316_v9  ;;  %v4496_v9 = vld [vmem:[#allocation17 + $0x18] sm:$0xff]   ;;  %4078 = vmatpush3.bf16.msra.mxu1 %v4495_v12 }
 0x5fd   : > { %v2425_v11 = vpack.c.bf16 %v6313_v61, %v6315_v18  ;;  %4071 = vmatprep.subr.bf16.mxu1 %v4496_v9 }
 0x5ff   : > { %3968 = vmatprep.mubr.bf16.mxu1 %v2425_v11 }
 0x600   : > { %3969 = vmatmul.mubr.bf16.gmra.mrb[156].mxu1 %v2426_v30 }
 0x601   : > { %4079 = vmatpush3.bf16.msra.mxu1 %v4496_v9 }
 0x602   : > { %4072 = vmatprep.subr.bf16.mxu1 %v4497_v29 }
 0x605   : > { %4080 = vmatpush3.bf16.msra.mxu1 %v4497_v29 }
 0x663   : > { %v3942_v2 = vpop.f32.mrb[128].mxu1 }
 0x664   : > { %v2526_v5 = vadd.f32 %v3942_v2, %v6014_v0  ;;  %v2517_v8 = vpop.f32.mrb[129].mxu1 }
 0x665   : > { %v2518_v55 = vadd.f32 %v6014_v0, %v2517_v8  ;;  %v3943_v41 = vpop.f32.mrb[130].mxu1 }
 0x666   : > { %v2529_v11 = vadd.f32 %v3943_v41, %v6014_v0  ;;  %v2520_v30 = vpop.f32.mrb[131].mxu1  ;;  %v2646_v16 = vmax.f32 %v2526_v5, 0.0 }
 0x667   : > { %v2521_v61 = vadd.f32 %v6014_v0, %v2520_v30  ;;  %v2644_v34 = vmax.f32 %v2518_v55, 0.0 }
 0x668   : > { %v2647_v18 = vmax.f32 %v2529_v11, 0.0 }
 0x669   : > { %v2645_v32 = vmax.f32 %v2521_v61, 0.0 }
 0x66a   : > { %v2694_v19 = vpack.c.bf16 %v2647_v18, %v2646_v16 }
 0x66b   : > { %v2693_v2 = vpack.c.bf16 %v2645_v32, %v2644_v34 }
 0x66d   : > { %3988 = vmatprep.mubr.bf16.mxu0 %v2693_v2 }
 0x66e   : > { %3989 = vmatmul.mubr.bf16.vlgmr.msra.gmra.mrb[64].mxu0 %v2694_v19 }
 0x66f   : > { %4021 = vmatpush3.bf16.msra.mxu0 %v4493_v6 }
 0x670   : > { %4022 = vmatprep.subr.bf16.mxu0 %v4494_v39 }
 0x673   : > { %v3946_v8 = vpop.f32.mrb[132].mxu1  ;;  %4023 = vmatpush3.bf16.msra.mxu0 %v4494_v39 }
 0x674   : > { %v2542_v5 = vadd.f32 %v3946_v8, %v6014_v0  ;;  %v2533_v41 = vpop.f32.mrb[133].mxu1  ;;  %4024 = vmatprep.subr.bf16.mxu0 %v4495_v12 }
 0x675   : > { %v2534_v61 = vadd.f32 %v6014_v0, %v2533_v41  ;;  %v3947_v55 = vpop.f32.mrb[134].mxu1 }
 0x676   : > { %v2545_v16 = vadd.f32 %v3947_v55, %v6014_v0  ;;  %v2536_v32 = vpop.f32.mrb[135].mxu1  ;;  %v2650_v19 = vmax.f32 %v2542_v5, 0.0 }
 0x677   : > { %v2537_v34 = vadd.f32 %v6014_v0, %v2536_v32  ;;  %4025 = vmatpush3.bf16.msra.mxu0 %v4495_v12  ;;  %v2648_v6 = vmax.f32 %v2534_v61, 0.0 }
 0x678   : > { %v2651_v18 = vmax.f32 %v2545_v16, 0.0  ;;  %4026 = vmatprep.subr.bf16.mxu0 %v4496_v9 }
 0x679   : > { %v2649_v11 = vmax.f32 %v2537_v34, 0.0 }
 0x67a   : > { %v2696_v30 = vpack.c.bf16 %v2651_v18, %v2650_v19 }
 0x67b   : > { %v2695_v39 = vpack.c.bf16 %v2649_v11, %v2648_v6  ;;  %4027 = vmatpush3.bf16.msra.mxu0 %v4496_v9 }
 0x67c   : > { %4028 = vmatprep.subr.bf16.mxu0 %v4497_v29 }
 0x67d   : > { %3992 = vmatprep.mubr.bf16.mxu0 %v2695_v39 }
 0x67e   : > { %3993 = vmatmul.mubr.bf16.gmra.mrb[68].mxu0 %v2696_v30 }
 0x67f   : > { %4029 = vmatpush3.bf16.msra.mxu0 %v4497_v29 }
 0x683   : > { %v3950_v2 = vpop.f32.mrb[136].mxu1 }
 0x684   : > { %v2558_v8 = vadd.f32 %v3950_v2, %v6014_v0  ;;  %v2549_v41 = vpop.f32.mrb[137].mxu1 }
 0x685   : > { %v2550_v55 = vadd.f32 %v6014_v0, %v2549_v41  ;;  %v3951_v32 = vpop.f32.mrb[138].mxu1 }
 0x686   : > { %v2561_v12 = vadd.f32 %v3951_v32, %v6014_v0  ;;  %v2552_v5 = vpop.f32.mrb[139].mxu1  ;;  %v2654_v16 = vmax.f32 %v2558_v8, 0.0 }
 0x687   : > { %v2553_v61 = vadd.f32 %v6014_v0, %v2552_v5  ;;  %v2652_v19 = vmax.f32 %v2550_v55, 0.0 }
 0x688   : > { %v2655_v34 = vmax.f32 %v2561_v12, 0.0 }
 0x689   : > { %v2653_v9 = vmax.f32 %v2553_v61, 0.0 }
 0x68a   : > { %v2698_v18 = vpack.c.bf16 %v2655_v34, %v2654_v16 }
 0x68b   : > { %v2697_v6 = vpack.c.bf16 %v2653_v9, %v2652_v19 }
 0x68d   : > { %3996 = vmatprep.mubr.bf16.mxu0 %v2697_v6 }
 0x68e   : > { %3997 = vmatmul.mubr.bf16.gmra.mrb[72].mxu0 %v2698_v18 }
 0x693   : > { %v3954_v29 = vpop.f32.mrb[140].mxu1 }
 0x694   : > { %v2574_v11 = vadd.f32 %v3954_v29, %v6014_v0  ;;  %v2565_v30 = vpop.f32.mrb[141].mxu1 }
 0x695   : > { %v2566_v39 = vadd.f32 %v6014_v0, %v2565_v30  ;;  %v3955_v2 = vpop.f32.mrb[142].mxu1 }
 0x696   : > { %v2577_v41 = vadd.f32 %v3955_v2, %v6014_v0  ;;  %v2568_v32 = vpop.f32.mrb[143].mxu1  ;;  %v2658_v8 = vmax.f32 %v2574_v11, 0.0 }
 0x697   : > { %v2569_v5 = vadd.f32 %v6014_v0, %v2568_v32  ;;  %v2656_v55 = vmax.f32 %v2566_v39, 0.0 }
 0x698   : > { %v2659_v12 = vmax.f32 %v2577_v41, 0.0 }
 0x699   : > { %v2657_v61 = vmax.f32 %v2569_v5, 0.0 }
 0x69a   : > { %v2700_v16 = vpack.c.bf16 %v2659_v12, %v2658_v8 }
 0x69b   : > { %v2699_v34 = vpack.c.bf16 %v2657_v61, %v2656_v55 }
 0x69d   : > { %4000 = vmatprep.mubr.bf16.mxu0 %v2699_v34 }
 0x69e   : > { %4001 = vmatmul.mubr.bf16.gmra.mrb[76].mxu0 %v2700_v16 }
 0x6a3   : > { %v3958_v19 = vpop.f32.mrb[144].mxu1 }
 0x6a4   : > { %v2590_v9 = vadd.f32 %v3958_v19, %v6014_v0  ;;  %v2581_v18 = vpop.f32.mrb[145].mxu1 }
 0x6a5   : > { %v2582_v6 = vadd.f32 %v6014_v0, %v2581_v18  ;;  %v3959_v29 = vpop.f32.mrb[146].mxu1 }
 0x6a6   : > { %v2593_v30 = vadd.f32 %v3959_v29, %v6014_v0  ;;  %v2584_v2 = vpop.f32.mrb[147].mxu1  ;;  %v2662_v11 = vmax.f32 %v2590_v9, 0.0 }
 0x6a7   : > { %v2585_v32 = vadd.f32 %v6014_v0, %v2584_v2  ;;  %v2660_v39 = vmax.f32 %v2582_v6, 0.0 }
 0x6a8   : > { %v2663_v41 = vmax.f32 %v2593_v30, 0.0 }
 0x6a9   : > { %v2661_v5 = vmax.f32 %v2585_v32, 0.0 }
 0x6aa   : > { %v2702_v8 = vpack.c.bf16 %v2663_v41, %v2662_v11 }
 0x6ab   : > { %v2701_v12 = vpack.c.bf16 %v2661_v5, %v2660_v39  ;;  %v4498_v39 = vld [vmem:[#allocation17 + $0x28] sm:$0xff]  }
 0x6ac   : > { %4030 = vmatprep.subr.bf16.mxu0 %v4498_v39  ;;  %4073 = vmatprep.subr.bf16.mxu1 %v4498_v39 }
 0x6ad   : > { %4004 = vmatprep.mubr.bf16.mxu0 %v2701_v12  ;;  %4031 = vmatpush3.bf16.msra.mxu0 %v4498_v39 }
 0x6ae   : > { %4005 = vmatmul.mubr.bf16.gmra.mrb[80].mxu0 %v2702_v8  ;;  %4081 = vmatpush3.bf16.msra.mxu1 %v4498_v39 }
 0x6b3   : > { %v3962_v55 = vpop.f32.mrb[148].mxu1 }
 0x6b4   : > { %v2606_v61 = vadd.f32 %v3962_v55, %v6014_v0  ;;  %v2597_v16 = vpop.f32.mrb[149].mxu1  ;;  %v4499_v55 = vld [vmem:[#allocation17 + $0x30] sm:$0xff]  }
 0x6b5   : > { %v2598_v34 = vadd.f32 %v6014_v0, %v2597_v16  ;;  %v3963_v19 = vpop.f32.mrb[150].mxu1  ;;  %4032 = vmatprep.subr.bf16.mxu0 %v4499_v55  ;;  %4074 = vmatprep.subr.bf16.mxu1 %v4499_v55 }
 0x6b6   : > { %v2609_v18 = vadd.f32 %v3963_v19, %v6014_v0  ;;  %v2600_v29 = vpop.f32.mrb[151].mxu1  ;;  %v2666_v9 = vmax.f32 %v2606_v61, 0.0  ;;  %4033 = vmatpush3.bf16.msra.mxu0 %v4499_v55  ;;  %4082 = vmatpush3.bf16.msra.mxu1 %v4499_v55 }
 0x6b7   : > { %v2601_v2 = vadd.f32 %v6014_v0, %v2600_v29  ;;  %v2664_v6 = vmax.f32 %v2598_v34, 0.0 }
 0x6b8   : > { %v2667_v30 = vmax.f32 %v2609_v18, 0.0 }
 0x6b9   : > { %v2665_v32 = vmax.f32 %v2601_v2, 0.0 }
 0x6ba   : > { %v2704_v11 = vpack.c.bf16 %v2667_v30, %v2666_v9  ;;  %v4500_v9 = vld [vmem:[#allocation17 + $0x38] sm:$0xff]  }
 0x6bb   : > { %v2703_v41 = vpack.c.bf16 %v2665_v32, %v2664_v6  ;;  %4034 = vmatprep.subr.bf16.mxu0 %v4500_v9  ;;  %4075 = vmatprep.subr.bf16.mxu1 %v4500_v9 }
 0x6bc   : > { %4035 = vmatpush3.bf16.msra.mxu0 %v4500_v9  ;;  %4083 = vmatpush3.bf16.msra.mxu1 %v4500_v9 }
 0x6bd   : > { %4008 = vmatprep.mubr.bf16.mxu0 %v2703_v41 }
 0x6be   : > { %4009 = vmatmul.mubr.bf16.gmra.mrb[84].mxu0 %v2704_v11 }
 0x6c3   : > { %v3966_v5 = vpop.f32.mrb[152].mxu1 }
 0x6c4   : > { %v2622_v8 = vadd.f32 %v3966_v5, %v6014_v0  ;;  %v2613_v12 = vpop.f32.mrb[153].mxu1 }
 0x6c5   : > { %v2614_v16 = vadd.f32 %v6014_v0, %v2613_v12  ;;  %v3967_v61 = vpop.f32.mrb[154].mxu1 }
 0x6c6   : > { %v2625_v34 = vadd.f32 %v3967_v61, %v6014_v0  ;;  %v2616_v19 = vpop.f32.mrb[155].mxu1  ;;  %v2670_v29 = vmax.f32 %v2622_v8, 0.0 }
 0x6c7   : > { %v2617_v18 = vadd.f32 %v6014_v0, %v2616_v19  ;;  %v2668_v30 = vmax.f32 %v2614_v16, 0.0 }
 0x6c8   : > { %v2671_v2 = vmax.f32 %v2625_v34, 0.0 }
 0x6c9   : > { %v2669_v6 = vmax.f32 %v2617_v18, 0.0 }
 0x6ca   : > { %v2706_v32 = vpack.c.bf16 %v2671_v2, %v2670_v29 }
 0x6cb   : > { %v2705_v11 = vpack.c.bf16 %v2669_v6, %v2668_v30  ;;  %v6048_v30 = vld [vmem:[#allocation16 + $0x1] ss:$0 sm:$0xff] }
 0x6cd   : > { %4012 = vmatprep.mubr.bf16.mxu0 %v2705_v11 }
 0x6ce   : > { %4013 = vmatmul.mubr.bf16.gmra.mrb[88].mxu0 %v2706_v32 }
 0x6d3   : > { %v3970_v41 = vpop.f32.mrb[156].mxu1 }
 0x6d4   : > { %v2638_v39 = vadd.f32 %v3970_v41, %v6014_v0  ;;  %v2629_v5 = vpop.f32.mrb[157].mxu1 }
 0x6d5   : > { %v2630_v12 = vadd.f32 %v6014_v0, %v2629_v5  ;;  %v3971_v55 = vpop.f32.mrb[158].mxu1 }
 0x6d6   : > { %v2641_v8 = vadd.f32 %v3971_v55, %v6014_v0  ;;  %v2632_v61 = vpop.f32.mrb[159].mxu1  ;;  %v2674_v34 = vmax.f32 %v2638_v39, 0.0 }
 0x6d7   : > { %v2633_v16 = vadd.f32 %v6014_v0, %v2632_v61  ;;  %v2672_v18 = vmax.f32 %v2630_v12, 0.0 }
 0x6d8   : > { %v2675_v19 = vmax.f32 %v2641_v8, 0.0 }
 0x6d9   : > { %v2673_v29 = vmax.f32 %v2633_v16, 0.0 }
 0x6da   : > { %v2708_v2 = vpack.c.bf16 %v2675_v19, %v2674_v34 }
 0x6db   : > { %v2707_v9 = vpack.c.bf16 %v2673_v29, %v2672_v18 }
 0x6dd   : > { %4016 = vmatprep.mubr.bf16.mxu0 %v2707_v9 }
 0x6de   : > { %4017 = vmatmul.mubr.bf16.gmra.mrb[92].mxu0 %v2708_v2 }
 0x741   : > { %v3990_v6 = vpop.f32.mrb[64].mxu0 }
 0x742   : > { %v2808_v32 = vadd.f32 %v3990_v6, %v6048_v30  ;;  %v2799_v11 = vpop.f32.mrb[65].mxu0 }
 0x743   : > { %v2800_v41 = vadd.f32 %v6048_v30, %v2799_v11  ;;  %v3991_v5 = vpop.f32.mrb[66].mxu0 }
 0x744   : > { %v2928_v0 = vadd.f32 %v2808_v32, %v2364_v25  ;;  %v2811_v39 = vadd.f32 %v3991_v5, %v6048_v30  ;;  %v2802_v12 = vpop.f32.mrb[67].mxu0 }
 0x745   : > { %v2926_v55 = vadd.f32 %v2800_v41, %v2362_v14  ;;  %v2803_v8 = vadd.f32 %v6048_v30, %v2802_v12 }
 0x746   : > { %v2929_v61 = vadd.f32 %v2811_v39, %v2365_v23  ;;  %v2960_v34 = vmax.f32 %v2928_v0, 0.0 }
 0x747   : > { %v2927_v16 = vadd.f32 %v2803_v8, %v2363_v60  ;;  %v2958_v18 = vmax.f32 %v2926_v55, 0.0 }
 0x748   : > { %v2961_v19 = vmax.f32 %v2929_v61, 0.0 }
 0x749   : > { %v2959_v29 = vmax.f32 %v2927_v16, 0.0 }
 0x74a   : > { %v3007_v21 = vpack.c.bf16 %v2961_v19, %v2960_v34 }
 0x74b   : > { %v3006_v25 = vpack.c.bf16 %v2959_v29, %v2958_v18 }
 0x74d   : > { %4036 = vmatprep.mubr.bf16.mxu0 %v3006_v25 }
 0x74e   : > { %4037 = vmatmul.mubr.bf16.vlgmr.msra.gmra.mrb[96].mxu0 %v3007_v21 }
 0x751   : > { %v3994_v2 = vpop.f32.mrb[68].mxu0 }
 0x752   : > { %v2824_v52 = vadd.f32 %v3994_v2, %v6048_v30  ;;  %v2815_v14 = vpop.f32.mrb[69].mxu0 }
 0x753   : > { %v2816_v9 = vadd.f32 %v6048_v30, %v2815_v14  ;;  %v3995_v6 = vpop.f32.mrb[70].mxu0 }
 0x754   : > { %v2932_v58 = vadd.f32 %v2824_v52, %v2368_v22  ;;  %v2827_v26 = vadd.f32 %v3995_v6, %v6048_v30  ;;  %v2818_v23 = vpop.f32.mrb[71].mxu0 }
 0x755   : > { %v2930_v60 = vadd.f32 %v2816_v9, %v2366_v36  ;;  %v2819_v32 = vadd.f32 %v6048_v30, %v2818_v23  ;;  %v6372_v23 = vmax.f32 %v5872_v13, 0.0 }
 0x756   : > { %v2933_v11 = vadd.f32 %v2827_v26, %v2369_v35  ;;  %v2964_v5 = vmax.f32 %v2932_v58, 0.0  ;;  %v6371_v58 = vmax.f32 %v5868_v28, 0.0  ;;  %v6373_v28 = vmax.f32 %v5896_v54, 0.0 }
 0x757   : > { %v2931_v41 = vadd.f32 %v2819_v32, %v2367_v40  ;;  %v2962_v39 = vmax.f32 %v2930_v60, 0.0 }
 0x758   : > { %v2965_v0 = vmax.f32 %v2933_v11, 0.0 }
 0x759   : > { %v2963_v12 = vmax.f32 %v2931_v41, 0.0 }
 0x75a   : > { %v3009_v4 = vpack.c.bf16 %v2965_v0, %v2964_v5 }
 0x75b   : > { %v3008_v22 = vpack.c.bf16 %v2963_v12, %v2962_v39 }
 0x75d   : > { %4040 = vmatprep.mubr.bf16.mxu0 %v3008_v22 }
 0x75e   : > { %4041 = vmatmul.mubr.bf16.gmra.mrb[100].mxu0 %v3009_v4 }
 0x761   : > { %v3998_v55 = vpop.f32.mrb[72].mxu0 }
 0x762   : > { %v2840_v37 = vadd.f32 %v3998_v55, %v6048_v30  ;;  %v2831_v36 = vpop.f32.mrb[73].mxu0 }
 0x763   : > { %v2832_v8 = vadd.f32 %v6048_v30, %v2831_v36  ;;  %v3999_v61 = vpop.f32.mrb[74].mxu0 }
 0x764   : > { %v2936_v63 = vadd.f32 %v2840_v37, %v2372_v56  ;;  %v2843_v50 = vadd.f32 %v3999_v61, %v6048_v30  ;;  %v2834_v35 = vpop.f32.mrb[75].mxu0  ;;  %v6374_v37 = vmax.f32 %v5891_v49, 0.0  ;;  %v6375_v61 = vmax.f32 %v5900_v44, 0.0 }
 0x765   : > { %v2934_v40 = vadd.f32 %v2832_v8, %v2370_v62  ;;  %v2835_v16 = vadd.f32 %v6048_v30, %v2834_v35  ;;  %v6377_v44 = vmax.f32 %v5928_v17, 0.0 }
 0x766   : > { %v2937_v34 = vadd.f32 %v2843_v50, %v2373_v33  ;;  %v2968_v18 = vmax.f32 %v2936_v63, 0.0  ;;  %v6376_v50 = vmax.f32 %v5904_v46, 0.0 }
 0x767   : > { %v2935_v19 = vadd.f32 %v2835_v16, %v2371_v1  ;;  %v2966_v21 = vmax.f32 %v2934_v40, 0.0  ;;  %v6370_v1 = vmax.f32 %v5859_v38, 0.0 }
 0x768   : > { %v2969_v29 = vmax.f32 %v2937_v34, 0.0 }
 0x769   : > { %v2967_v25 = vmax.f32 %v2935_v19, 0.0 }
 0x76a   : > { %v3011_v47 = vpack.c.bf16 %v2969_v29, %v2968_v18 }
 0x76b   : > { %v3010_v56 = vpack.c.bf16 %v2967_v25, %v2966_v21 }
 0x76d   : > { %4044 = vmatprep.mubr.bf16.mxu1 %v3010_v56 }
 0x76e   : > { %4045 = vmatmul.mubr.bf16.vlgmr.msra.gmra.mrb[160].mxu1 %v3011_v47 }
 0x771   : > { %v4002_v2 = vpop.f32.mrb[76].mxu0 }
 0x772   : > { %v2856_v15 = vadd.f32 %v4002_v2, %v6048_v30  ;;  %v2847_v62 = vpop.f32.mrb[77].mxu0 }
 0x773   : > { %v2848_v52 = vadd.f32 %v6048_v30, %v2847_v62  ;;  %v4003_v14 = vpop.f32.mrb[78].mxu0 }
 0x774   : > { %v2940_v7 = vadd.f32 %v2856_v15, %v2376_v10  ;;  %v2859_v57 = vadd.f32 %v4003_v14, %v6048_v30  ;;  %v2850_v33 = vpop.f32.mrb[79].mxu0  ;;  %v6378_v15 = vmax.f32 %v5923_v31, 0.0  ;;  %v6379_v14 = vmax.f32 %v5932_v20, 0.0 }
 0x775   : > { %v2938_v9 = vadd.f32 %v2848_v52, %v6370_v1  ;;  %v2851_v6 = vadd.f32 %v6048_v30, %v2850_v33  ;;  %v6381_v20 = vmax.f32 %v5960_v45, 0.0 }
 0x776   : > { %v2941_v26 = vadd.f32 %v2859_v57, %v6371_v58  ;;  %v2972_v32 = vmax.f32 %v2940_v7, 0.0  ;;  %v6380_v57 = vmax.f32 %v5936_v59, 0.0 }
 0x777   : > { %v2939_v60 = vadd.f32 %v2851_v6, %v6372_v23  ;;  %v2970_v41 = vmax.f32 %v2938_v9, 0.0 }
 0x778   : > { %v2973_v11 = vmax.f32 %v2941_v26, 0.0 }
 0x779   : > { %v2971_v5 = vmax.f32 %v2939_v60, 0.0 }
 0x77a   : > { %v3013_v53 = vpack.c.bf16 %v2973_v11, %v2972_v32 }
 0x77b   : > { %v3012_v10 = vpack.c.bf16 %v2971_v5, %v2970_v41 }
 0x77d   : > { %4048 = vmatprep.mubr.bf16.mxu1 %v3012_v10 }
 0x77e   : > { %4049 = vmatmul.mubr.bf16.gmra.mrb[164].mxu1 %v3013_v53  ;;  %v6382_v53 = vmax.f32 %v5955_v42, 0.0 }
 0x781   : > { %v4006_v0 = vpop.f32.mrb[80].mxu0 }
 0x782   : > { %v2872_v38 = vadd.f32 %v4006_v0, %v6048_v30  ;;  %v2863_v39 = vpop.f32.mrb[81].mxu0 }
 0x783   : > { %v2864_v12 = vadd.f32 %v6048_v30, %v2863_v39  ;;  %v4007_v4 = vpop.f32.mrb[82].mxu0 }
 0x784   : > { %v2944_v22 = vadd.f32 %v2872_v38, %v6373_v28  ;;  %v2875_v13 = vadd.f32 %v4007_v4, %v6048_v30  ;;  %v2866_v55 = vpop.f32.mrb[83].mxu0  ;;  %v6383_v38 = vmax.f32 %v5964_v51, 0.0  ;;  %v6385_v51 = vmax.f32 %v5992_v43, 0.0 }
 0x785   : > { %v2942_v36 = vadd.f32 %v2864_v12, %v6374_v37  ;;  %v2867_v8 = vadd.f32 %v6048_v30, %v2866_v55  ;;  %v6384_v12 = vmax.f32 %v5968_v24, 0.0 }
 0x786   : > { %v2945_v63 = vadd.f32 %v2875_v13, %v6375_v61  ;;  %v2976_v40 = vmax.f32 %v2944_v22, 0.0 }
 0x787   : > { %v2943_v35 = vadd.f32 %v2867_v8, %v6376_v50  ;;  %v2974_v34 = vmax.f32 %v2942_v36, 0.0 }
 0x788   : > { %v2977_v16 = vmax.f32 %v2945_v63, 0.0 }
 0x789   : > { %v2975_v19 = vmax.f32 %v2943_v35, 0.0 }
 0x78a   : > { %v3015_v54 = vpack.c.bf16 %v2977_v16, %v2976_v40  ;;  %v6386_v40 = vmax.f32 %v5987_v27, 0.0 }
 0x78b   : > { %v3014_v18 = vpack.c.bf16 %v2975_v19, %v2974_v34  ;;  %v6387_v19 = vmax.f32 %v5996_v48, 0.0 }
 0x78d   : > { %4052 = vmatprep.mubr.bf16.mxu1 %v3014_v18  ;;  %v6388_v18 = vmax.f32 %v6000_v3, 0.0 }
 0x78e   : > { %4053 = vmatmul.mubr.bf16.gmra.mrb[168].mxu1 %v3015_v54 }
 0x791   : > { %v4010_v29 = vpop.f32.mrb[84].mxu0 }
 0x792   : > { %v2888_v49 = vadd.f32 %v4010_v29, %v6048_v30  ;;  %v2879_v21 = vpop.f32.mrb[85].mxu0 }
 0x793   : > { %v2880_v25 = vadd.f32 %v6048_v30, %v2879_v21  ;;  %v4011_v47 = vpop.f32.mrb[86].mxu0 }
 0x794   : > { %v2948_v56 = vadd.f32 %v2888_v49, %v6377_v44  ;;  %v2891_v46 = vadd.f32 %v4011_v47, %v6048_v30  ;;  %v2882_v2 = vpop.f32.mrb[87].mxu0 }
 0x795   : > { %v2946_v62 = vadd.f32 %v2880_v25, %v6378_v15  ;;  %v2883_v52 = vadd.f32 %v6048_v30, %v2882_v2 }
 0x796   : > { %v2949_v7 = vadd.f32 %v2891_v46, %v6379_v14  ;;  %v2980_v1 = vmax.f32 %v2948_v56, 0.0  ;;  %v6147_v56 = vld [vmem:[#allocation19] ss:$0 sm:$0xff] }
 0x797   : > { %v2947_v33 = vadd.f32 %v2883_v52, %v6380_v57  ;;  %v2978_v6 = vmax.f32 %v2946_v62, 0.0 }
 0x798   : > { %v2981_v9 = vmax.f32 %v2949_v7, 0.0 }
 0x799   : > { %v2979_v58 = vmax.f32 %v2947_v33, 0.0 }
 0x79a   : > { %v3017_v17 = vpack.c.bf16 %v2981_v9, %v2980_v1 }
 0x79b   : > { %v3016_v26 = vpack.c.bf16 %v2979_v58, %v2978_v6 }
 0x79d   : > { %4056 = vmatprep.mubr.bf16.mxu1 %v3016_v26 }
 0x79e   : > { %4057 = vmatmul.mubr.bf16.gmra.mrb[172].mxu1 %v3017_v17 }
 0x7a1   : > { %v4014_v23 = vpop.f32.mrb[88].mxu0 }
 0x7a2   : > { %v2904_v31 = vadd.f32 %v4014_v23, %v6048_v30  ;;  %v2895_v60 = vpop.f32.mrb[89].mxu0 }
 0x7a3   : > { %v2896_v32 = vadd.f32 %v6048_v30, %v2895_v60  ;;  %v4015_v11 = vpop.f32.mrb[90].mxu0 }
 0x7a4   : > { %v2952_v41 = vadd.f32 %v2904_v31, %v6381_v20  ;;  %v2907_v59 = vadd.f32 %v4015_v11, %v6048_v30  ;;  %v2898_v5 = vpop.f32.mrb[91].mxu0 }
 0x7a5   : > { %v2950_v10 = vadd.f32 %v2896_v32, %v6382_v53  ;;  %v2899_v0 = vadd.f32 %v6048_v30, %v2898_v5 }
 0x7a6   : > { %v2953_v39 = vadd.f32 %v2907_v59, %v6383_v38  ;;  %v2984_v28 = vmax.f32 %v2952_v41, 0.0 }
 0x7a7   : > { %v2951_v4 = vadd.f32 %v2899_v0, %v6384_v12  ;;  %v2982_v13 = vmax.f32 %v2950_v10, 0.0 }
 0x7a8   : > { %v2985_v22 = vmax.f32 %v2953_v39, 0.0 }
 0x7a9   : > { %v2983_v55 = vmax.f32 %v2951_v4, 0.0 }
 0x7aa   : > { %v3019_v45 = vpack.c.bf16 %v2985_v22, %v2984_v28 }
 0x7ab   : > { %v3018_v37 = vpack.c.bf16 %v2983_v55, %v2982_v13 }
 0x7ad   : > { %4060 = vmatprep.mubr.bf16.mxu1 %v3018_v37 }
 0x7ae   : > { %4061 = vmatmul.mubr.bf16.gmra.mrb[176].mxu1 %v3019_v45 }
 0x7b1   : > { %v4018_v36 = vpop.f32.mrb[92].mxu0 }
 0x7b2   : > { %v2920_v42 = vadd.f32 %v4018_v36, %v6048_v30  ;;  %v2911_v8 = vpop.f32.mrb[93].mxu0 }
 0x7b3   : > { %v2912_v61 = vadd.f32 %v6048_v30, %v2911_v8  ;;  %v4019_v63 = vpop.f32.mrb[94].mxu0 }
 0x7b4   : > { %v2956_v24 = vadd.f32 %v2920_v42, %v6385_v51  ;;  %v2923_v50 = vadd.f32 %v4019_v63, %v6048_v30  ;;  %v2914_v35 = vpop.f32.mrb[95].mxu0 }
 0x7b5   : > { %v2954_v16 = vadd.f32 %v2912_v61, %v6386_v40  ;;  %v2915_v34 = vadd.f32 %v6048_v30, %v2914_v35 }
 0x7b6   : > { %v2957_v54 = vadd.f32 %v2923_v50, %v6387_v19  ;;  %v2988_v49 = vmax.f32 %v2956_v24, 0.0 }
 0x7b7   : > { %v2955_v29 = vadd.f32 %v2915_v34, %v6388_v18  ;;  %v2986_v25 = vmax.f32 %v2954_v16, 0.0 }
 0x7b8   : > { %v2989_v21 = vmax.f32 %v2957_v54, 0.0 }
 0x7b9   : > { %v2987_v43 = vmax.f32 %v2955_v29, 0.0 }
 0x7ba   : > { %v3021_v47 = vpack.c.bf16 %v2989_v21, %v2988_v49 }
 0x7bb   : > { %v3020_v44 = vpack.c.bf16 %v2987_v43, %v2986_v25 }
 0x7bd   : > { %4064 = vmatprep.mubr.bf16.mxu1 %v3020_v44 }
 0x7be   : > { %4065 = vmatmul.mubr.bf16.gmra.mrb[180].mxu1 %v3021_v47 }
 0x821   : > { %v4038_v27 = vpop.f32.mrb[96].mxu0 }
 0x822   : > { %v3120_v30 = vadd.f32 %v4038_v27, %v6147_v56  ;;  %v3111_v46 = vpop.f32.mrb[97].mxu0 }
 0x823   : > { %v3112_v48 = vadd.f32 %v6147_v56, %v3111_v46  ;;  %v4039_v2 = vpop.f32.mrb[98].mxu0 }
 0x824   : > { %3240 = vst [vmem:[%s6151_s25 + $0x10] sm:$0xff] %v3120_v30  ;;  %v3123_v3 = vadd.f32 %v4039_v2, %v6147_v56  ;;  %v3114_v15 = vpop.f32.mrb[99].mxu0 }
 0x825   : > { %3238 = vst [vmem:[%s6151_s25] sm:$0xff] %v3112_v48  ;;  %v3115_v62 = vadd.f32 %v6147_v56, %v3114_v15 }
 0x826   : > { %3241 = vst [vmem:[%s6151_s25 + $0x18] sm:$0xff] %v3123_v3 }
 0x827   : > { %3239 = vst [vmem:[%s6151_s25 + $0x8] sm:$0xff] %v3115_v62 }
 0x831   : > { %v4042_v52 = vpop.f32.mrb[100].mxu0 }
 0x832   : > { %v3136_v14 = vadd.f32 %v4042_v52, %v6147_v56  ;;  %v3127_v7 = vpop.f32.mrb[101].mxu0 }
 0x833   : > { %v3128_v57 = vadd.f32 %v6147_v56, %v3127_v7  ;;  %v4043_v33 = vpop.f32.mrb[102].mxu0 }
 0x834   : > { %3244 = vst [vmem:[%s6151_s25 + $0x30] sm:$0xff] %v3136_v14  ;;  %v3139_v1 = vadd.f32 %v4043_v33, %v6147_v56  ;;  %v3130_v9 = vpop.f32.mrb[103].mxu0 }
 0x835   : > { %3242 = vst [vmem:[%s6151_s25 + $0x20] sm:$0xff] %v3128_v57  ;;  %v3131_v6 = vadd.f32 %v6147_v56, %v3130_v9 }
 0x836   : > { %3245 = vst [vmem:[%s6151_s25 + $0x38] sm:$0xff] %v3139_v1 }
 0x837   : > { %3243 = vst [vmem:[%s6151_s25 + $0x28] sm:$0xff] %v3131_v6 }
 0x841   : > { %v4046_v58 = vpop.f32.mrb[160].mxu1 }
 0x842   : > { %v3152_v17 = vadd.f32 %v4046_v58, %v6147_v56  ;;  %v3143_v26 = vpop.f32.mrb[161].mxu1 }
 0x843   : > { %v3144_v23 = vadd.f32 %v6147_v56, %v3143_v26  ;;  %v4047_v31 = vpop.f32.mrb[162].mxu1 }
 0x844   : > { %3248 = vst [vmem:[%s6151_s25 + $0x50] sm:$0xff] %v3152_v17  ;;  %v3155_v60 = vadd.f32 %v4047_v31, %v6147_v56  ;;  %v3146_v32 = vpop.f32.mrb[163].mxu1 }
 0x845   : > { %3246 = vst [vmem:[%s6151_s25 + $0x40] sm:$0xff] %v3144_v23  ;;  %v3147_v11 = vadd.f32 %v6147_v56, %v3146_v32 }
 0x846   : > { %3249 = vst [vmem:[%s6151_s25 + $0x58] sm:$0xff] %v3155_v60 }
 0x847   : > { %3247 = vst [vmem:[%s6151_s25 + $0x48] sm:$0xff] %v3147_v11 }
 0x851   : > { %v4050_v20 = vpop.f32.mrb[164].mxu1 }
 0x852   : > { %v3168_v41 = vadd.f32 %v4050_v20, %v6147_v56  ;;  %v3159_v59 = vpop.f32.mrb[165].mxu1 }
 0x853   : > { %v3160_v5 = vadd.f32 %v6147_v56, %v3159_v59  ;;  %v4051_v53 = vpop.f32.mrb[166].mxu1 }
 0x854   : > { %3252 = vst [vmem:[%s6151_s25 + $0x70] sm:$0xff] %v3168_v41  ;;  %v3171_v10 = vadd.f32 %v4051_v53, %v6147_v56  ;;  %v3162_v0 = vpop.f32.mrb[167].mxu1 }
 0x855   : > { %3250 = vst [vmem:[%s6151_s25 + $0x60] sm:$0xff] %v3160_v5  ;;  %v3163_v38 = vadd.f32 %v6147_v56, %v3162_v0 }
 0x856   : > { %3253 = vst [vmem:[%s6151_s25 + $0x78] sm:$0xff] %v3171_v10 }
 0x857   : > { %3251 = vst [vmem:[%s6151_s25 + $0x68] sm:$0xff] %v3163_v38 }
 0x861   : > { %v4054_v39 = vpop.f32.mrb[168].mxu1 }
 0x862   : > { %v3184_v12 = vadd.f32 %v4054_v39, %v6147_v56  ;;  %v3175_v4 = vpop.f32.mrb[169].mxu1 }
 0x863   : > { %v3176_v28 = vadd.f32 %v6147_v56, %v3175_v4  ;;  %v4055_v22 = vpop.f32.mrb[170].mxu1 }
 0x864   : > { %3256 = vst [vmem:[%s6151_s25 + $0x90] sm:$0xff] %v3184_v12  ;;  %v3187_v13 = vadd.f32 %v4055_v22, %v6147_v56  ;;  %v3178_v55 = vpop.f32.mrb[171].mxu1 }
 0x865   : > { %3254 = vst [vmem:[%s6151_s25 + $0x80] sm:$0xff] %v3176_v28  ;;  %v3179_v45 = vadd.f32 %v6147_v56, %v3178_v55 }
 0x866   : > { %3257 = vst [vmem:[%s6151_s25 + $0x98] sm:$0xff] %v3187_v13 }
 0x867   : > { %3255 = vst [vmem:[%s6151_s25 + $0x88] sm:$0xff] %v3179_v45 }
 0x871   : > { %v4058_v37 = vpop.f32.mrb[172].mxu1 }
 0x872   : > { %v3200_v36 = vadd.f32 %v4058_v37, %v6147_v56  ;;  %v3191_v42 = vpop.f32.mrb[173].mxu1 }
 0x873   : > { %v3192_v8 = vadd.f32 %v6147_v56, %v3191_v42  ;;  %v4059_v61 = vpop.f32.mrb[174].mxu1 }
 0x874   : > { %3260 = vst [vmem:[%s6151_s25 + $0xb0] sm:$0xff] %v3200_v36  ;;  %v3203_v63 = vadd.f32 %v4059_v61, %v6147_v56  ;;  %v3194_v51 = vpop.f32.mrb[175].mxu1 }
 0x875   : > { %3258 = vst [vmem:[%s6151_s25 + $0xa0] sm:$0xff] %v3192_v8  ;;  %v3195_v24 = vadd.f32 %v6147_v56, %v3194_v51 }
 0x876   : > { %3261 = vst [vmem:[%s6151_s25 + $0xb8] sm:$0xff] %v3203_v63 }
 0x877   : > { %3259 = vst [vmem:[%s6151_s25 + $0xa8] sm:$0xff] %v3195_v24 }
 0x881   : > { %v4062_v50 = vpop.f32.mrb[176].mxu1 }
 0x882   : > { %v3216_v35 = vadd.f32 %v4062_v50, %v6147_v56  ;;  %v3207_v40 = vpop.f32.mrb[177].mxu1 }
 0x883   : > { %v3208_v16 = vadd.f32 %v6147_v56, %v3207_v40  ;;  %v4063_v34 = vpop.f32.mrb[178].mxu1 }
 0x884   : > { %3264 = vst [vmem:[%s6151_s25 + $0xd0] sm:$0xff] %v3216_v35  ;;  %v3219_v19 = vadd.f32 %v4063_v34, %v6147_v56  ;;  %v3210_v54 = vpop.f32.mrb[179].mxu1 }
 0x885   : > { %3262 = vst [vmem:[%s6151_s25 + $0xc0] sm:$0xff] %v3208_v16  ;;  %v3211_v18 = vadd.f32 %v6147_v56, %v3210_v54 }
 0x886   : > { %3265 = vst [vmem:[%s6151_s25 + $0xd8] sm:$0xff] %v3219_v19 }
 0x887   : > { %3263 = vst [vmem:[%s6151_s25 + $0xc8] sm:$0xff] %v3211_v18 }
 0x891   : > { %v4066_v29 = vpop.f32.mrb[180].mxu1 }
 0x892   : > { %v3232_v49 = vadd.f32 %v4066_v29, %v6147_v56  ;;  %v3223_v21 = vpop.f32.mrb[181].mxu1 }
 0x893   : > { %v3224_v25 = vadd.f32 %v6147_v56, %v3223_v21  ;;  %v4067_v43 = vpop.f32.mrb[182].mxu1 }
 0x894   : > { %3268 = vst [vmem:[%s6151_s25 + $0xf0] sm:$0xff] %v3232_v49  ;;  %v3235_v47 = vadd.f32 %v4067_v43, %v6147_v56  ;;  %v3226_v44 = vpop.f32.mrb[183].mxu1 }
 0x895   : > { %3266 = vst [vmem:[%s6151_s25 + $0xe0] sm:$0xff] %v3224_v25  ;;  %v3227_v27 = vadd.f32 %v6147_v56, %v3226_v44 }
 0x896   : > { %3269 = vst [vmem:[%s6151_s25 + $0xf8] sm:$0xff] %v3235_v47 }
 0x897   : > { %3267 = vst [vmem:[%s6151_s25 + $0xe8] sm:$0xff] %v3227_v27 }
 0x898   : > { %4824 = shalt.err (!%p4821_p3)
}
 0x899   : > { %s4825_s15 = scalar_lea.hbm %s6216_s3, 4096  ;;  %s4829_s11 = scalar_lea.hbm %s6389_s2, 65536 }
 0x89a   : > { %p4826_p5 = scmp.ne.s32.totalorder %s6216_s3, %s4825_s15  ;;  %p4830_p4 = scmp.lt.u32.totalorder %s6216_s3, %s6389_s2 }
 0x89b   : > { %p4831_p10 = scmp.lt.u32.totalorder %s4829_s11, %s4825_s15  ;;  %p4833_p11 = scmp.lt.u32.totalorder %s4825_s15, %s6216_s3 }
 0x89c   : > { %p4827_p2 = pnand %p4826_p5, %p6390_p12 }
 0x89d   : > { %p4832_p1 = por %p4831_p10, %p4830_p4 }
 0x89e   : > { %p4828_p0 = pneg %p4827_p2 }
 0x89f   : > { %p4834_p13 = por %p4833_p11, %p4832_p1 }
 0x8a1   : > { %p4835_p7 = pnand %p4834_p13, %p4828_p0 }
 0x8a3   : > { %4838 = shalt.err (!%p4835_p7)
}
 0x8a4   : > { %s4920_s26 = smov 128   ;;  %s4921_s21 = smov 8  }
 0x8a5   : > { %4257 = dma.vmem_to_hbm [thread:$0]  (%p6390_p12), %s6218_s27, 4096, %s6216_s3, %s3271_s23, %s4920_s26, %s4920_s26, %s4921_s21  }
 0x8a6 PF: > { %p4319_p6 = scmp.ge.s32.totalorder %s4897_s20, 2  ;;  %s3299_s28 = sand.u32 1, %s4885_s17  }
 0x8a7   : > { %p6391_p8 = scmp.ne.s32.totalorder %s6336_s30, 0  ;;  %s3300_s29 = scalar_lea.sflag [#allocation4], %s3299_s28 }
 0x8a9   : > { %p4295_p9 = pnand %p4319_p6, %p6391_p8 }
 0x8ab   : > { %4880 = dma.done.wait (!%p4295_p9), %s3300_s29, 4096  }
 0x8ac   : > { %4882 = vsyncadd (!%p4295_p9), %s3300_s29, 4294963200  ;;  %p29_p3 = scmp.ge.s32.totalorder %s5245_s16, 18   ;;  %s6392_s17 = smov %s4889_s18 }
 0x8ad   : > { %s6393_s18 = smov %s4893_s19  ;;  %s6394_s19 = smov %s5256_s12 }
 0x8ae   : > { %s6395_s20 = smov %s5245_s16  ;;  %31 = sbr.rel (!%p29_p3) target bundleno = 16 (0x10), region = 153 }
 0x8b5   :  { %3305 = vsyncpa [#allocation3], 1 }
 0x8b6   :  { %3307 = vsyncpa [#allocation3 + $0x1], 1 }
 0x8b7   :  { %3308 = vsyncpa [#allocation6], 1 }
 0x8b8   :  { %3309 = vsyncpa [#allocation9], 1 }
 0x8b9   :  { %3310 = vsyncpa [#allocation12], 1 }
 0x8ba   :  { %3311 = vsyncpa [#allocation15], 1 }
 0x8bb   :  { %3312 = vsyncpa [#allocation18], 1 }
 0x8bc   :  { %3313 = vsyncpa [#allocation4], 1 }
 0x8bd   :  { %3315 = vsyncpa [#allocation4 + $0x1], 1 }

</bundles_post_ra>
